<compile_context>
chip_gen: v5e
topology: v5e:2x2
jax: 0.10.0
libtpu: 0.0.40
codegen_flags: <defaults>
</compile_context>

<pallas_src>
import math
import functools

import jax
import jax.numpy as jnp
from jax.experimental import pallas as pl
from jax.experimental.pallas import tpu as pltpu


def user_encoder_kernel(news_ref, mask_ref, pad_ref,
                        wqkv_ref, bqkv_ref,
                        w1_ref, b1_ref, w2_ref, b2_ref,
                        out_ref, *, bt, seq_len, n_heads, d_k, d_v):
    L = seq_len
    HK = n_heads * d_k
    HV = n_heads * d_v

    x = news_ref[...]          # (BT*L, D)
    m = mask_ref[...]          # (BT*L, 1)
    pad = pad_ref[...]         # (1, D)

    # news_vecs = news * mask + pad_doc * (1 - mask)
    xm = x * m + pad * (1.0 - m)                                   # (BT*L, D)

    # Fused Q/K/V projection: weights pre-transposed to (D, 2*HK + HV).
    qkv = jnp.dot(xm, wqkv_ref[...],
                  preferred_element_type=jnp.float32) + bqkv_ref[...]   # (BT*L, 2*HK+HV)
    q_all = qkv[:, :HK].reshape(bt, L, HK)                         # (BT, L, H*d_k)
    k_all = qkv[:, HK:2 * HK].reshape(bt, L, HK)
    v_all = qkv[:, 2 * HK:2 * HK + HV].reshape(bt, L, HV)

    inv_sqrt_dk = 1.0 / math.sqrt(d_k)

    # Multi-head self attention (exp-normalized, no max subtraction — matches ref).
    # Per-head loop only for the tiny (L, L) score / attn@V step; projections are fused.
    ctx_heads = []
    for h in range(n_heads):
        q_h = q_all[:, :, h * d_k:(h + 1) * d_k]                   # (BT, L, d_k)
        k_h = k_all[:, :, h * d_k:(h + 1) * d_k]                   # (BT, L, d_k)
        v_h = v_all[:, :, h * d_v:(h + 1) * d_v]                   # (BT, L, d_v)

        scores = jnp.einsum('bld,bmd->blm', q_h, k_h,
                            preferred_element_type=jnp.float32) * inv_sqrt_dk
        scores = jnp.exp(scores)
        attn = scores / (jnp.sum(scores, axis=-1, keepdims=True) + 1e-8)
        ctx_heads.append(jnp.einsum('blm,bmd->bld', attn, v_h,
                                    preferred_element_type=jnp.float32))  # (BT, L, d_v)

    ctx = jnp.concatenate(ctx_heads, axis=-1)                      # (BT, L, emb)
    emb = HV

    # Attention pooling (flattened to keep the matmul M-dimension large).
    ctx2 = ctx.reshape(bt * L, emb)                                # (BT*L, emb)
    e = jnp.tanh(jnp.dot(ctx2, w1_ref[...],
                         preferred_element_type=jnp.float32) + b1_ref[...])   # (BT*L, hidden)
    # Output width 1: VPU broadcast-multiply + lane reduce instead of an MXU matmul.
    alpha_logit = jnp.sum(e * w2_ref[...], axis=-1, keepdims=True) + b2_ref[...]  # (BT*L, 1)
    alpha = jnp.exp(alpha_logit).reshape(bt, L, 1)
    alpha = alpha / (jnp.sum(alpha, axis=1, keepdims=True) + 1e-8)

    out_ref[...] = jnp.sum(ctx * alpha, axis=1)                    # (BT, emb) lane-dense slab


def user_encoder(news_vecs, log_mask, params, *, n_heads, d_k, d_v, hidden,
                 batch_tile=8):
    B, L, D = news_vecs.shape
    emb = n_heads * d_v

    # BT must keep the (BT, emb) output block sublane-aligned -> multiple of 8.
    BT = max(8, (batch_tile // 8) * 8)
    Bp = ((B + BT - 1) // BT) * BT
    grid = Bp // BT

    news_f32 = news_vecs.astype(jnp.float32)
    mask_f32 = log_mask.astype(jnp.float32)
    if Bp != B:
        news_f32 = jnp.pad(news_f32, ((0, Bp - B), (0, 0), (0, 0)))
        mask_f32 = jnp.pad(mask_f32, ((0, Bp - B), (0, 0)))

    # Flatten batch*history so projections see a large M dimension.
    news_flat = news_f32.reshape(Bp * L, D)
    mask_flat = mask_f32.reshape(Bp * L, 1)

    # Consolidated, pre-transposed parameters (host/XLA side, free).
    wqkv_t = jnp.concatenate([params["W_Q"], params["W_K"], params["W_V"]],
                             axis=0).T.astype(jnp.float32)          # (D, 2*H*d_k + H*d_v)
    bqkv = jnp.concatenate([params["b_Q"], params["b_K"], params["b_V"]],
                           axis=1).astype(jnp.float32)              # (1, 2*H*d_k + H*d_v)
    w1_t = params["att_W1"].T.astype(jnp.float32)                   # (emb, hidden)
    pad_doc = params["pad_doc"].astype(jnp.float32)                 # (1, D)
    b1 = params["att_b1"].astype(jnp.float32)                       # (1, hidden)
    w2 = params["att_W2"].astype(jnp.float32)                       # (1, hidden)
    b2 = params["att_b2"].astype(jnp.float32)                       # (1, 1)

    full2d = lambda arr: pl.BlockSpec(arr.shape, lambda b: (0, 0))

    kernel = functools.partial(user_encoder_kernel, bt=BT, seq_len=L,
                               n_heads=n_heads, d_k=d_k, d_v=d_v)

    out = pl.pallas_call(
        kernel,
        out_shape=jax.ShapeDtypeStruct((Bp, emb), jnp.float32),
        grid=(grid,),
        in_specs=[
            pl.BlockSpec((BT * L, D), lambda b: (b, 0)),   # news (flattened)
            pl.BlockSpec((BT * L, 1), lambda b: (b, 0)),   # log_mask (flattened)
            full2d(pad_doc),
            full2d(wqkv_t), full2d(bqkv),
            full2d(w1_t), full2d(b1),
            full2d(w2), full2d(b2),
        ],
        out_specs=pl.BlockSpec((BT, emb), lambda b: (b, 0)),
        compiler_params=pltpu.CompilerParams(dimension_semantics=("parallel",)),
    )(news_flat, mask_flat, pad_doc, wqkv_t, bqkv, w1_t, b1, w2, b2)

    return out[:B]


def user_encoder_ref(news_vecs, log_mask, params, *, n_heads, d_k, d_v):
    """Plain-JAX reference mirroring the PyTorch forward."""
    B, L, D = news_vecs.shape
    m = log_mask[..., None].astype(jnp.float32)
    x = news_vecs * m + params["pad_doc"][None] * (1.0 - m)      # (B, L, D)

    def proj(W, b, d):
        y = jnp.einsum("bld,ed->ble", x, W) + b                   # (B, L, H*d)
        return y.reshape(B, L, n_heads, d).transpose(0, 2, 1, 3)  # (B, H, L, d)

    q = proj(params["W_Q"], params["b_Q"], d_k)
    k = proj(params["W_K"], params["b_K"], d_k)
    v = proj(params["W_V"], params["b_V"], d_v)

    scores = jnp.exp(jnp.einsum("bhld,bhmd->bhlm", q, k) / math.sqrt(d_k))
    attn = scores / (jnp.sum(scores, axis=-1, keepdims=True) + 1e-8)
    ctx = jnp.einsum("bhlm,bhmd->bhld", attn, v)                  # (B, H, L, d_v)
    ctx = ctx.transpose(0, 2, 1, 3).reshape(B, L, n_heads * d_v)  # (B, L, H*d_v)

    e = jnp.tanh(jnp.einsum("ble,he->blh", ctx, params["att_W1"]) + params["att_b1"])
    alpha = jnp.exp(jnp.einsum("blh,oh->blo", e, params["att_W2"]) + params["att_b2"])
    alpha = alpha / (jnp.sum(alpha, axis=1, keepdims=True) + 1e-8)
    return jnp.sum(ctx * alpha, axis=1)                           # (B, H*d_v)


if __name__ == "__main__":
    # args: model='NRMS', user_log_mask=False, news_dim=32,
    #       num_attention_heads=4 (d_k=d_v=16), user_query_vector_dim=32,
    #       user_log_length=8
    B, L, D = 16, 8, 32
    n_heads, d_k, d_v, hidden = 4, 16, 16, 32
    emb = n_heads * d_v

    key = jax.random.PRNGKey(0)
    ks = jax.random.split(key, 12)

    params = {
        "pad_doc": jax.random.uniform(ks[0], (1, D), jnp.float32, -1.0, 1.0),
        "W_Q": jax.random.normal(ks[1], (n_heads * d_k, D), jnp.float32) * 0.1,
        "b_Q": jax.random.normal(ks[2], (1, n_heads * d_k), jnp.float32) * 0.01,
        "W_K": jax.random.normal(ks[3], (n_heads * d_k, D), jnp.float32) * 0.1,
        "b_K": jax.random.normal(ks[4], (1, n_heads * d_k), jnp.float32) * 0.01,
        "W_V": jax.random.normal(ks[5], (n_heads * d_v, D), jnp.float32) * 0.1,
        "b_V": jax.random.normal(ks[6], (1, n_heads * d_v), jnp.float32) * 0.01,
        "att_W1": jax.random.normal(ks[7], (hidden, emb), jnp.float32) * 0.1,
        "att_b1": jax.random.normal(ks[8], (1, hidden), jnp.float32) * 0.01,
        "att_W2": jax.random.normal(ks[9], (1, hidden), jnp.float32) * 0.1,
        "att_b2": jax.random.normal(ks[10], (1, 1), jnp.float32) * 0.01,
    }

    news_vecs = jax.random.normal(ks[11], (B, L, D), jnp.float32)
    log_mask = (jax.random.uniform(jax.random.PRNGKey(1), (B, L)) > 0.3).astype(jnp.float32)

    out = user_encoder(news_vecs, log_mask, params,
                       n_heads=n_heads, d_k=d_k, d_v=d_v, hidden=hidden,
                       batch_tile=8)
    out = jax.block_until_ready(out)

    ref = user_encoder_ref(news_vecs, log_mask, params,
                           n_heads=n_heads, d_k=d_k, d_v=d_v)
    assert out.shape == (B, emb)
    assert jnp.allclose(out, ref, rtol=1e-4, atol=1e-5), "mismatch vs JAX reference"

    print("KERNEL_OK")
</pallas_src>

<mosaic_0001>
module attributes {stable_mosaic.version = 11 : i64} {
  func.func @user_encoder_kernel(%arg0: i32, %arg1: memref<64x32xf32, #tpu.memory_space<vmem>>, %arg2: memref<64x1xf32, #tpu.memory_space<vmem>>, %arg3: memref<1x32xf32, #tpu.memory_space<vmem>>, %arg4: memref<32x192xf32, #tpu.memory_space<vmem>>, %arg5: memref<1x192xf32, #tpu.memory_space<vmem>>, %arg6: memref<64x32xf32, #tpu.memory_space<vmem>>, %arg7: memref<1x32xf32, #tpu.memory_space<vmem>>, %arg8: memref<1x32xf32, #tpu.memory_space<vmem>>, %arg9: memref<1x1xf32, #tpu.memory_space<vmem>>, %arg10: memref<8x64xf32, #tpu.memory_space<vmem>>) attributes {dimension_semantics = [#tpu.dimension_semantics<parallel>], iteration_bounds = array<i64: 2>, scalar_prefetch = 0 : i64, scratch_operands = 0 : i64, tpu.core_type = #tpu.core_type<tc>, window_params = [{transform_indices = @transform_0, window_bounds = array<i64: 64, 32>}, {transform_indices = @transform_1, window_bounds = array<i64: 64, 1>}, {pipeline_mode = #tpu.pipeline_mode<synchronous>, transform_indices = @transform_2, window_bounds = array<i64: 1, 32>}, {pipeline_mode = #tpu.pipeline_mode<synchronous>, transform_indices = @transform_3, window_bounds = array<i64: 32, 192>}, {pipeline_mode = #tpu.pipeline_mode<synchronous>, transform_indices = @transform_4, window_bounds = array<i64: 1, 192>}, {pipeline_mode = #tpu.pipeline_mode<synchronous>, transform_indices = @transform_5, window_bounds = array<i64: 64, 32>}, {pipeline_mode = #tpu.pipeline_mode<synchronous>, transform_indices = @transform_6, window_bounds = array<i64: 1, 32>}, {pipeline_mode = #tpu.pipeline_mode<synchronous>, transform_indices = @transform_7, window_bounds = array<i64: 1, 32>}, {pipeline_mode = #tpu.pipeline_mode<synchronous>, transform_indices = @transform_8, window_bounds = array<i64: 1, 1>}, {transform_indices = @transform_9, window_bounds = array<i64: 8, 64>}]} {
    %c0 = arith.constant 0 : index
    %c0_0 = arith.constant 0 : index
    %0 = vector.load %arg1[%c0, %c0_0] : memref<64x32xf32, #tpu.memory_space<vmem>>, vector<64x32xf32>
    %c0_1 = arith.constant 0 : index
    %c0_2 = arith.constant 0 : index
    %1 = vector.load %arg2[%c0_1, %c0_2] : memref<64x1xf32, #tpu.memory_space<vmem>>, vector<64x1xf32>
    %c0_3 = arith.constant 0 : index
    %c0_4 = arith.constant 0 : index
    %2 = vector.load %arg3[%c0_3, %c0_4] : memref<1x32xf32, #tpu.memory_space<vmem>>, vector<1x32xf32>
    %3 = vector.broadcast %1 : vector<64x1xf32> to vector<64x32xf32>
    %4 = arith.mulf %0, %3 : vector<64x32xf32>
    %cst = arith.constant 1.000000e+00 : f32
    %5 = vector.broadcast %cst : f32 to vector<64x1xf32>
    %6 = arith.subf %5, %1 : vector<64x1xf32>
    %7 = vector.broadcast %2 : vector<1x32xf32> to vector<64x32xf32>
    %8 = vector.broadcast %6 : vector<64x1xf32> to vector<64x32xf32>
    %9 = arith.mulf %7, %8 : vector<64x32xf32>
    %10 = arith.addf %4, %9 : vector<64x32xf32>
    %c0_5 = arith.constant 0 : index
    %c0_6 = arith.constant 0 : index
    %11 = vector.load %arg4[%c0_5, %c0_6] : memref<32x192xf32, #tpu.memory_space<vmem>>, vector<32x192xf32>
    %cst_7 = arith.constant dense<0.000000e+00> : vector<64x192xf32>
    %12 = tpu.matmul %10, %11, %cst_7 {dimension_numbers = #tpu.dot_dimension_numbers<[1], [0], [0], [1], [0, 0, 1, 1], [], []>} : vector<64x32xf32>, vector<32x192xf32>, vector<64x192xf32> -> vector<64x192xf32>
    %c0_8 = arith.constant 0 : index
    %c0_9 = arith.constant 0 : index
    %13 = vector.load %arg5[%c0_8, %c0_9] : memref<1x192xf32, #tpu.memory_space<vmem>>, vector<1x192xf32>
    %14 = vector.broadcast %13 : vector<1x192xf32> to vector<64x192xf32>
    %15 = arith.addf %12, %14 : vector<64x192xf32>
    %16 = vector.extract_strided_slice %15 {offsets = [0, 0], sizes = [64, 64], strides = [1, 1]} : vector<64x192xf32> to vector<64x64xf32>
    %17 = vector.shape_cast %16 : vector<64x64xf32> to vector<8x8x64xf32>
    %18 = vector.extract_strided_slice %15 {offsets = [0, 64], sizes = [64, 64], strides = [1, 1]} : vector<64x192xf32> to vector<64x64xf32>
    %19 = vector.shape_cast %18 : vector<64x64xf32> to vector<8x8x64xf32>
    %20 = vector.extract_strided_slice %15 {offsets = [0, 128], sizes = [64, 64], strides = [1, 1]} : vector<64x192xf32> to vector<64x64xf32>
    %21 = vector.shape_cast %20 : vector<64x64xf32> to vector<8x8x64xf32>
    %22 = vector.extract_strided_slice %17 {offsets = [0, 0, 0], sizes = [8, 8, 16], strides = [1, 1, 1]} : vector<8x8x64xf32> to vector<8x8x16xf32>
    %23 = vector.extract_strided_slice %19 {offsets = [0, 0, 0], sizes = [8, 8, 16], strides = [1, 1, 1]} : vector<8x8x64xf32> to vector<8x8x16xf32>
    %24 = vector.extract_strided_slice %21 {offsets = [0, 0, 0], sizes = [8, 8, 16], strides = [1, 1, 1]} : vector<8x8x64xf32> to vector<8x8x16xf32>
    "tpu.trace_start"() <{level = 10 : i32, message = "bld,bmd->blm"}> : () -> ()
    %cst_10 = arith.constant dense<0.000000e+00> : vector<8x8x8xf32>
    %25 = tpu.matmul %22, %23, %cst_10 {dimension_numbers = #tpu.dot_dimension_numbers<[2], [2], [1], [1], [0, 0, 0, 1, 1, 1], [0], [0]>} : vector<8x8x16xf32>, vector<8x8x16xf32>, vector<8x8x8xf32> -> vector<8x8x8xf32>
    "tpu.trace_stop"() : () -> ()
    %cst_11 = arith.constant 2.500000e-01 : f32
    %26 = vector.broadcast %cst_11 : f32 to vector<8x8x8xf32>
    %27 = arith.mulf %25, %26 : vector<8x8x8xf32>
    %28 = math.exp %27 : vector<8x8x8xf32>
    %cst_12 = arith.constant dense<0.000000e+00> : vector<8x8xf32>
    %29 = vector.multi_reduction <add>, %28, %cst_12 [2] : vector<8x8x8xf32> to vector<8x8xf32>
    %30 = vector.shape_cast %29 : vector<8x8xf32> to vector<8x8x1xf32>
    %cst_13 = arith.constant 9.99999993E-9 : f32
    %31 = vector.broadcast %cst_13 : f32 to vector<8x8x1xf32>
    %32 = arith.addf %30, %31 : vector<8x8x1xf32>
    %33 = vector.broadcast %32 : vector<8x8x1xf32> to vector<8x8x8xf32>
    %34 = arith.divf %28, %33 : vector<8x8x8xf32>
    "tpu.trace_start"() <{level = 10 : i32, message = "blm,bmd->bld"}> : () -> ()
    %cst_14 = arith.constant dense<0.000000e+00> : vector<8x8x16xf32>
    %35 = tpu.matmul %34, %24, %cst_14 {dimension_numbers = #tpu.dot_dimension_numbers<[2], [1], [1], [2], [0, 0, 0, 1, 1, 2], [0], [0]>} : vector<8x8x8xf32>, vector<8x8x16xf32>, vector<8x8x16xf32> -> vector<8x8x16xf32>
    "tpu.trace_stop"() : () -> ()
    %36 = vector.extract_strided_slice %17 {offsets = [0, 0, 16], sizes = [8, 8, 16], strides = [1, 1, 1]} : vector<8x8x64xf32> to vector<8x8x16xf32>
    %37 = vector.extract_strided_slice %19 {offsets = [0, 0, 16], sizes = [8, 8, 16], strides = [1, 1, 1]} : vector<8x8x64xf32> to vector<8x8x16xf32>
    %38 = vector.extract_strided_slice %21 {offsets = [0, 0, 16], sizes = [8, 8, 16], strides = [1, 1, 1]} : vector<8x8x64xf32> to vector<8x8x16xf32>
    "tpu.trace_start"() <{level = 10 : i32, message = "bld,bmd->blm"}> : () -> ()
    %cst_15 = arith.constant dense<0.000000e+00> : vector<8x8x8xf32>
    %39 = tpu.matmul %36, %37, %cst_15 {dimension_numbers = #tpu.dot_dimension_numbers<[2], [2], [1], [1], [0, 0, 0, 1, 1, 1], [0], [0]>} : vector<8x8x16xf32>, vector<8x8x16xf32>, vector<8x8x8xf32> -> vector<8x8x8xf32>
    "tpu.trace_stop"() : () -> ()
    %cst_16 = arith.constant 2.500000e-01 : f32
    %40 = vector.broadcast %cst_16 : f32 to vector<8x8x8xf32>
    %41 = arith.mulf %39, %40 : vector<8x8x8xf32>
    %42 = math.exp %41 : vector<8x8x8xf32>
    %cst_17 = arith.constant dense<0.000000e+00> : vector<8x8xf32>
    %43 = vector.multi_reduction <add>, %42, %cst_17 [2] : vector<8x8x8xf32> to vector<8x8xf32>
    %44 = vector.shape_cast %43 : vector<8x8xf32> to vector<8x8x1xf32>
    %cst_18 = arith.constant 9.99999993E-9 : f32
    %45 = vector.broadcast %cst_18 : f32 to vector<8x8x1xf32>
    %46 = arith.addf %44, %45 : vector<8x8x1xf32>
    %47 = vector.broadcast %46 : vector<8x8x1xf32> to vector<8x8x8xf32>
    %48 = arith.divf %42, %47 : vector<8x8x8xf32>
    "tpu.trace_start"() <{level = 10 : i32, message = "blm,bmd->bld"}> : () -> ()
    %cst_19 = arith.constant dense<0.000000e+00> : vector<8x8x16xf32>
    %49 = tpu.matmul %48, %38, %cst_19 {dimension_numbers = #tpu.dot_dimension_numbers<[2], [1], [1], [2], [0, 0, 0, 1, 1, 2], [0], [0]>} : vector<8x8x8xf32>, vector<8x8x16xf32>, vector<8x8x16xf32> -> vector<8x8x16xf32>
    "tpu.trace_stop"() : () -> ()
    %50 = vector.extract_strided_slice %17 {offsets = [0, 0, 32], sizes = [8, 8, 16], strides = [1, 1, 1]} : vector<8x8x64xf32> to vector<8x8x16xf32>
    %51 = vector.extract_strided_slice %19 {offsets = [0, 0, 32], sizes = [8, 8, 16], strides = [1, 1, 1]} : vector<8x8x64xf32> to vector<8x8x16xf32>
    %52 = vector.extract_strided_slice %21 {offsets = [0, 0, 32], sizes = [8, 8, 16], strides = [1, 1, 1]} : vector<8x8x64xf32> to vector<8x8x16xf32>
    "tpu.trace_start"() <{level = 10 : i32, message = "bld,bmd->blm"}> : () -> ()
    %cst_20 = arith.constant dense<0.000000e+00> : vector<8x8x8xf32>
    %53 = tpu.matmul %50, %51, %cst_20 {dimension_numbers = #tpu.dot_dimension_numbers<[2], [2], [1], [1], [0, 0, 0, 1, 1, 1], [0], [0]>} : vector<8x8x16xf32>, vector<8x8x16xf32>, vector<8x8x8xf32> -> vector<8x8x8xf32>
    "tpu.trace_stop"() : () -> ()
    %cst_21 = arith.constant 2.500000e-01 : f32
    %54 = vector.broadcast %cst_21 : f32 to vector<8x8x8xf32>
    %55 = arith.mulf %53, %54 : vector<8x8x8xf32>
    %56 = math.exp %55 : vector<8x8x8xf32>
    %cst_22 = arith.constant dense<0.000000e+00> : vector<8x8xf32>
    %57 = vector.multi_reduction <add>, %56, %cst_22 [2] : vector<8x8x8xf32> to vector<8x8xf32>
    %58 = vector.shape_cast %57 : vector<8x8xf32> to vector<8x8x1xf32>
    %cst_23 = arith.constant 9.99999993E-9 : f32
    %59 = vector.broadcast %cst_23 : f32 to vector<8x8x1xf32>
    %60 = arith.addf %58, %59 : vector<8x8x1xf32>
    %61 = vector.broadcast %60 : vector<8x8x1xf32> to vector<8x8x8xf32>
    %62 = arith.divf %56, %61 : vector<8x8x8xf32>
    "tpu.trace_start"() <{level = 10 : i32, message = "blm,bmd->bld"}> : () -> ()
    %cst_24 = arith.constant dense<0.000000e+00> : vector<8x8x16xf32>
    %63 = tpu.matmul %62, %52, %cst_24 {dimension_numbers = #tpu.dot_dimension_numbers<[2], [1], [1], [2], [0, 0, 0, 1, 1, 2], [0], [0]>} : vector<8x8x8xf32>, vector<8x8x16xf32>, vector<8x8x16xf32> -> vector<8x8x16xf32>
    "tpu.trace_stop"() : () -> ()
    %64 = vector.extract_strided_slice %17 {offsets = [0, 0, 48], sizes = [8, 8, 16], strides = [1, 1, 1]} : vector<8x8x64xf32> to vector<8x8x16xf32>
    %65 = vector.extract_strided_slice %19 {offsets = [0, 0, 48], sizes = [8, 8, 16], strides = [1, 1, 1]} : vector<8x8x64xf32> to vector<8x8x16xf32>
    %66 = vector.extract_strided_slice %21 {offsets = [0, 0, 48], sizes = [8, 8, 16], strides = [1, 1, 1]} : vector<8x8x64xf32> to vector<8x8x16xf32>
    "tpu.trace_start"() <{level = 10 : i32, message = "bld,bmd->blm"}> : () -> ()
    %cst_25 = arith.constant dense<0.000000e+00> : vector<8x8x8xf32>
    %67 = tpu.matmul %64, %65, %cst_25 {dimension_numbers = #tpu.dot_dimension_numbers<[2], [2], [1], [1], [0, 0, 0, 1, 1, 1], [0], [0]>} : vector<8x8x16xf32>, vector<8x8x16xf32>, vector<8x8x8xf32> -> vector<8x8x8xf32>
    "tpu.trace_stop"() : () -> ()
    %cst_26 = arith.constant 2.500000e-01 : f32
    %68 = vector.broadcast %cst_26 : f32 to vector<8x8x8xf32>
    %69 = arith.mulf %67, %68 : vector<8x8x8xf32>
    %70 = math.exp %69 : vector<8x8x8xf32>
    %cst_27 = arith.constant dense<0.000000e+00> : vector<8x8xf32>
    %71 = vector.multi_reduction <add>, %70, %cst_27 [2] : vector<8x8x8xf32> to vector<8x8xf32>
    %72 = vector.shape_cast %71 : vector<8x8xf32> to vector<8x8x1xf32>
    %cst_28 = arith.constant 9.99999993E-9 : f32
    %73 = vector.broadcast %cst_28 : f32 to vector<8x8x1xf32>
    %74 = arith.addf %72, %73 : vector<8x8x1xf32>
    %75 = vector.broadcast %74 : vector<8x8x1xf32> to vector<8x8x8xf32>
    %76 = arith.divf %70, %75 : vector<8x8x8xf32>
    "tpu.trace_start"() <{level = 10 : i32, message = "blm,bmd->bld"}> : () -> ()
    %cst_29 = arith.constant dense<0.000000e+00> : vector<8x8x16xf32>
    %77 = tpu.matmul %76, %66, %cst_29 {dimension_numbers = #tpu.dot_dimension_numbers<[2], [1], [1], [2], [0, 0, 0, 1, 1, 2], [0], [0]>} : vector<8x8x8xf32>, vector<8x8x16xf32>, vector<8x8x16xf32> -> vector<8x8x16xf32>
    "tpu.trace_stop"() : () -> ()
    %78 = tpu.concatenate %35, %49, %63, %77 in 2 : vector<8x8x16xf32>, vector<8x8x16xf32>, vector<8x8x16xf32>, vector<8x8x16xf32> -> vector<8x8x64xf32>
    %79 = vector.shape_cast %78 : vector<8x8x64xf32> to vector<64x64xf32>
    %c0_30 = arith.constant 0 : index
    %c0_31 = arith.constant 0 : index
    %80 = vector.load %arg6[%c0_30, %c0_31] : memref<64x32xf32, #tpu.memory_space<vmem>>, vector<64x32xf32>
    %cst_32 = arith.constant dense<0.000000e+00> : vector<64x32xf32>
    %81 = tpu.matmul %79, %80, %cst_32 {dimension_numbers = #tpu.dot_dimension_numbers<[1], [0], [0], [1], [0, 0, 1, 1], [], []>} : vector<64x64xf32>, vector<64x32xf32>, vector<64x32xf32> -> vector<64x32xf32>
    %c0_33 = arith.constant 0 : index
    %c0_34 = arith.constant 0 : index
    %82 = vector.load %arg7[%c0_33, %c0_34] : memref<1x32xf32, #tpu.memory_space<vmem>>, vector<1x32xf32>
    %83 = vector.broadcast %82 : vector<1x32xf32> to vector<64x32xf32>
    %84 = arith.addf %81, %83 : vector<64x32xf32>
    %85 = math.tanh %84 : vector<64x32xf32>
    %c0_35 = arith.constant 0 : index
    %c0_36 = arith.constant 0 : index
    %86 = vector.load %arg8[%c0_35, %c0_36] : memref<1x32xf32, #tpu.memory_space<vmem>>, vector<1x32xf32>
    %87 = vector.broadcast %86 : vector<1x32xf32> to vector<64x32xf32>
    %88 = arith.mulf %85, %87 : vector<64x32xf32>
    %cst_37 = arith.constant dense<0.000000e+00> : vector<64xf32>
    %89 = vector.multi_reduction <add>, %88, %cst_37 [1] : vector<64x32xf32> to vector<64xf32>
    %90 = vector.shape_cast %89 : vector<64xf32> to vector<64x1xf32>
    %c0_38 = arith.constant 0 : index
    %c0_39 = arith.constant 0 : index
    %91 = vector.load %arg9[%c0_38, %c0_39] : memref<1x1xf32, #tpu.memory_space<vmem>>, vector<1x1xf32>
    %92 = vector.broadcast %91 : vector<1x1xf32> to vector<64x1xf32>
    %93 = arith.addf %90, %92 : vector<64x1xf32>
    %94 = math.exp %93 : vector<64x1xf32>
    %95 = vector.shape_cast %94 : vector<64x1xf32> to vector<8x8x1xf32>
    %cst_40 = arith.constant dense<0.000000e+00> : vector<8x1xf32>
    %96 = vector.multi_reduction <add>, %95, %cst_40 [1] : vector<8x8x1xf32> to vector<8x1xf32>
    %97 = vector.shape_cast %96 : vector<8x1xf32> to vector<8x1x1xf32>
    %cst_41 = arith.constant 9.99999993E-9 : f32
    %98 = vector.broadcast %cst_41 : f32 to vector<8x1x1xf32>
    %99 = arith.addf %97, %98 : vector<8x1x1xf32>
    %100 = vector.broadcast %99 : vector<8x1x1xf32> to vector<8x8x1xf32>
    %101 = arith.divf %95, %100 : vector<8x8x1xf32>
    %102 = vector.broadcast %101 : vector<8x8x1xf32> to vector<8x8x64xf32>
    %103 = arith.mulf %78, %102 : vector<8x8x64xf32>
    %cst_42 = arith.constant dense<0.000000e+00> : vector<8x64xf32>
    %104 = vector.multi_reduction <add>, %103, %cst_42 [1] : vector<8x8x64xf32> to vector<8x64xf32>
    %c0_43 = arith.constant 0 : index
    %c0_44 = arith.constant 0 : index
    %105 = vector.load %arg10[%c0_43, %c0_44] : memref<8x64xf32, #tpu.memory_space<vmem>>, vector<8x64xf32>
    tpu.vector_store %arg10[%c0_43, %c0_44], %104 {strides = array<i32>} : memref<8x64xf32, #tpu.memory_space<vmem>>, vector<8x64xf32>,
    return
  }
  func.func @transform_0(%arg0: i32) -> (i32, i32) {
    %c0_i32 = arith.constant 0 : i32
    %c0_i32_0 = arith.constant 0 : i32
    return %arg0, %c0_i32 : i32, i32
  }
  func.func @transform_1(%arg0: i32) -> (i32, i32) {
    %c0_i32 = arith.constant 0 : i32
    %c0_i32_0 = arith.constant 0 : i32
    return %arg0, %c0_i32 : i32, i32
  }
  func.func @transform_2(%arg0: i32) -> (i32, i32) {
    %c0_i32 = arith.constant 0 : i32
    %c0_i32_0 = arith.constant 0 : i32
    %c0_i32_1 = arith.constant 0 : i32
    return %c0_i32, %c0_i32_0 : i32, i32
  }
  func.func @transform_3(%arg0: i32) -> (i32, i32) {
    %c0_i32 = arith.constant 0 : i32
    %c0_i32_0 = arith.constant 0 : i32
    %c0_i32_1 = arith.constant 0 : i32
    return %c0_i32, %c0_i32_0 : i32, i32
  }
  func.func @transform_4(%arg0: i32) -> (i32, i32) {
    %c0_i32 = arith.constant 0 : i32
    %c0_i32_0 = arith.constant 0 : i32
    %c0_i32_1 = arith.constant 0 : i32
    return %c0_i32, %c0_i32_0 : i32, i32
  }
  func.func @transform_5(%arg0: i32) -> (i32, i32) {
    %c0_i32 = arith.constant 0 : i32
    %c0_i32_0 = arith.constant 0 : i32
    %c0_i32_1 = arith.constant 0 : i32
    return %c0_i32, %c0_i32_0 : i32, i32
  }
  func.func @transform_6(%arg0: i32) -> (i32, i32) {
    %c0_i32 = arith.constant 0 : i32
    %c0_i32_0 = arith.constant 0 : i32
    %c0_i32_1 = arith.constant 0 : i32
    return %c0_i32, %c0_i32_0 : i32, i32
  }
  func.func @transform_7(%arg0: i32) -> (i32, i32) {
    %c0_i32 = arith.constant 0 : i32
    %c0_i32_0 = arith.constant 0 : i32
    %c0_i32_1 = arith.constant 0 : i32
    return %c0_i32, %c0_i32_0 : i32, i32
  }
  func.func @transform_8(%arg0: i32) -> (i32, i32) {
    %c0_i32 = arith.constant 0 : i32
    %c0_i32_0 = arith.constant 0 : i32
    %c0_i32_1 = arith.constant 0 : i32
    return %c0_i32, %c0_i32_0 : i32, i32
  }
  func.func @transform_9(%arg0: i32) -> (i32, i32) {
    %c0_i32 = arith.constant 0 : i32
    %c0_i32_0 = arith.constant 0 : i32
    return %arg0, %c0_i32 : i32, i32
  }
}

</mosaic_0001>

<bundles_post_ra>
// kernel: tpu_custom_call.1
= control target key start
LH: loop header
LB: loop body
LE: loop exit
PB: predicated region body
PF: predicated region fallthrough
CT: control target
= control target key end

     0   :  { %s5321_s0 = inlined_call_operand.vmem [shape: f32[128,32], index: 0, kind: input, shape index: {}]   ;;  %s5322_s1 = inlined_call_operand.vmem [shape: f32[128,1], index: 1, kind: input, shape index: {}]   ;;  %s5323_s2 = inlined_call_operand.vmem [shape: f32[1,32], index: 2, kind: input, shape index: {}]   ;;  %s5324_s3 = inlined_call_operand.vmem [shape: f32[32,192], index: 3, kind: input, shape index: {}]   ;;  %s5325_s4 = inlined_call_operand.vmem [shape: f32[1,192], index: 4, kind: input, shape index: {}]   ;;  %s5326_s5 = inlined_call_operand.vmem [shape: f32[64,32], index: 5, kind: input, shape index: {}]   ;;  %s5327_s6 = inlined_call_operand.vmem [shape: f32[1,32], index: 6, kind: input, shape index: {}]   ;;  %s5328_s7 = inlined_call_operand.vmem [shape: f32[1,32], index: 7, kind: input, shape index: {}]   ;;  %s5329_s8 = inlined_call_operand.<no memory space> [shape: f32[1,1], index: 8, kind: input, shape index: {}]   ;;  %s5330_s9 = inlined_call_operand.hbm [shape: f32[16,64], index: 9, kind: output, shape index: {}]  }
   0x1   :  { %v14_v0 = vstv %s5329_s8 }
   0x2   :  { %15 = vst [vmem:[#allocation2] sm:$0x1] %v14_v0 }
   0x3   :  { %16 = vsyncpa [#allocation4], 0 }
   0x4   :  { %18 = vsyncpa [#allocation4 + $0x1], 0  ;;  %s4254_s11 = smov 0   ;;  %s4256_s12 = smov 0  }
   0x5   :  { %s4258_s13 = smov 0   ;;  %s4260_s14 = smov 0  }
   0x6 LB: > { %s3690_s8 = sadd.s32 4294967295, %s4191_s14   ;;  %s3691_s15 = sadd.s32 4294967294, %s4191_s14   ;;  %s4191_s14 = sphi %s4260_s14, %s5354_s14   ;;  %s4187_s13 = sphi %s4258_s13, %s5353_s13   ;;  %s4183_s12 = sphi %s4256_s12, %s5352_s12   ;;  %s4179_s11 = sphi %s4254_s11, %s5351_s11  }
   0x7   : > { %s4277_s16 = sadd.s32 1, %s4191_s14   ;;  %s230_s17 = sadd.s32 1, %s4187_s13 }
   0x8   : > { %s227_s18 = ssub.s32 %s4191_s14, %s4277_s16  ;;  %p240_p0 = scmp.ne.s32.totalorder %s4187_s13, %s4183_s12 }
   0x9   : > { %p228_p1 = scmp.eq.s32.totalorder %s227_s18, 0  ;;  %p241_p2 = scmp.eq.s32.totalorder %s3690_s8, 1 }
   0xa   : > { %p246_p3 = scmp.ne.s32.totalorder %s4183_s12, %s4179_s11  ;;  %p247_p4 = scmp.eq.s32.totalorder %s3691_s15, 1 }
   0xb   : > { %s4287_s19 = scalar_select %p228_p1, %s4187_s13, %s230_s17  }
   0xc   : > { %p4289_p5 = por %p241_p2, %p240_p0  ;;  %p4293_p6 = por %p247_p4, %p246_p3 }
   0xd   : > { %p3694_p7 = scmp.ge.s32.totalorder %s4191_s14, 1  ;;  %p304_p8 = scmp.lt.s32.totalorder %s4191_s14, 3 }
   0xf   : > { %p305_p9 = pnand %p3694_p7, %p304_p8 }
  0x10   : > { %s4299_s22 = sshll.u32 (!%p305_p9), %s3690_s8, 3  ;;  %s4195_s28 = smov (!%p305_p9), 112  }
  0x11   : > { %308 = sbr.rel (%p305_p9) target bundleno = 2606 (0xa2e), region = 56  ;;  %p346_p10 = scmp.lt.s32.totalorder (!%p305_p9), %s4299_s22, 15 }
  0x12   : > { %s4196_s29 = smov (!%p305_p9), 48   ;;  %s4199_s30 = smov (!%p305_p9), 80  }
  0x13   : > { %s4200_s10 = smov (!%p305_p9), 16   ;;  %s3615_s8 = scalar_lea.hbm (!%p305_p9), %s5330_s9, %s4299_s22 }
  0x14   : > { %s3619_s18 = sshll.u32 (!%p305_p9), %s3615_s8, 4  ;;  %s3620_s18 = int_to_ptr.hbm [resolvable:$true] %s3619_s18 }
  0x15   : > { %s4143_s25 = sshra.s32 (!%p305_p9), %s3620_s18, 4  ;;  %s4144_s25 = int_to_ptr.hbm [resolvable:$true] %s4143_s25 }
  0x16   : > { %v4193_v1 = vmov 0   ;;  %s4303_s23 = scalar_select %p346_p10, %s4299_s22, 15  ;;  %v495_v18 = vld [vmem:[%s5324_s3 + $0x30] sm:$0xff]  ;;  %v493_v19 = vld [vmem:[%s5324_s3 + $0x20] sm:$0xff]  ;;  %vm503_vm0 = vcmask 261120   ;;  %v496_v36 = vld [vmem:[%s5324_s3 + $0x38] sm:$0xff] }
  0x17   : > { %3892 = vset.pattern.permute.xlu1 %v4193_v1  ;;  %3891 = vset.pattern.permute.xlu0 %v4193_v1  ;;  %v491_v20 = vld [vmem:[%s5324_s3 + $0x10] sm:$0xff]  ;;  %v489_v21 = vld [vmem:[%s5324_s3] sm:$0xff]  ;;  %v494_v37 = vld [vmem:[%s5324_s3 + $0x28] sm:$0xff]  ;;  %vm613_vm1 = vcmask 130048   ;;  %vm851_vm2 = vcmask 64512   ;;  %p4150_p0 = scmp.lt.s32.totalorder %s4144_s25, %s5330_s9 }
  0x18   : > { %3893 = vset.pattern.permute.xlu2 %v4193_v1  ;;  %s3697_s24 = sshll.u32 %s4303_s23, 3  ;;  %540 = vmatpush.msra.mxu0 %v495_v18  ;;  %v3949_v25 = vld [vmem:[%s5323_s2] ss:$0 sm:$0xff]  ;;  %v492_v39 = vld [vmem:[%s5324_s3 + $0x18] sm:$0xff]  ;;  %v490_v43 = vld [vmem:[%s5324_s3 + $0x8] sm:$0xff]  ;;  %s4197_s23 = smov 32  }
  0x19   : > { %s355_s27 = scalar_lea.vmem %s5322_s1, %s3697_s24  ;;  %3824 = vmatpush.msra.mxu1 %v495_v18 }
  0x1a   : > { %v366_v2 = vld [vmem:[%s355_s27 + $0x8] sm:$0xff]  ;;  %v365_v3 = vld [vmem:[%s355_s27] sm:$0xff]  ;;  %v367_v4 = vld [vmem:[%s355_s27 + $0x10] sm:$0xff]  ;;  %541 = vmatpush.msra.mxu0 %v493_v19 }
  0x1b   : > { %381 = vperm.xlu1 %3892, %v366_v2   ;;  %376 = vperm.xlu0 %3891, %v365_v3   ;;  %v423_v5 = vsub.f32 1.0, %v366_v2  ;;  %v422_v6 = vsub.f32 1.0, %v365_v3  ;;  %v424_v7 = vsub.f32 1.0, %v367_v4  ;;  %v368_v8 = vld [vmem:[%s355_s27 + $0x18] sm:$0xff]  ;;  %v369_v10 = vld [vmem:[%s355_s27 + $0x20] sm:$0xff]  ;;  %v370_v12 = vld [vmem:[%s355_s27 + $0x28] sm:$0xff] }
  0x1c   : > { %386 = vperm.xlu2 %3893, %v367_v4   ;;  %v425_v9 = vsub.f32 1.0, %v368_v8  ;;  %v426_v11 = vsub.f32 1.0, %v369_v10  ;;  %v371_v13 = vld [vmem:[%s355_s27 + $0x30] sm:$0xff]  ;;  %v427_v14 = vsub.f32 1.0, %v370_v12  ;;  %v372_v16 = vld [vmem:[%s355_s27 + $0x38] sm:$0xff]  ;;  %3825 = vmatpush.msra.mxu1 %v493_v19  ;;  %s4328_s27 = scalar_lea.vmem %s5321_s0, %s3697_s24  ;;  %s4198_s24 = smov 96  }
  0x1d   : > { %v428_v15 = vsub.f32 1.0, %v371_v13  ;;  %v429_v17 = vsub.f32 1.0, %v372_v16  ;;  %542 = vmatpush.msra.mxu0 %v491_v20  ;;  %v357_v27 = vld [vmem:[%s4328_s27] sm:$0xff]  ;;  %v358_v32 = vld [vmem:[%s4328_s27 + $0x8] sm:$0xff]  ;;  %v359_v44 = vld [vmem:[%s4328_s27 + $0x10] sm:$0xff] }
  0x1e   : > { %3826 = vmatpush.msra.mxu1 %v491_v20  ;;  %v360_v51 = vld [vmem:[%s4328_s27 + $0x18] sm:$0xff]  ;;  %v363_v52 = vld [vmem:[%s4328_s27 + $0x30] sm:$0xff]  ;;  %v361_v61 = vld [vmem:[%s4328_s27 + $0x20] sm:$0xff] }
  0x1f   : > { %543 = vmatpush.msra.mxu0 %v489_v21  ;;  %v364_v63 = vld [vmem:[%s4328_s27 + $0x38] sm:$0xff] }
  0x20   : > { %3827 = vmatpush.msra.mxu1 %v489_v21 }
  0x22   : > { %581 = vmatpush.msrb.mxu1 %v496_v36 }
  0x23   : > { %440 = vperm.xlu1 %3892, %v423_v5   ;;  %435 = vperm.xlu0 %3891, %v422_v6  }
  0x24   : > { %445 = vperm.xlu2 %3893, %v424_v7   ;;  %582 = vmatpush.msrb.mxu1 %v494_v37  ;;  %v362_v7 = vld [vmem:[%s4328_s27 + $0x28] sm:$0xff]  ;;  %s4194_s27 = smov 64  }
  0x26   : > { %583 = vmatpush.msrb.mxu1 %v492_v39 }
  0x28   : > { %584 = vmatpush.msrb.mxu1 %v490_v43 }
  0x2b   : > { %450 = vperm.xlu1 %3892, %v425_v9   ;;  %391 = vperm.xlu0 %3891, %v368_v8  }
  0x2c   : > { %396 = vperm.xlu2 %3893, %v369_v10  }
  0x33   : > { %401 = vperm.xlu1 %3892, %v370_v12   ;;  %455 = vperm.xlu0 %3891, %v426_v11   ;;  %v497_v11 = vld [vmem:[%s5325_s4] sm:$0x3] }
  0x34   : > { %406 = vperm.xlu2 %3893, %v371_v13   ;;  %v499_v12 = vperm.slane %v497_v11, 0  ;;  %v4409_v36 = vperm.slane %v497_v11, 1 }
  0x3b   : > { %465 = vperm.xlu1 %3892, %v428_v15   ;;  %460 = vperm.xlu0 %3891, %v427_v14  }
  0x3c   : > { %411 = vperm.xlu2 %3893, %v372_v16  }
  0x43   : > { %470 = vperm.xlu0 %3891, %v429_v17  }
  0x76   : > { %v387_v22 = vpop.permute.xlu2 %386 }
  0x77   : > { %v416_v45 = vmul.f32 %v387_v22, %v359_v44 }
  0x7e   : > { %v446_v26 = vpop.permute.xlu2 %445 }
  0x7f   : > { %v475_v46 = vmul.f32 %v3949_v25, %v446_v26 }
  0x81   : > { %v483_v49 = vadd.f32 %v475_v46, %v416_v45 }
  0x86   : > { %v397_v38 = vpop.permute.xlu2 %396 }
  0x87   : > { %v418_v0 = vmul.f32 %v397_v38, %v361_v61 }
  0x8d   : > { %v382_v23 = vpop.permute.xlu1 %381  ;;  %v377_v24 = vpop.permute.xlu0 %376 }
  0x8e   : > { %v414_v30 = vmul.f32 %v377_v24, %v357_v27  ;;  %v415_v34 = vmul.f32 %v382_v23, %v358_v32  ;;  %v407_v50 = vpop.permute.xlu2 %406 }
  0x8f   : > { %v420_v55 = vmul.f32 %v407_v50, %v363_v52 }
  0x95   : > { %v441_v28 = vpop.permute.xlu1 %440  ;;  %v436_v29 = vpop.permute.xlu0 %435 }
  0x96   : > { %v473_v31 = vmul.f32 %v3949_v25, %v436_v29  ;;  %v474_v35 = vmul.f32 %v3949_v25, %v441_v28  ;;  %v412_v62 = vpop.permute.xlu2 %411 }
  0x97   : > { %v421_v2 = vmul.f32 %v412_v62, %v364_v63 }
  0x98   : > { %v481_v33 = vadd.f32 %v473_v31, %v414_v30  ;;  %v482_v42 = vadd.f32 %v474_v35, %v415_v34 }
  0x9a   : > { %3700 = vmatmul.msk.f32.vlgmr.msra.gmra.mxu0 %vm503_vm0, %v481_v33 }
  0x9d   : > { %v451_v40 = vpop.permute.xlu1 %450  ;;  %v392_v41 = vpop.permute.xlu0 %391 }
  0x9e   : > { %v476_v53 = vmul.f32 %v3949_v25, %v451_v40  ;;  %v417_v54 = vmul.f32 %v392_v41, %v360_v51 }
  0xa0   : > { %v484_v59 = vadd.f32 %v476_v53, %v417_v54 }
  0xa2   : > { %3701 = vmatmul.msk.f32.gmra.mxu0 %vm503_vm0, %v482_v42 }
  0xa5   : > { %v402_v47 = vpop.permute.xlu1 %401  ;;  %v456_v48 = vpop.permute.xlu0 %455 }
  0xa6   : > { %v477_v1 = vmul.f32 %v3949_v25, %v456_v48  ;;  %v419_v8 = vmul.f32 %v402_v47, %v362_v7 }
  0xa8   : > { %v485_v5 = vadd.f32 %v477_v1, %v418_v0 }
  0xaa   : > { %3702 = vmatmul.msk.f32.gmra.mxu0 %vm503_vm0, %v483_v49 }
  0xad   : > { %v466_v56 = vpop.permute.xlu1 %465  ;;  %v461_v57 = vpop.permute.xlu0 %460 }
  0xae   : > { %v479_v58 = vmul.f32 %v3949_v25, %v466_v56  ;;  %v478_v9 = vmul.f32 %v3949_v25, %v461_v57 }
  0xb0   : > { %v487_v60 = vadd.f32 %v479_v58, %v420_v55  ;;  %v486_v10 = vadd.f32 %v478_v9, %v419_v8 }
  0xb2   : > { %3703 = vmatmul.msk.f32.gmra.mxu0 %vm503_vm0, %v484_v59  ;;  %3706 = vmatmul.msk.f32.vlgmr.msra.gmra.mxu1 %vm503_vm0, %v487_v60 }
  0xb5   : > { %v471_v3 = vpop.permute.xlu0 %470 }
  0xb6   : > { %v480_v4 = vmul.f32 %v3949_v25, %v471_v3 }
  0xb8   : > { %v488_v6 = vadd.f32 %v480_v4, %v421_v2 }
  0xba   : > { %3704 = vmatmul.msk.f32.gmra.mxu0 %vm503_vm0, %v485_v5  ;;  %3707 = vmatmul.msk.f32.gmra.mxu1 %vm503_vm0, %v488_v6 }
  0xc2   : > { %3705 = vmatmul.msk.f32.gmra.mxu0 %vm503_vm0, %v486_v10  ;;  %3708 = vmatmul.msk.f32.vlgmr.msrb.gmra.mxu1 %vm503_vm0, %v481_v33 }
  0xca   : > { %3709 = vmatmul.msk.f32.gmra.mxu1 %vm503_vm0, %v482_v42 }
  0xd2   : > { %3710 = vmatmul.msk.f32.gmra.mxu1 %vm503_vm0, %v483_v49 }
  0xda   : > { %3711 = vmatmul.msk.f32.gmra.mxu1 %vm503_vm0, %v484_v59 }
  0xe2   : > { %3712 = vmatmul.msk.f32.gmra.mxu1 %vm503_vm0, %v485_v5 }
  0xea   : > { %3713 = vmatmul.msk.f32.gmra.mxu1 %vm503_vm0, %v486_v10 }
  0xf2   : > { %3714 = vmatmul.msk.f32.gmra.mxu1 %vm503_vm0, %v487_v60 }
  0xfa   : > { %3715 = vmatmul.msk.f32.gmra.mxu1 %vm503_vm0, %v488_v6 }
 0x117   : > { %v545_v13 = vpop.f32.mrf.mxu0 }
 0x118   : > { %v4372_v14 = vadd.f32 %v545_v13, %v499_v12 }
 0x11a   : > { %611 = vrot.lane.b32.xlu1 %v4372_v14, %s4194_s27 }
 0x11f   : > { %v548_v15 = vpop.f32.mrf.mxu0 }
 0x120   : > { %v4375_v16 = vadd.f32 %v548_v15, %v499_v12 }
 0x122   : > { %639 = vrot.lane.b32.xlu2 %v4375_v16, %s4194_s27 }
 0x127   : > { %v551_v17 = vpop.f32.mrf.mxu0 }
 0x128   : > { %v4378_v18 = vadd.f32 %v551_v17, %v499_v12 }
 0x12a   : > { %666 = vrot.lane.b32.xlu0 %v4378_v18, %s4194_s27 }
 0x12f   : > { %v554_v19 = vpop.f32.mrf.mxu0  ;;  %v563_v21 = vpop.f32.mrf.mxu1 }
 0x130   : > { %v4381_v20 = vadd.f32 %v554_v19, %v499_v12  ;;  %v4384_v22 = vadd.f32 %v563_v21, %v499_v12 }
 0x132   : > { %693 = vrot.lane.b32.xlu1 %v4381_v20, %s4194_s27 }
 0x137   : > { %v557_v23 = vpop.f32.mrf.mxu0  ;;  %v566_v25 = vpop.f32.mrf.mxu1 }
 0x138   : > { %v4386_v24 = vadd.f32 %v557_v23, %v499_v12  ;;  %v4390_v27 = vadd.f32 %v566_v25, %v499_v12 }
 0x13a   : > { %720 = vrot.lane.b32.xlu2 %v4386_v24, %s4194_s27  ;;  %774 = vrot.lane.b32.xlu1 %v4384_v22, %s4194_s27 }
 0x13f   : > { %v560_v26 = vpop.f32.mrf.mxu0  ;;  %v586_v31 = vpop.f32.mrf.mxu1 }
 0x140   : > { %v4392_v28 = vadd.f32 %v560_v26, %v499_v12  ;;  %v4416_v37 = vadd.f32 %v586_v31, %v4409_v36 }
 0x142   : > { %747 = vrot.lane.b32.xlu0 %v4392_v28, %s4194_s27  ;;  %801 = vrot.lane.b32.xlu2 %v4390_v27, %s4194_s27  ;;  %s4149_s27 = scalar_lea.hbm %s5330_s9, 16 }
 0x147   : > { %v589_v34 = vpop.f32.mrf.mxu1 }
 0x148   : > { %v4429_v43 = vadd.f32 %v589_v34, %v4409_v36 }
 0x14a   : > { %1188 = vrot.lane.b32.xlu2 %v4372_v14, %s4195_s28  ;;  %v4488_v21 = vpack.i.bf16 %v4429_v43, %v4416_v37 }
 0x14f   : > { %v592_v38 = vpop.f32.mrf.mxu1 }
 0x150   : > { %v4421_v40 = vadd.f32 %v592_v38, %v4409_v36 }
 0x157   : > { %v595_v44 = vpop.f32.mrf.mxu1 }
 0x158   : > { %v4435_v45 = vadd.f32 %v595_v44, %v4409_v36 }
 0x15f   : > { %v598_v31 = vpop.f32.mrf.mxu1 }
 0x17c   : > { %v640_v29 = vpop.permute.xlu2 %639 }
 0x17d   : > { %3718 = vmatpush.xpose.msk.msra.mxu3 %vm613_vm1, %v640_v29 }
 0x180   : > { %3719 = vmatmul.msk.f32.vlgmr.msra.gmra.mxu3 %vm613_vm1, %v4375_v16 }
 0x18c   : > { %v612_v30 = vpop.permute.xlu1 %611 }
 0x18d   : > { %3716 = vmatpush.xpose.msk.msra.mxu2 %vm613_vm1, %v612_v30 }
 0x190   : > { %3717 = vmatmul.msk.f32.vlgmr.msra.gmra.mxu2 %vm613_vm1, %v4372_v14 }
 0x194   : > { %v721_v33 = vpop.permute.xlu2 %720 }
 0x19c   : > { %v667_v32 = vpop.permute.xlu0 %666  ;;  %v802_v42 = vpop.permute.xlu2 %801 }
 0x19d   : > { %3720 = vmatpush.xpose.msk.msrb.mxu2 %vm613_vm1, %v667_v32 }
 0x1a0   : > { %3721 = vmatmul.msk.f32.vlgmr.msrb.gmra.mxu2 %vm613_vm1, %v4378_v18 }
 0x1a1   : > { %3724 = vmatpush.xpose.msk.msra.mxu2 %vm613_vm1, %v721_v33 }
 0x1a4   : > { %v694_v35 = vpop.permute.xlu1 %693 }
 0x1a5   : > { %3722 = vmatpush.xpose.msk.msrb.mxu3 %vm613_vm1, %v694_v35 }
 0x1a8   : > { %3723 = vmatmul.msk.f32.vlgmr.msrb.gmra.mxu3 %vm613_vm1, %v4381_v20  ;;  %3725 = vmatmul.msk.f32.vlgmr.msra.gmra.mxu2 %vm613_vm1, %v4386_v24 }
 0x1ac   : > { %v775_v39 = vpop.permute.xlu1 %774 }
 0x1ad   : > { %3728 = vmatpush.xpose.msk.msrb.mxu2 %vm613_vm1, %v775_v39 }
 0x1b0   : > { %3729 = vmatmul.msk.f32.vlgmr.msrb.gmra.mxu2 %vm613_vm1, %v4384_v22 }
 0x1b1   : > { %1022 = vmatpush.msra.mxu2 %v4416_v37 }
 0x1b3   : > { %1068 = vmatpush.msrb.mxu2 %v4421_v40 }
 0x1b4   : > { %v748_v41 = vpop.permute.xlu0 %747 }
 0x1b5   : > { %3726 = vmatpush.xpose.msk.msra.mxu3 %vm613_vm1, %v748_v41 }
 0x1b8   : > { %3727 = vmatmul.msk.f32.vlgmr.msra.gmra.mxu3 %vm613_vm1, %v4392_v28 }
 0x1b9   : > { %3730 = vmatpush.xpose.msk.msrb.mxu3 %vm613_vm1, %v802_v42 }
 0x1bd   : > { %1045 = vmatpush.msra.mxu3 %v4429_v43 }
 0x1c0   : > { %3731 = vmatmul.msk.f32.vlgmr.msrb.gmra.mxu3 %vm613_vm1, %v4390_v27 }
 0x1c1   : > { %1091 = vmatpush.msrb.mxu3 %v4435_v45 }
 0x203   : > { %v662_v46 = vpop.f32.mrf.mxu3 }
 0x204   : > { %v828_v47 = vmul.f32 0.25, %v662_v46  ;;  %v601_v46 = vpop.f32.mrf.mxu1 }
 0x206   : > { %v837_v48 = vmul.f32 1.442695, %v828_v47 }
 0x208   : > { %3953 = vpow2.f32 %v837_v48 }
 0x20e   : > { %v4440_v49 = vpop.eup %3953 }
 0x20f   : > { %v855_v50 = vsel %vm851_vm2, %v4440_v49, 0.0 }
 0x210   : > { %856 = vadd.xlane.f32.xlu1 %v855_v50 }
 0x213   : > { %v635_v51 = vpop.f32.mrf.mxu2 }
 0x214   : > { %v827_v52 = vmul.f32 0.25, %v635_v51  ;;  %v4506_v51 = vadd.f32 %v601_v46, %v4409_v36 }
 0x216   : > { %v835_v53 = vmul.f32 1.442695, %v827_v52  ;;  %v4509_v52 = vpop.permute.xlu2 %1188 }
 0x218   : > { %3955 = vpow2.f32 %v835_v53 }
 0x21e   : > { %v4444_v54 = vpop.eup %3955 }
 0x21f   : > { %v852_v55 = vsel %vm851_vm2, %v4444_v54, 0.0 }
 0x220   : > { %853 = vadd.xlane.f32.xlu0 %v852_v55 }
 0x223   : > { %v689_v56 = vpop.f32.mrf.mxu2 }
 0x224   : > { %v829_v57 = vmul.f32 0.25, %v689_v56 }
 0x226   : > { %v839_v58 = vmul.f32 1.442695, %v829_v57 }
 0x228   : > { %3957 = vpow2.f32 %v839_v58 }
 0x229   : > { %1190 = vrot.lane.b32.xlu1 %v4372_v14, %s4196_s29 }
 0x22b   : > { %v716_v59 = vpop.f32.mrf.mxu3  ;;  %v743_v60 = vpop.f32.mrf.mxu2 }
 0x22c   : > { %v830_v61 = vmul.f32 0.25, %v716_v59  ;;  %v831_v11 = vmul.f32 0.25, %v743_v60 }
 0x22e   : > { %v4450_v62 = vpop.eup %3957  ;;  %v841_v63 = vmul.f32 1.442695, %v830_v61  ;;  %v843_v13 = vmul.f32 1.442695, %v831_v11 }
 0x22f   : > { %v858_v0 = vsel %vm851_vm2, %v4450_v62, 0.0 }
 0x230   : > { %3959 = vpow2.f32 %v841_v63  ;;  %859 = vadd.xlane.f32.xlu2 %v858_v0 }
 0x233   : > { %v797_v1 = vpop.f32.mrf.mxu2 }
 0x234   : > { %v833_v2 = vmul.f32 0.25, %v797_v1  ;;  %1218 = vrot.lane.b32.xlu0 %v4375_v16, %s4196_s29 }
 0x236   : > { %v4456_v3 = vpop.eup %3959  ;;  %v847_v4 = vmul.f32 1.442695, %v833_v2 }
 0x237   : > { %v861_v5 = vsel %vm851_vm2, %v4456_v3, 0.0 }
 0x238   : > { %3961 = vpow2.f32 %v847_v4  ;;  %862 = vadd.xlane.f32.xlu2 %v861_v5  ;;  %v4516_v5 = vadd.f32 %v598_v31, %v4409_v36 }
 0x23b   : > { %v770_v7 = vpop.f32.mrf.mxu3 }
 0x23c   : > { %v832_v9 = vmul.f32 0.25, %v770_v7 }
 0x23e   : > { %v4460_v6 = vpop.eup %3961  ;;  %v845_v10 = vmul.f32 1.442695, %v832_v9 }
 0x23f   : > { %v870_v8 = vsel %vm851_vm2, %v4460_v6, 0.0 }
 0x240   : > { %871 = vadd.xlane.f32.xlu2 %v870_v8  ;;  %3963 = vpow2.f32 %v845_v10 }
 0x241   : > { %3965 = vpow2.f32 %v843_v13 }
 0x243   : > { %v824_v26 = vpop.f32.mrf.mxu3 }
 0x244   : > { %v834_v29 = vmul.f32 0.25, %v824_v26 }
 0x246   : > { %v4464_v12 = vpop.eup %3963  ;;  %v849_v33 = vmul.f32 1.442695, %v834_v29 }
 0x247   : > { %v867_v15 = vsel %vm851_vm2, %v4464_v12, 0.0  ;;  %v4470_v17 = vpop.eup %3965 }
 0x248   : > { %v864_v19 = vsel %vm851_vm2, %v4470_v17, 0.0 }
 0x253   : > { %868 = vadd.xlane.f32.xlu1 %v867_v15 }
 0x258   : > { %1300 = vrot.lane.b32.xlu2 %v4386_v24, %s4195_s28 }
 0x25e   : > { %865 = vadd.xlane.f32.xlu0 %v864_v19  ;;  %v604_v19 = vpop.f32.mrf.mxu1 }
 0x260   : > { %1246 = vrot.lane.b32.xlu2 %v4378_v18, %s4196_s29 }
 0x268   : > { %1358 = vrot.lane.b32.xlu2 %v4384_v22, %s4196_s29 }
 0x26c   : > { %1302 = vrot.lane.b32.xlu1 %v4386_v24, %s4196_s29 }
 0x270   : > { %1386 = vrot.lane.b32.xlu2 %v4390_v27, %s4196_s29 }
 0x272   : > { %1216 = vrot.lane.b32.xlu0 %v4375_v16, %s4195_s28 }
 0x274   : > { %1330 = vrot.lane.b32.xlu1 %v4392_v28, %s4196_s29 }
 0x278   : > { %3895 = vrot.lane.b32.xlu2 %v4488_v21, %s4195_s28 }
 0x27c   : > { %1244 = vrot.lane.b32.xlu1 %v4378_v18, %s4195_s28 }
 0x280   : > { %1806 = vrot.lane.b32.xlu2 %v4372_v14, %s4197_s23 }
 0x283   : > { %v857_v23 = vpop.xlane.xlu1 %856 }
 0x284   : > { %v877_v25 = vadd.f32 1e-08, %v857_v23  ;;  %1272 = vrot.lane.b32.xlu1 %v4381_v20, %s4195_s28 }
 0x286   : > { %3967 = vrcp.f32 %v877_v25  ;;  %v910_v37 = vand.u32 2147483648, %v877_v25  ;;  %v908_v38 = vand.u32 2147483647, %v877_v25  ;;  %vm904_vm4 = vweird.f32 %v877_v25 }
 0x287   : > { %3969 = vpow2.f32 %v849_v33 }
 0x288   : > { %1834 = vrot.lane.b32.xlu2 %v4375_v16, %s4197_s23  ;;  %v911_v43 = vor.u32 1.1754944e-38, %v910_v37  ;;  %vm909_vm6 = vcmp.eq.f32.partialorder %v908_v38, 8.507059e+37  ;;  %v4526_v37 = vadd.f32 %v604_v19, %v4409_v36 }
 0x28c   : > { %v3968_v30 = vpop.eup %3967  ;;  %1384 = vrot.lane.b32.xlu1 %v4390_v27, %s4195_s28 }
 0x28d   : > { %v900_v32 = vmul.f32 %v3968_v30, %v877_v25  ;;  %vm905_vm3 = vweird.f32 %v3968_v30  ;;  %v4502_v48 = vpop.eup %3969 }
 0x28e   : > { %vm906_vm5 = vmor %vm904_vm4, %vm905_vm3  ;;  %v873_v53 = vsel %vm851_vm2, %v4502_v48, 0.0 }
 0x28f   : > { %v901_v34 = vsub.f32 1.0, %v900_v32 }
 0x291   : > { %v902_v35 = vmul.f32 %v3968_v30, %v901_v34 }
 0x293   : > { %v903_v39 = vadd.f32 %v3968_v30, %v902_v35  ;;  %v854_v41 = vpop.xlane.xlu0 %853 }
 0x294   : > { %v876_v42 = vadd.f32 1e-08, %v854_v41 }
 0x295   : > { %v907_v44 = vsel %vm906_vm5, %v3968_v30, %v903_v39 }
 0x296   : > { %3971 = vrcp.f32 %v876_v42  ;;  %v912_v47 = vsel %vm909_vm6, %v911_v43, %v907_v44  ;;  %v895_v59 = vand.u32 2147483648, %v876_v42  ;;  %vm889_vm8 = vweird.f32 %v876_v42  ;;  %v607_v44 = vpop.f32.mrf.mxu1 }
 0x297   : > { %v913_v50 = vmul.f32 %v4440_v49, %v912_v47  ;;  %v893_v49 = vand.u32 2147483647, %v876_v42 }
 0x298   : > { %v896_v0 = vor.u32 1.1754944e-38, %v895_v59 }
 0x299   : > { %3733 = vmatmul.msk.f32.vlgmr.msra.gmra.mxu3 %vm851_vm2, %v913_v50  ;;  %vm894_vm10 = vcmp.eq.f32.partialorder %v893_v49, 8.507059e+37 }
 0x29a   : > { %1137 = vmatpush.msra.mxu3 %v4506_v51 }
 0x29c   : > { %v3972_v55 = vpop.eup %3971  ;;  %874 = vadd.xlane.f32.xlu0 %v873_v53  ;;  %v4536_v53 = vadd.f32 %v607_v44, %v4409_v36 }
 0x29d   : > { %v885_v56 = vmul.f32 %v3972_v55, %v876_v42  ;;  %vm890_vm7 = vweird.f32 %v3972_v55 }
 0x29e   : > { %vm891_vm9 = vmor %vm889_vm8, %vm890_vm7 }
 0x29f   : > { %v886_v57 = vsub.f32 1.0, %v885_v56 }
 0x2a1   : > { %v887_v58 = vmul.f32 %v3972_v55, %v886_v57  ;;  %v4545_v57 = vpack.i.bf16 %v4506_v51, %v4516_v5 }
 0x2a3   : > { %v888_v60 = vadd.f32 %v3972_v55, %v887_v58  ;;  %v860_v61 = vpop.xlane.xlu2 %859 }
 0x2a4   : > { %v878_v63 = vadd.f32 1e-08, %v860_v61 }
 0x2a5   : > { %v892_v1 = vsel %vm891_vm9, %v3972_v55, %v888_v60 }
 0x2a6   : > { %3973 = vrcp.f32 %v878_v63  ;;  %v897_v2 = vsel %vm894_vm10, %v896_v0, %v892_v1  ;;  %v925_v15 = vand.u32 2147483648, %v878_v63  ;;  %vm919_vm12 = vweird.f32 %v878_v63  ;;  %v1219_v36 = vpop.permute.xlu0 %1218 }
 0x2a7   : > { %v898_v4 = vmul.f32 %v4444_v54, %v897_v2  ;;  %v923_v54 = vand.u32 2147483647, %v878_v63 }
 0x2a8   : > { %v926_v29 = vor.u32 1.1754944e-38, %v925_v15 }
 0x2a9   : > { %3732 = vmatmul.msk.f32.vlgmr.msra.gmra.mxu2 %vm851_vm2, %v898_v4  ;;  %vm924_vm14 = vcmp.eq.f32.partialorder %v923_v54, 8.507059e+37 }
 0x2aa   : > { %1114 = vmatpush.msra.mxu2 %v4516_v5 }
 0x2ab   : > { %v863_v7 = vpop.xlane.xlu2 %862 }
 0x2ac   : > { %v3974_v8 = vpop.eup %3973  ;;  %v879_v9 = vadd.f32 1e-08, %v863_v7 }
 0x2ad   : > { %v915_v10 = vmul.f32 %v3974_v8, %v878_v63  ;;  %vm920_vm11 = vweird.f32 %v3974_v8 }
 0x2ae   : > { %3975 = vrcp.f32 %v879_v9  ;;  %vm921_vm13 = vmor %vm919_vm12, %vm920_vm11  ;;  %v940_v34 = vand.u32 2147483648, %v879_v9  ;;  %v938_v39 = vand.u32 2147483647, %v879_v9  ;;  %vm934_vm3 = vweird.f32 %v879_v9 }
 0x2af   : > { %v916_v11 = vsub.f32 1.0, %v915_v10 }
 0x2b0   : > { %1328 = vrot.lane.b32.xlu0 %v4392_v28, %s4195_s28  ;;  %v941_v43 = vor.u32 1.1754944e-38, %v940_v34  ;;  %vm939_vm5 = vcmp.eq.f32.partialorder %v938_v39, 8.507059e+37 }
 0x2b1   : > { %v917_v13 = vmul.f32 %v3974_v8, %v916_v11 }
 0x2b3   : > { %v918_v23 = vadd.f32 %v3974_v8, %v917_v13  ;;  %v872_v25 = vpop.xlane.xlu2 %871 }
 0x2b4   : > { %v3976_v26 = vpop.eup %3975 }
 0x2b5   : > { %v930_v30 = vmul.f32 %v3976_v26, %v879_v9  ;;  %v922_v31 = vsel %vm921_vm13, %v3974_v8, %v918_v23  ;;  %vm935_vm15 = vweird.f32 %v3976_v26 }
 0x2b6   : > { %v927_v33 = vsel %vm924_vm14, %v926_v29, %v922_v31  ;;  %vm936_vm4 = vmor %vm934_vm3, %vm935_vm15 }
 0x2b7   : > { %v931_v32 = vsub.f32 1.0, %v930_v30  ;;  %v928_v35 = vmul.f32 %v4450_v62, %v927_v33  ;;  %v4532_v62 = vpop.permute.xlu1 %1190 }
 0x2b8   : > { %1274 = vrot.lane.b32.xlu0 %v4381_v20, %s4196_s29 }
 0x2b9   : > { %v932_v38 = vmul.f32 %v3976_v26, %v931_v32  ;;  %3734 = vmatmul.msk.f32.vlgmr.msrb.gmra.mxu2 %vm851_vm2, %v928_v35 }
 0x2ba   : > { %1160 = vmatpush.msrb.mxu2 %v4526_v37 }
 0x2bb   : > { %v933_v41 = vadd.f32 %v3976_v26, %v932_v38  ;;  %v4530_v42 = vpop.permute.xlu2 %1300 }
 0x2bd   : > { %v937_v46 = vsel %vm936_vm4, %v3976_v26, %v933_v41 }
 0x2be   : > { %v942_v47 = vsel %vm939_vm5, %v941_v43, %v937_v46 }
 0x2bf   : > { %v943_v50 = vmul.f32 %v4456_v3, %v942_v47  ;;  %v882_v3 = vadd.f32 1e-08, %v872_v25 }
 0x2c0   : > { %1356 = vrot.lane.b32.xlu0 %v4384_v22, %s4195_s28 }
 0x2c1   : > { %3735 = vmatmul.msk.f32.vlgmr.msrb.gmra.mxu3 %vm851_vm2, %v943_v50  ;;  %v985_v38 = vand.u32 2147483648, %v882_v3  ;;  %vm979_vm15 = vweird.f32 %v882_v3  ;;  %v983_v41 = vand.u32 2147483647, %v882_v3 }
 0x2c2   : > { %1183 = vmatpush.msrb.mxu3 %v4536_v53 }
 0x2c3   : > { %v1247_v55 = vpop.permute.xlu2 %1246  ;;  %v986_v47 = vor.u32 1.1754944e-38, %v985_v38  ;;  %vm984_vm4 = vcmp.eq.f32.partialorder %v983_v41, 8.507059e+37 }
 0x2c4   : > { %3744 = vmatpush.xpose.msk.msrb.mxu0 %vm613_vm1, %v1247_v55 }
 0x2c6   : > { %v869_v56 = vpop.xlane.xlu1 %868 }
 0x2c7   : > { %v881_v58 = vadd.f32 1e-08, %v869_v56 }
 0x2c8   : > { %3900 = vrot.lane.b32.xlu0 %v4545_v57, %s4195_s28 }
 0x2c9   : > { %3977 = vrcp.f32 %v881_v58  ;;  %v970_v1 = vand.u32 2147483648, %v881_v58  ;;  %v968_v7 = vand.u32 2147483647, %v881_v58  ;;  %vm964_vm7 = vweird.f32 %v881_v58 }
 0x2ca   : > { %3979 = vrcp.f32 %v882_v3 }
 0x2cb   : > { %v1359_v59 = vpop.permute.xlu2 %1358  ;;  %v971_v10 = vor.u32 1.1754944e-38, %v970_v1  ;;  %vm969_vm9 = vcmp.eq.f32.partialorder %v968_v7, 8.507059e+37 }
 0x2cc   : > { %3752 = vmatpush.xpose.msk.msra.mxu0 %vm613_vm1, %v1359_v59 }
 0x2cf   : > { %v3978_v49 = vpop.eup %3977 }
 0x2d0   : > { %v960_v60 = vmul.f32 %v3978_v49, %v881_v58  ;;  %1804 = vrot.lane.b32.xlu0 %v4372_v14, %s4198_s24  ;;  %v3980_v2 = vpop.eup %3979  ;;  %vm965_vm6 = vweird.f32 %v3978_v49 }
 0x2d1   : > { %v866_v61 = vpop.xlane.xlu0 %865  ;;  %v975_v9 = vmul.f32 %v3980_v2, %v882_v3  ;;  %vm966_vm8 = vmor %vm964_vm7, %vm965_vm6  ;;  %vm980_vm13 = vweird.f32 %v3980_v2 }
 0x2d2   : > { %v961_v63 = vsub.f32 1.0, %v960_v60  ;;  %v880_v0 = vadd.f32 1e-08, %v866_v61  ;;  %vm981_vm3 = vmor %vm979_vm15, %vm980_vm13 }
 0x2d3   : > { %v976_v19 = vsub.f32 1.0, %v975_v9  ;;  %v1387_v50 = vpop.permute.xlu2 %1386 }
 0x2d4   : > { %v962_v4 = vmul.f32 %v3978_v49, %v961_v63  ;;  %3981 = vrcp.f32 %v880_v0  ;;  %v955_v26 = vand.u32 2147483648, %v880_v0  ;;  %v953_v32 = vand.u32 2147483647, %v880_v0 }
 0x2d5   : > { %v977_v30 = vmul.f32 %v3980_v2, %v976_v19  ;;  %vm949_vm11 = vweird.f32 %v880_v0 }
 0x2d6   : > { %v963_v8 = vadd.f32 %v3978_v49, %v962_v4  ;;  %v956_v34 = vor.u32 1.1754944e-38, %v955_v26  ;;  %vm954_vm14 = vcmp.eq.f32.partialorder %v953_v32, 8.507059e+37 }
 0x2d7   : > { %v978_v35 = vadd.f32 %v3980_v2, %v977_v30 }
 0x2d8   : > { %1918 = vrot.lane.b32.xlu0 %v4386_v24, %s4197_s23  ;;  %v967_v11 = vsel %vm966_vm8, %v3978_v49, %v963_v8 }
 0x2d9   : > { %v972_v13 = vsel %vm969_vm9, %v971_v10, %v967_v11  ;;  %v982_v46 = vsel %vm981_vm3, %v3980_v2, %v978_v35 }
 0x2da   : > { %v3982_v15 = vpop.eup %3981  ;;  %v973_v54 = vmul.f32 %v4464_v12, %v972_v13  ;;  %v987_v55 = vsel %vm984_vm4, %v986_v47, %v982_v46 }
 0x2db   : > { %v945_v23 = vmul.f32 %v3982_v15, %v880_v0  ;;  %vm950_vm10 = vweird.f32 %v3982_v15  ;;  %v988_v56 = vmul.f32 %v4460_v6, %v987_v55 }
 0x2dc   : > { %3737 = vmatmul.msk.f32.vlgmr.msra.gmra.mxu3 %vm851_vm2, %v973_v54  ;;  %vm951_vm12 = vmor %vm949_vm11, %vm950_vm10 }
 0x2dd   : > { %v946_v25 = vsub.f32 1.0, %v945_v23  ;;  %3742 = vmatpush.xpose.msk.msra.mxu3 %vm613_vm1, %v1219_v36 }
 0x2de   : > { %v1303_v29 = vpop.permute.xlu1 %1302 }
 0x2df   : > { %v947_v31 = vmul.f32 %v3982_v15, %v946_v25 }
 0x2e1   : > { %v948_v33 = vadd.f32 %v3982_v15, %v947_v31 }
 0x2e3   : > { %v952_v12 = vsel %vm951_vm12, %v3982_v15, %v948_v33 }
 0x2e4   : > { %v957_v39 = vsel %vm954_vm14, %v956_v34, %v952_v12 }
 0x2e5   : > { %v958_v43 = vmul.f32 %v4470_v17, %v957_v39  ;;  %v3896_v17 = vpop.permute.xlu2 %3895 }
 0x2e6   : > { %v1331_v44 = vpop.permute.xlu1 %1330  ;;  %v3897_v36 = vunpack.i.l.bf16 %v3896_v17  ;;  %v3898_v10 = vunpack.i.h.bf16 %v3896_v17 }
 0x2e7   : > { %3736 = vmatmul.msk.f32.vlgmr.msra.gmra.mxu2 %vm851_vm2, %v958_v43 }
 0x2e8   : > { %3740 = vmatpush.xpose.msk.msra.mxu2 %vm613_vm1, %v4532_v62  ;;  %v1217_v62 = vpop.permute.xlu0 %1216 }
 0x2ee   : > { %v1245_v58 = vpop.permute.xlu1 %1244 }
 0x2ef   : > { %3738 = vmatmul.msk.f32.vlgmr.msrb.gmra.mxu2 %vm851_vm2, %v988_v56  ;;  %3745 = vmatmul.msk.f32.vlgmr.msrb.gmra.mxu0 %vm613_vm1, %v1245_v58 }
 0x2f0   : > { %3748 = vmatpush.xpose.msk.msrb.mxu2 %vm613_vm1, %v1303_v29 }
 0x2f6   : > { %v1273_v9 = vpop.permute.xlu1 %1272 }
 0x2f7   : > { %3741 = vmatmul.msk.f32.vlgmr.msra.gmra.mxu2 %vm613_vm1, %v4509_v52 }
 0x2f8   : > { %1610 = vmatpush.msra.mxu2 %v3897_v36 }
 0x2ff   : > { %3749 = vmatmul.msk.f32.vlgmr.msrb.gmra.mxu2 %vm613_vm1, %v4530_v42 }
 0x30f   : > { %v875_v3 = vpop.xlane.xlu0 %874 }
 0x310   : > { %v883_v59 = vadd.f32 1e-08, %v875_v3 }
 0x312   : > { %3983 = vrcp.f32 %v883_v59  ;;  %v1000_v61 = vand.u32 2147483648, %v883_v59  ;;  %v998_v0 = vand.u32 2147483647, %v883_v59  ;;  %vm994_vm6 = vweird.f32 %v883_v59 }
 0x314   : > { %v1001_v2 = vor.u32 1.1754944e-38, %v1000_v61  ;;  %vm999_vm8 = vcmp.eq.f32.partialorder %v998_v0, 8.507059e+37 }
 0x318   : > { %v3984_v6 = vpop.eup %3983 }
 0x319   : > { %v990_v49 = vmul.f32 %v3984_v6, %v883_v59  ;;  %vm995_vm5 = vweird.f32 %v3984_v6 }
 0x31a   : > { %vm996_vm7 = vmor %vm994_vm6, %vm995_vm5 }
 0x31b   : > { %v991_v60 = vsub.f32 1.0, %v990_v49 }
 0x31c   : > { %v4595_v41 = vpop.f32.mrf.mxu3 }
 0x31d   : > { %v992_v63 = vmul.f32 %v3984_v6, %v991_v60 }
 0x31f   : > { %v993_v1 = vadd.f32 %v3984_v6, %v992_v63 }
 0x321   : > { %v997_v52 = vsel %vm996_vm7, %v3984_v6, %v993_v1 }
 0x322   : > { %v1329_v4 = vpop.permute.xlu0 %1328  ;;  %v1002_v7 = vsel %vm999_vm8, %v1001_v2, %v997_v52 }
 0x323   : > { %v1003_v42 = vmul.f32 %v4502_v48, %v1002_v7  ;;  %v1385_v48 = vpop.permute.xlu1 %1384 }
 0x325   : > { %3739 = vmatmul.msk.f32.vlgmr.msrb.gmra.mxu3 %vm851_vm2, %v1003_v42 }
 0x326   : > { %3750 = vmatpush.xpose.msk.msrb.mxu3 %vm613_vm1, %v1331_v44 }
 0x32a   : > { %v1275_v8 = vpop.permute.xlu0 %1274 }
 0x32b   : > { %3746 = vmatpush.xpose.msk.msra.mxu1 %vm613_vm1, %v1275_v8 }
 0x32c   : > { %v4579_v19 = vpop.f32.mrf.mxu2 }
 0x32d   : > { %3743 = vmatmul.msk.f32.vlgmr.msra.gmra.mxu3 %vm613_vm1, %v1217_v62 }
 0x32e   : > { %1637 = vmatpush.msra.mxu3 %v3898_v10  ;;  %3747 = vmatmul.msk.f32.vlgmr.msra.gmra.mxu1 %vm613_vm1, %v1273_v9 }
 0x32f   : > { %3754 = vmatpush.xpose.msk.msrb.mxu1 %vm613_vm1, %v1387_v50 }
 0x332   : > { %v1357_v11 = vpop.permute.xlu0 %1356 }
 0x333   : > { %3753 = vmatmul.msk.f32.vlgmr.msra.gmra.mxu0 %vm613_vm1, %v1357_v11 }
 0x335   : > { %3751 = vmatmul.msk.f32.vlgmr.msrb.gmra.mxu3 %vm613_vm1, %v1329_v4 }
 0x336   : > { %3755 = vmatmul.msk.f32.vlgmr.msrb.gmra.mxu1 %vm613_vm1, %v1385_v48 }
 0x33a   : > { %v3901_v13 = vpop.permute.xlu0 %3900 }
 0x33b   : > { %v3903_v15 = vunpack.i.h.bf16 %v3901_v13  ;;  %v3902_v54 = vunpack.i.l.bf16 %v3901_v13 }
 0x33c   : > { %v4581_v23 = vpop.f32.mrf.mxu2 }
 0x33d   : > { %1718 = vmatpush.msrb.mxu2 %v3902_v54  ;;  %1745 = vmatpush.msrb.mxu3 %v3903_v15 }
 0x344   : > { %v4597_v43 = vpop.f32.mrf.mxu3 }
 0x35f   : > { %v4601_v44 = vpop.f32.mrf.mxu3 }
 0x36a   : > { %v4583_v25 = vpop.f32.mrf.mxu2 }
 0x36c   : > { %v1269_v26 = vpop.f32.mrf.mxu0 }
 0x36d   : > { %v1414_v29 = vmul.f32 0.25, %v1269_v26  ;;  %v4633_v26 = vpack.i.bf16 %v4536_v53, %v4526_v37 }
 0x36f   : > { %v1424_v30 = vmul.f32 1.442695, %v1414_v29  ;;  %v3904_v29 = vpack.i.bf16 %v4435_v45, %v4421_v40 }
 0x371   : > { %3985 = vpow2.f32 %v1424_v30  ;;  %v4645_v30 = vpop.permute.xlu0 %1804 }
 0x372   : > { %v4585_v31 = vpop.f32.mrf.mxu2 }
 0x377   : > { %v4587_v32 = vpop.eup %3985 }
 0x378   : > { %v1442_v33 = vsel %vm851_vm2, %v4587_v32, 0.0 }
 0x379   : > { %1443 = vadd.xlane.f32.xlu1 %v1442_v33  ;;  %v4656_v33 = vpop.permute.xlu0 %1918 }
 0x37a   : > { %v1213_v34 = vpop.f32.mrf.mxu2 }
 0x37b   : > { %v1412_v35 = vmul.f32 0.25, %v1213_v34 }
 0x37d   : > { %v1420_v12 = vmul.f32 1.442695, %v1412_v35 }
 0x37f   : > { %3987 = vpow2.f32 %v1420_v12 }
 0x382   : > { %v1325_v2 = vpop.f32.mrf.mxu2 }
 0x383   : > { %v1416_v42 = vmul.f32 0.25, %v1325_v2 }
 0x385   : > { %v4591_v38 = vpop.eup %3987  ;;  %v1428_v9 = vmul.f32 1.442695, %v1416_v42 }
 0x386   : > { %v1436_v39 = vsel %vm851_vm2, %v4591_v38, 0.0 }
 0x387   : > { %1437 = vadd.xlane.f32.xlu0 %v1436_v39 }
 0x39b   : > { %1916 = vrot.lane.b32.xlu0 %v4386_v24, %s4198_s24 }
 0x3a8   : > { %v4603_v46 = vpop.f32.mrf.mxu3 }
 0x3ab   : > { %v1297_v47 = vpop.f32.mrf.mxu1 }
 0x3ac   : > { %v1415_v50 = vmul.f32 0.25, %v1297_v47 }
 0x3ae   : > { %v1426_v55 = vmul.f32 1.442695, %v1415_v50 }
 0x3b0   : > { %3989 = vpow2.f32 %v1426_v55  ;;  %v1241_v56 = vpop.f32.mrf.mxu3  ;;  %v1381_v58 = vpop.f32.mrf.mxu0 }
 0x3b1   : > { %v1413_v17 = vmul.f32 0.25, %v1241_v56  ;;  %v1418_v36 = vmul.f32 0.25, %v1381_v58 }
 0x3b3   : > { %v1422_v62 = vmul.f32 1.442695, %v1413_v17  ;;  %v1432_v3 = vmul.f32 1.442695, %v1418_v36  ;;  %v1409_v59 = vpop.f32.mrf.mxu1 }
 0x3b4   : > { %v1419_v49 = vmul.f32 0.25, %v1409_v59  ;;  %v1807_v59 = vpop.permute.xlu2 %1806 }
 0x3b5   : > { %3991 = vpow2.f32 %v1422_v62 }
 0x3b6   : > { %v4605_v6 = vpop.eup %3989  ;;  %3993 = vpow2.f32 %v1432_v3  ;;  %v1434_v0 = vmul.f32 1.442695, %v1419_v49 }
 0x3b7   : > { %v1445_v60 = vsel %vm851_vm2, %v4605_v6, 0.0 }
 0x3b8   : > { %v1353_v61 = vpop.f32.mrf.mxu3  ;;  %1446 = vadd.xlane.f32.xlu1 %v1445_v60 }
 0x3b9   : > { %v1417_v63 = vmul.f32 0.25, %v1353_v61 }
 0x3bb   : > { %v4609_v1 = vpop.eup %3991  ;;  %v1430_v52 = vmul.f32 1.442695, %v1417_v63 }
 0x3bc   : > { %v4611_v4 = vpop.eup %3993  ;;  %v1439_v7 = vsel %vm851_vm2, %v4609_v1, 0.0  ;;  %v1835_v60 = vpop.permute.xlu2 %1834 }
 0x3bd   : > { %3995 = vpow2.f32 %v1430_v52  ;;  %1440 = vadd.xlane.f32.xlu2 %v1439_v7  ;;  %v1454_v8 = vsel %vm851_vm2, %v4611_v4, 0.0 }
 0x3be   : > { %3997 = vpow2.f32 %v1434_v0 }
 0x3bf   : > { %3999 = vpow2.f32 %v1428_v9 }
 0x3c0   : > { %1455 = vadd.xlane.f32.xlu1 %v1454_v8 }
 0x3c3   : > { %v4617_v10 = vpop.eup %3995 }
 0x3c4   : > { %v4619_v11 = vpop.eup %3997  ;;  %v1451_v48 = vsel %vm851_vm2, %v4617_v10, 0.0 }
 0x3c5   : > { %1452 = vadd.xlane.f32.xlu0 %v1451_v48  ;;  %v1457_v13 = vsel %vm851_vm2, %v4619_v11, 0.0  ;;  %v4625_v15 = vpop.eup %3999 }
 0x3c6   : > { %v1448_v54 = vsel %vm851_vm2, %v4625_v15, 0.0 }
 0x3c8   : > { %1458 = vadd.xlane.f32.xlu1 %v1457_v13 }
 0x3d0   : > { %1449 = vadd.xlane.f32.xlu1 %v1448_v54 }
 0x3d5   : > { %1832 = vrot.lane.b32.xlu2 %v4375_v16, %s4198_s24 }
 0x3d9   : > { %3910 = vrot.lane.b32.xlu0 %v4633_v26, %s4195_s28 }
 0x3dd   : > { %1946 = vrot.lane.b32.xlu2 %v4392_v28, %s4197_s23 }
 0x3e1   : > { %1862 = vrot.lane.b32.xlu0 %v4378_v18, %s4197_s23 }
 0x3e5   : > { %1944 = vrot.lane.b32.xlu2 %v4392_v28, %s4198_s24 }
 0x3e9   : > { %1974 = vrot.lane.b32.xlu0 %v4384_v22, %s4197_s23  ;;  %3905 = vrot.lane.b32.xlu1 %v3904_v29, %s4195_s28  ;;  %s342_s28 = sand.u32 1, %s4183_s12  }
 0x3ea   : > { %s3605_s22 = scalar_lea.sflag [#allocation4], %s342_s28 }
 0x3ec   : > { %v1444_v49 = vpop.xlane.xlu1 %1443 }
 0x3ed   : > { %1890 = vrot.lane.b32.xlu2 %v4381_v20, %s4197_s23  ;;  %v4676_v8 = vadd.f32 1e-08, %v1444_v49 }
 0x3f1   : > { %2002 = vrot.lane.b32.xlu0 %v4390_v27, %s4197_s23  ;;  %1860 = vrot.lane.b32.xlu1 %v4378_v18, %s4198_s24 }
 0x3f5   : > { %1972 = vrot.lane.b32.xlu2 %v4384_v22, %s4198_s24 }
 0x3f9   : > { %1888 = vrot.lane.b32.xlu1 %v4381_v20, %s4198_s24 }
 0x3fa   : > { %v1438_v34 = vpop.xlane.xlu0 %1437 }
 0x3fb   : > { %v1460_v35 = vadd.f32 1e-08, %v1438_v34 }
 0x3fd   : > { %4001 = vrcp.f32 %v1460_v35  ;;  %v1479_v50 = vand.u32 2147483648, %v1460_v35  ;;  %v1477_v56 = vand.u32 2147483647, %v1460_v35  ;;  %vm1473_vm10 = vweird.f32 %v1460_v35 }
 0x3ff   : > { %v1480_v17 = vor.u32 1.1754944e-38, %v1479_v50  ;;  %vm1478_vm12 = vcmp.eq.f32.partialorder %v1477_v56, 8.507059e+37 }
 0x401   : > { %2000 = vrot.lane.b32.xlu1 %v4390_v27, %s4198_s24 }
 0x403   : > { %v4002_v12 = vpop.eup %4001 }
 0x404   : > { %v1469_v39 = vmul.f32 %v4002_v12, %v1460_v35  ;;  %vm1474_vm9 = vweird.f32 %v4002_v12 }
 0x405   : > { %vm1475_vm11 = vmor %vm1473_vm10, %vm1474_vm9  ;;  %vm1503_vm9 = vweird.f32 %v4676_v8 }
 0x406   : > { %v1470_v47 = vsub.f32 1.0, %v1469_v39 }
 0x408   : > { %v1471_v55 = vmul.f32 %v4002_v12, %v1470_v47 }
 0x409   : > { %3915 = vrot.lane.b32.xlu1 %v4488_v21, %s4198_s24 }
 0x40a   : > { %v1472_v58 = vadd.f32 %v4002_v12, %v1471_v55 }
 0x40c   : > { %v1476_v36 = vsel %vm1475_vm11, %v4002_v12, %v1472_v58 }
 0x40d   : > { %v1481_v62 = vsel %vm1478_vm12, %v1480_v17, %v1476_v36  ;;  %v4674_v63 = vpop.permute.xlu0 %1916 }
 0x40e   : > { %v1482_v3 = vmul.f32 %v4591_v38, %v1481_v62 }
 0x410   : > { %3756 = vmatmul.msk.f32.vlgmr.msra.gmra.mxu2 %vm851_vm2, %v1482_v3 }
 0x411   : > { %3764 = vmatpush.xpose.msk.msra.mxu2 %vm613_vm1, %v1807_v59  ;;  %2412 = vrot.lane.b32.xlu1 %v4372_v14, %s4199_s30 }
 0x419   : > { %3925 = vrot.lane.b32.xlu1 %v3904_v29, %s4198_s24 }
 0x421   : > { %2440 = vrot.lane.b32.xlu1 %v4375_v16, %s4199_s30 }
 0x42b   : > { %v1447_v61 = vpop.xlane.xlu1 %1446 }
 0x42c   : > { %v4678_v48 = vadd.f32 1e-08, %v1447_v61 }
 0x430   : > { %v1441_v38 = vpop.xlane.xlu2 %1440 }
 0x431   : > { %v1461_v0 = vadd.f32 1e-08, %v1441_v38 }
 0x433   : > { %4003 = vrcp.f32 %v1461_v0  ;;  %v1456_v2 = vpop.xlane.xlu1 %1455  ;;  %v1494_v29 = vand.u32 2147483648, %v1461_v0  ;;  %v1492_v35 = vand.u32 2147483647, %v1461_v0  ;;  %vm1488_vm14 = vweird.f32 %v1461_v0 }
 0x434   : > { %v4682_v50 = vadd.f32 1e-08, %v1456_v2 }
 0x435   : > { %v1495_v47 = vor.u32 1.1754944e-38, %v1494_v29  ;;  %vm1493_vm3 = vcmp.eq.f32.partialorder %v1492_v35, 8.507059e+37 }
 0x438   : > { %v1453_v52 = vpop.xlane.xlu0 %1452  ;;  %v4684_v58 = vpop.permute.xlu2 %1832 }
 0x439   : > { %v4004_v7 = vpop.eup %4003  ;;  %v1465_v42 = vadd.f32 1e-08, %v1453_v52 }
 0x43a   : > { %v1484_v9 = vmul.f32 %v4004_v7, %v1461_v0  ;;  %vm1489_vm13 = vweird.f32 %v4004_v7 }
 0x43b   : > { %4005 = vrcp.f32 %v1465_v42  ;;  %v1459_v13 = vpop.xlane.xlu1 %1458  ;;  %vm1490_vm15 = vmor %vm1488_vm14, %vm1489_vm13  ;;  %v1554_v0 = vand.u32 2147483648, %v1465_v42  ;;  %v1552_v52 = vand.u32 2147483647, %v1465_v42  ;;  %vm1548_vm5 = vweird.f32 %v1465_v42 }
 0x43c   : > { %v1485_v54 = vsub.f32 1.0, %v1484_v9  ;;  %4007 = vrcp.f32 %v4676_v8  ;;  %v4686_v17 = vadd.f32 1e-08, %v1459_v13 }
 0x43d   : > { %4009 = vrcp.f32 %v4678_v48  ;;  %v1555_v13 = vor.u32 1.1754944e-38, %v1554_v0  ;;  %vm1553_vm7 = vcmp.eq.f32.partialorder %v1552_v52, 8.507059e+37 }
 0x43e   : > { %v1486_v34 = vmul.f32 %v4004_v7, %v1485_v54  ;;  %4011 = vrcp.f32 %v4682_v50 }
 0x440   : > { %v1487_v12 = vadd.f32 %v4004_v7, %v1486_v34 }
 0x441   : > { %v4006_v39 = vpop.eup %4005 }
 0x442   : > { %v1544_v55 = vmul.f32 %v4006_v39, %v1465_v42  ;;  %v1491_v56 = vsel %vm1490_vm15, %v4004_v7, %v1487_v12  ;;  %v4688_v3 = vpop.eup %4007  ;;  %vm1549_vm4 = vweird.f32 %v4006_v39 }
 0x443   : > { %v1450_v36 = vpop.xlane.xlu1 %1449  ;;  %v1496_v62 = vsel %vm1493_vm3, %v1495_v47, %v1491_v56  ;;  %v4691_v38 = vpop.eup %4009  ;;  %v1499_v7 = vmul.f32 %v4688_v3, %v4676_v8  ;;  %vm1550_vm6 = vmor %vm1548_vm5, %vm1549_vm4  ;;  %vm1504_vm10 = vweird.f32 %v4688_v3  ;;  %vm1518_vm3 = vweird.f32 %v4678_v48 }
 0x444   : > { %v1545_v59 = vsub.f32 1.0, %v1544_v55  ;;  %v1464_v49 = vadd.f32 1e-08, %v1450_v36  ;;  %v1497_v61 = vmul.f32 %v4609_v1, %v1496_v62  ;;  %v1514_v1 = vmul.f32 %v4691_v38, %v4678_v48  ;;  %v4701_v29 = vpop.eup %4011  ;;  %v1947_v36 = vpop.permute.xlu2 %1946  ;;  %vm4728_vm15 = vmor %vm1503_vm9, %vm1504_vm10 }
 0x445   : > { %v1500_v34 = vsub.f32 1.0, %v1499_v7  ;;  %v1509_v7 = vand.u32 2147483648, %v4676_v8  ;;  %vm1519_vm12 = vweird.f32 %v4691_v38  ;;  %vm1563_vm9 = vweird.f32 %v4682_v50 }
 0x446   : > { %v1546_v2 = vmul.f32 %v4006_v39, %v1545_v59  ;;  %4013 = vrcp.f32 %v1464_v49  ;;  %3757 = vmatmul.msk.f32.vlgmr.msra.gmra.mxu3 %vm851_vm2, %v1497_v61  ;;  %v1515_v55 = vsub.f32 1.0, %v1514_v1  ;;  %v1537_v52 = vand.u32 2147483647, %v1464_v49  ;;  %vm4736_vm4 = vmor %vm1518_vm3, %vm1519_vm12 }
 0x447   : > { %4015 = vrcp.f32 %v4686_v17  ;;  %3766 = vmatpush.xpose.msk.msra.mxu3 %vm613_vm1, %v1835_v60  ;;  %v1501_v42 = vmul.f32 %v4688_v3, %v1500_v34  ;;  %vm1533_vm11 = vweird.f32 %v1464_v49 }
 0x448   : > { %v1547_v9 = vadd.f32 %v4006_v39, %v1546_v2  ;;  %v1516_v61 = vmul.f32 %v4691_v38, %v1515_v55  ;;  %vm1538_vm14 = vcmp.eq.f32.partialorder %v1537_v52, 8.507059e+37 }
 0x449   : > { %v1502_v1 = vadd.f32 %v4688_v3, %v1501_v42  ;;  %v1522_v42 = vand.u32 2147483647, %v4678_v48 }
 0x44a   : > { %v1551_v54 = vsel %vm1550_vm6, %v4006_v39, %v1547_v9  ;;  %v1559_v39 = vmul.f32 %v4701_v29, %v4682_v50 }
 0x44b   : > { %v4703_v35 = vpop.permute.xlu0 %3910  ;;  %v1556_v12 = vsel %vm1553_vm7, %v1555_v13, %v1551_v54  ;;  %v1517_v54 = vadd.f32 %v4691_v38, %v1516_v61  ;;  %vm1523_vm6 = vcmp.eq.f32.partialorder %v1522_v42, 8.507059e+37  ;;  %vm1564_vm7 = vweird.f32 %v4701_v29 }
 0x44c   : > { %v4014_v47 = vpop.eup %4013  ;;  %v1557_v56 = vmul.f32 %v4617_v10, %v1556_v12  ;;  %v1539_v10 = vand.u32 2147483648, %v1464_v49  ;;  %v1560_v9 = vsub.f32 1.0, %v1559_v39  ;;  %v1945_v61 = vpop.permute.xlu2 %1944  ;;  %vm4761_vm10 = vmor %vm1563_vm9, %vm1564_vm7 }
 0x44d   : > { %v4706_v60 = vpop.eup %4015  ;;  %v1529_v62 = vmul.f32 %v4014_v47, %v1464_v49  ;;  %vm1534_vm8 = vweird.f32 %v4014_v47 }
 0x44e   : > { %3761 = vmatmul.msk.f32.vlgmr.msrb.gmra.mxu3 %vm851_vm2, %v1557_v56  ;;  %v1574_v0 = vmul.f32 %v4706_v60, %v4686_v17  ;;  %vm1535_vm13 = vmor %vm1533_vm11, %vm1534_vm8  ;;  %v1540_v12 = vor.u32 1.1754944e-38, %v1539_v10  ;;  %v1507_v56 = vand.u32 2147483647, %v4676_v8  ;;  %v1510_v10 = vor.u32 1.1754944e-38, %v1509_v7 }
 0x44f   : > { %v1530_v59 = vsub.f32 1.0, %v1529_v62  ;;  %3774 = vmatpush.xpose.msk.msrb.mxu3 %vm613_vm1, %v1947_v36  ;;  %v1524_v36 = vand.u32 2147483648, %v4678_v48  ;;  %vm1579_vm8 = vweird.f32 %v4706_v60  ;;  %vm1578_vm11 = vweird.f32 %v4686_v17 }
 0x450   : > { %v1575_v34 = vsub.f32 1.0, %v1574_v0  ;;  %v1506_v0 = vsel %vm4728_vm15, %v4688_v3, %v1502_v1  ;;  %vm1508_vm5 = vcmp.eq.f32.partialorder %v1507_v56, 8.507059e+37  ;;  %v1569_v3 = vand.u32 2147483648, %v4682_v50  ;;  %vm4771_vm12 = vmor %vm1578_vm11, %vm1579_vm8 }
 0x451   : > { %v1531_v2 = vmul.f32 %v4014_v47, %v1530_v59  ;;  %v1582_v56 = vand.u32 2147483647, %v4686_v17 }
 0x452   : > { %v1576_v48 = vmul.f32 %v4706_v60, %v1575_v34  ;;  %v1570_v42 = vor.u32 1.1754944e-38, %v1569_v3 }
 0x453   : > { %v1532_v13 = vadd.f32 %v4014_v47, %v1531_v2  ;;  %v1863_v55 = vpop.permute.xlu0 %1862  ;;  %v1525_v2 = vor.u32 1.1754944e-38, %v1524_v36  ;;  %v3912_v36 = vunpack.i.l.bf16 %v4703_v35 }
 0x454   : > { %v1891_v59 = vpop.permute.xlu2 %1890 }
 0x455   : > { %v1536_v62 = vsel %vm1535_vm13, %v4014_v47, %v1532_v13  ;;  %v1561_v47 = vmul.f32 %v4701_v29, %v1560_v9  ;;  %v1577_v9 = vadd.f32 %v4706_v60, %v1576_v48 }
 0x456   : > { %3767 = vmatmul.msk.f32.vlgmr.msra.gmra.mxu3 %vm613_vm1, %v4684_v58  ;;  %v1541_v39 = vsel %vm1538_vm14, %v1540_v12, %v1536_v62  ;;  %v1521_v58 = vsel %vm4736_vm4, %v4691_v38, %v1517_v54  ;;  %v1567_v54 = vand.u32 2147483647, %v4682_v50  ;;  %vm1583_vm14 = vcmp.eq.f32.partialorder %v1582_v56, 8.507059e+37 }
 0x457   : > { %v1542_v8 = vmul.f32 %v4625_v15, %v1541_v39  ;;  %v1511_v15 = vsel %vm1508_vm5, %v1510_v10, %v1506_v0  ;;  %v1562_v52 = vadd.f32 %v4701_v29, %v1561_v47  ;;  %v1526_v1 = vsel %vm1523_vm6, %v1525_v2, %v1521_v58 }
 0x458   : > { %v1512_v34 = vmul.f32 %v4587_v32, %v1511_v15  ;;  %v1527_v49 = vmul.f32 %v4605_v6, %v1526_v1  ;;  %v3913_v32 = vunpack.i.h.bf16 %v4703_v35  ;;  %v1581_v6 = vsel %vm4771_vm12, %v4706_v60, %v1577_v9 }
 0x459   : > { %3760 = vmatmul.msk.f32.vlgmr.msrb.gmra.mxu2 %vm851_vm2, %v1542_v8  ;;  %vm1568_vm13 = vcmp.eq.f32.partialorder %v1567_v54, 8.507059e+37 }
 0x45a   : > { %3772 = vmatpush.xpose.msk.msrb.mxu2 %vm613_vm1, %v4656_v33  ;;  %v1584_v33 = vand.u32 2147483648, %v4686_v17  ;;  %v1566_v17 = vsel %vm4761_vm10, %v4701_v29, %v1562_v52 }
 0x45b   : > { %v3906_v7 = vpop.permute.xlu1 %3905  ;;  %v1975_v62 = vpop.permute.xlu0 %1974  ;;  %v1571_v29 = vsel %vm1568_vm13, %v1570_v42, %v1566_v17 }
 0x45c   : > { %v3908_v38 = vunpack.i.h.bf16 %v3906_v7  ;;  %v3907_v13 = vunpack.i.l.bf16 %v3906_v7  ;;  %v1585_v39 = vor.u32 1.1754944e-38, %v1584_v33 }
 0x45e   : > { %1664 = vmatpush.msrb.mxu0 %v3907_v13  ;;  %1691 = vmatpush.msra.mxu1 %v3908_v38  ;;  %v1586_v47 = vsel %vm1583_vm14, %v1585_v39, %v1581_v6 }
 0x45f   : > { %3775 = vmatmul.msk.f32.vlgmr.msrb.gmra.mxu3 %vm613_vm1, %v1945_v61  ;;  %3758 = vmatmul.msk.f32.vlgmr.msrb.gmra.mxu0 %vm851_vm2, %v1512_v34  ;;  %v1572_v61 = vmul.f32 %v4611_v4, %v1571_v29  ;;  %v1587_v8 = vmul.f32 %v4619_v11, %v1586_v47 }
 0x460   : > { %3759 = vmatmul.msk.f32.vlgmr.msra.gmra.mxu1 %vm851_vm2, %v1527_v49  ;;  %1772 = vmatpush.msra.mxu0 %v3912_v36 }
 0x461   : > { %1799 = vmatpush.msrb.mxu1 %v3913_v32  ;;  %3765 = vmatmul.msk.f32.vlgmr.msra.gmra.mxu2 %vm613_vm1, %v4645_v30 }
 0x462   : > { %3768 = vmatpush.xpose.msk.msrb.mxu0 %vm613_vm1, %v1863_v55  ;;  %v1973_v55 = vpop.permute.xlu2 %1972 }
 0x463   : > { %3770 = vmatpush.xpose.msk.msra.mxu1 %vm613_vm1, %v1891_v59  ;;  %v1861_v35 = vpop.permute.xlu1 %1860  ;;  %v2003_v60 = vpop.permute.xlu0 %2002 }
 0x467   : > { %3762 = vmatmul.msk.f32.vlgmr.msra.gmra.mxu0 %vm851_vm2, %v1572_v61 }
 0x468   : > { %3763 = vmatmul.msk.f32.vlgmr.msrb.gmra.mxu1 %vm851_vm2, %v1587_v8  ;;  %3776 = vmatpush.xpose.msk.msra.mxu0 %vm613_vm1, %v1975_v62 }
 0x469   : > { %3778 = vmatpush.xpose.msk.msrb.mxu1 %vm613_vm1, %v2003_v60  ;;  %3773 = vmatmul.msk.f32.vlgmr.msrb.gmra.mxu2 %vm613_vm1, %v4674_v63 }
 0x46b   : > { %v1889_v30 = vpop.permute.xlu1 %1888 }
 0x46f   : > { %3769 = vmatmul.msk.f32.vlgmr.msrb.gmra.mxu0 %vm613_vm1, %v1861_v35 }
 0x470   : > { %3771 = vmatmul.msk.f32.vlgmr.msra.gmra.mxu1 %vm613_vm1, %v1889_v30 }
 0x473   : > { %v2001_v4 = vpop.permute.xlu1 %2000 }
 0x477   : > { %3777 = vmatmul.msk.f32.vlgmr.msra.gmra.mxu0 %vm613_vm1, %v1973_v55 }
 0x478   : > { %3779 = vmatmul.msk.f32.vlgmr.msrb.gmra.mxu1 %vm613_vm1, %v2001_v4 }
 0x47b   : > { %v3916_v11 = vpop.permute.xlu1 %3915 }
 0x47c   : > { %v3918_v0 = vunpack.i.h.bf16 %v3916_v11  ;;  %v3917_v10 = vunpack.i.l.bf16 %v3916_v11 }
 0x47e   : > { %2225 = vmatpush.msra.mxu2 %v3917_v10  ;;  %2251 = vmatpush.msra.mxu3 %v3918_v0 }
 0x483   : > { %v4801_v48 = vpop.permute.xlu1 %2412 }
 0x48b   : > { %v3926_v58 = vpop.permute.xlu1 %3925 }
 0x48c   : > { %v3928_v63 = vunpack.i.h.bf16 %v3926_v58  ;;  %v3927_v2 = vunpack.i.l.bf16 %v3926_v58 }
 0x48e   : > { %2277 = vmatpush.msrb.mxu0 %v3927_v2  ;;  %2303 = vmatpush.msra.mxu1 %v3928_v63 }
 0x493   : > { %v4803_v15 = vpop.f32.mrf.mxu2 }
 0x4dc   : > { %v4805_v52 = vpop.f32.mrf.mxu0  ;;  %v4807_v3 = vpop.f32.mrf.mxu2 }
 0x4dd   : > { %v4809_v7 = vpop.f32.mrf.mxu1 }
 0x4e4   : > { %v4811_v1 = vpop.f32.mrf.mxu0  ;;  %v1829_v38 = vpop.f32.mrf.mxu2 }
 0x4e5   : > { %v4813_v9 = vpop.f32.mrf.mxu1  ;;  %v2028_v11 = vmul.f32 0.25, %v1829_v38 }
 0x4ec   : > { %v1885_v13 = vpop.f32.mrf.mxu0  ;;  %v1941_v34 = vpop.f32.mrf.mxu2 }
 0x4ed   : > { %v2030_v54 = vmul.f32 0.25, %v1885_v13  ;;  %v1913_v33 = vpop.f32.mrf.mxu1  ;;  %v2032_v56 = vmul.f32 0.25, %v1941_v34 }
 0x4ee   : > { %v2031_v12 = vmul.f32 0.25, %v1913_v33 }
 0x4ef   : > { %v2040_v36 = vmul.f32 1.442695, %v2030_v54  ;;  %v2044_v49 = vmul.f32 1.442695, %v2032_v56 }
 0x4f0   : > { %v2042_v62 = vmul.f32 1.442695, %v2031_v12 }
 0x4f1   : > { %4017 = vpow2.f32 %v2040_v36 }
 0x4f2   : > { %4019 = vpow2.f32 %v2042_v62 }
 0x4f3   : > { %4021 = vpow2.f32 %v2044_v49 }
 0x4f4   : > { %v1997_v50 = vpop.f32.mrf.mxu0 }
 0x4f5   : > { %v2034_v32 = vmul.f32 0.25, %v1997_v50  ;;  %v2025_v17 = vpop.f32.mrf.mxu1 }
 0x4f6   : > { %v2035_v39 = vmul.f32 0.25, %v2025_v17 }
 0x4f7   : > { %v4815_v42 = vpop.eup %4017  ;;  %v2048_v6 = vmul.f32 1.442695, %v2034_v32 }
 0x4f8   : > { %v4817_v59 = vpop.eup %4019  ;;  %v2058_v29 = vsel %vm851_vm2, %v4815_v42, 0.0  ;;  %v2050_v8 = vmul.f32 1.442695, %v2035_v39 }
 0x4f9   : > { %v4821_v35 = vpop.eup %4021  ;;  %4023 = vpow2.f32 %v2048_v6  ;;  %v2061_v47 = vsel %vm851_vm2, %v4817_v59, 0.0  ;;  %2059 = vadd.xlane.f32.xlu0 %v2058_v29 }
 0x4fa   : > { %v2064_v61 = vsel %vm851_vm2, %v4821_v35, 0.0  ;;  %2062 = vadd.xlane.f32.xlu2 %v2061_v47  ;;  %4025 = vpow2.f32 %v2050_v8 }
 0x4fb   : > { %2065 = vadd.xlane.f32.xlu1 %v2064_v61 }
 0x4ff   : > { %v4827_v60 = vpop.eup %4023 }
 0x500   : > { %v2070_v30 = vsel %vm851_vm2, %v4827_v60, 0.0  ;;  %v4831_v4 = vpop.eup %4025 }
 0x501   : > { %2071 = vadd.xlane.f32.xlu0 %v2070_v30  ;;  %v2073_v55 = vsel %vm851_vm2, %v4831_v4, 0.0 }
 0x509   : > { %2074 = vadd.xlane.f32.xlu0 %v2073_v55 }
 0x512   : > { %3920 = vrot.lane.b32.xlu2 %v4545_v57, %s4198_s24  ;;  %v4851_v57 = vpop.f32.mrf.mxu3 }
 0x514   : > { %2524 = vrot.lane.b32.xlu1 %v4386_v24, %s4199_s30 }
 0x51a   : > { %2442 = vrot.lane.b32.xlu2 %v4375_v16, %s4200_s10  ;;  %v4855_v16 = vpop.f32.mrf.mxu3 }
 0x51c   : > { %2468 = vrot.lane.b32.xlu1 %v4378_v18, %s4199_s30 }
 0x51d   : > { %2414 = vrot.lane.b32.xlu0 %v4372_v14, %s4200_s10  ;;  %v2036_v14 = vmul.f32 1.442695, %v2028_v11 }
 0x51f   : > { %4027 = vpow2.f32 %v2036_v14 }
 0x522   : > { %2526 = vrot.lane.b32.xlu2 %v4386_v24, %s4200_s10  ;;  %v1857_v0 = vpop.f32.mrf.mxu3 }
 0x523   : > { %v2029_v10 = vmul.f32 0.25, %v1857_v0 }
 0x524   : > { %2582 = vrot.lane.b32.xlu1 %v4384_v22, %s4200_s10 }
 0x525   : > { %3930 = vrot.lane.b32.xlu0 %v4633_v26, %s4198_s24  ;;  %v2038_v58 = vmul.f32 1.442695, %v2029_v10  ;;  %v4857_v24 = vpop.eup %4027 }
 0x526   : > { %v2052_v63 = vsel %vm851_vm2, %v4857_v24, 0.0 }
 0x527   : > { %4029 = vpow2.f32 %v2038_v58 }
 0x52a   : > { %v1969_v62 = vpop.f32.mrf.mxu3 }
 0x52b   : > { %v2033_v6 = vmul.f32 0.25, %v1969_v62 }
 0x52c   : > { %2610 = vrot.lane.b32.xlu1 %v4390_v27, %s4200_s10 }
 0x52d   : > { %v4861_v26 = vpop.eup %4029  ;;  %v2046_v58 = vmul.f32 1.442695, %v2033_v6 }
 0x52e   : > { %v2055_v2 = vsel %vm851_vm2, %v4861_v26, 0.0 }
 0x54b   : > { %2053 = vadd.xlane.f32.xlu2 %v2052_v63 }
 0x54f   : > { %2056 = vadd.xlane.f32.xlu0 %v2055_v2 }
 0x563   : > { %2554 = vrot.lane.b32.xlu2 %v4392_v28, %s4200_s10  ;;  %2470 = vrot.lane.b32.xlu0 %v4378_v18, %s4200_s10 }
 0x56b   : > { %2552 = vrot.lane.b32.xlu0 %v4392_v28, %s4199_s30 }
 0x56c   : > { %v2060_v38 = vpop.xlane.xlu0 %2059 }
 0x56d   : > { %v2063_v13 = vpop.xlane.xlu2 %2062  ;;  %v2078_v54 = vadd.f32 1e-08, %v2060_v38 }
 0x56e   : > { %v2079_v33 = vadd.f32 1e-08, %v2063_v13 }
 0x56f   : > { %4031 = vrcp.f32 %v2078_v54  ;;  %v2125_v47 = vand.u32 2147483648, %v2078_v54  ;;  %v2123_v30 = vand.u32 2147483647, %v2078_v54  ;;  %vm2119_vm4 = vweird.f32 %v2078_v54 }
 0x570   : > { %4033 = vrcp.f32 %v2079_v33  ;;  %v2140_v8 = vand.u32 2147483648, %v2079_v33  ;;  %v2138_v55 = vand.u32 2147483647, %v2079_v33  ;;  %vm2134_vm6 = vweird.f32 %v2079_v33 }
 0x571   : > { %v2126_v63 = vor.u32 1.1754944e-38, %v2125_v47  ;;  %vm2124_vm8 = vcmp.eq.f32.partialorder %v2123_v30, 8.507059e+37 }
 0x572   : > { %v2141_v38 = vor.u32 1.1754944e-38, %v2140_v8  ;;  %vm2139_vm9 = vcmp.eq.f32.partialorder %v2138_v55, 8.507059e+37 }
 0x573   : > { %2496 = vrot.lane.b32.xlu0 %v4381_v20, %s4199_s30 }
 0x574   : > { %v2072_v34 = vpop.xlane.xlu0 %2071 }
 0x575   : > { %v4032_v12 = vpop.eup %4031  ;;  %v3921_v56 = vpop.permute.xlu2 %3920  ;;  %v4873_v32 = vadd.f32 1e-08, %v2072_v34 }
 0x576   : > { %v4034_v36 = vpop.eup %4033  ;;  %v2115_v49 = vmul.f32 %v4032_v12, %v2078_v54  ;;  %v3923_v50 = vunpack.i.h.bf16 %v3921_v56  ;;  %v3922_v18 = vunpack.i.l.bf16 %v3921_v56  ;;  %vm2120_vm15 = vweird.f32 %v4032_v12 }
 0x577   : > { %v2130_v28 = vmul.f32 %v4034_v36, %v2079_v33  ;;  %4035 = vrcp.f32 %v4873_v32  ;;  %vm2135_vm3 = vweird.f32 %v4034_v36  ;;  %vm2121_vm5 = vmor %vm2119_vm4, %vm2120_vm15  ;;  %vm2179_vm12 = vweird.f32 %v4873_v32 }
 0x578   : > { %v2116_v17 = vsub.f32 1.0, %v2115_v49  ;;  %2329 = vmatpush.msrb.mxu2 %v3922_v18  ;;  %2355 = vmatpush.msrb.mxu3 %v3923_v50  ;;  %vm2136_vm7 = vmor %vm2134_vm6, %vm2135_vm3 }
 0x579   : > { %v2131_v39 = vsub.f32 1.0, %v2130_v28 }
 0x57a   : > { %v2117_v29 = vmul.f32 %v4032_v12, %v2116_v17 }
 0x57b   : > { %v2132_v61 = vmul.f32 %v4034_v36, %v2131_v39  ;;  %2608 = vrot.lane.b32.xlu0 %v4390_v27, %s4199_s30 }
 0x57c   : > { %v2118_v11 = vadd.f32 %v4032_v12, %v2117_v29  ;;  %v2075_v0 = vpop.xlane.xlu0 %2074  ;;  %v2185_v29 = vand.u32 2147483648, %v4873_v32 }
 0x57d   : > { %v2133_v10 = vadd.f32 %v4034_v36, %v2132_v61  ;;  %v2083_v14 = vadd.f32 1e-08, %v2075_v0  ;;  %v4036_v13 = vpop.eup %4035  ;;  %v2183_v61 = vand.u32 2147483647, %v4873_v32 }
 0x57e   : > { %v2122_v2 = vsel %vm2121_vm5, %v4032_v12, %v2118_v11  ;;  %v2175_v49 = vmul.f32 %v4036_v13, %v4873_v32  ;;  %vm2180_vm10 = vweird.f32 %v4036_v13  ;;  %v2186_v11 = vor.u32 1.1754944e-38, %v2185_v29  ;;  %v4898_v32 = vpop.permute.xlu1 %2440 }
 0x57f   : > { %4037 = vrcp.f32 %v2083_v14  ;;  %v2127_v34 = vsel %vm2124_vm8, %v2126_v63, %v2122_v2  ;;  %v2137_v27 = vsel %vm2136_vm7, %v4034_v36, %v2133_v10  ;;  %v2200_v47 = vand.u32 2147483648, %v2083_v14  ;;  %vm2181_vm13 = vmor %vm2179_vm12, %vm2180_vm10 }
 0x580   : > { %v2128_v56 = vmul.f32 %v4815_v42, %v2127_v34  ;;  %v2142_v62 = vsel %vm2139_vm9, %v2141_v38, %v2137_v27  ;;  %4039 = vpow2.f32 %v2046_v58  ;;  %v2176_v50 = vsub.f32 1.0, %v2175_v49 }
 0x581   : > { %v2143_v54 = vmul.f32 %v4817_v59, %v2142_v62  ;;  %vm2194_vm14 = vweird.f32 %v2083_v14  ;;  %v2198_v8 = vand.u32 2147483647, %v2083_v14  ;;  %v2201_v0 = vor.u32 1.1754944e-38, %v2200_v47 }
 0x582   : > { %3782 = vmatmul.msk.f32.vlgmr.msrb.gmra.mxu0 %vm851_vm2, %v2128_v56  ;;  %v2177_v17 = vmul.f32 %v4036_v13, %v2176_v50  ;;  %vm2184_vm3 = vcmp.eq.f32.partialorder %v2183_v61, 8.507059e+37 }
 0x583   : > { %3783 = vmatmul.msk.f32.vlgmr.msra.gmra.mxu1 %vm851_vm2, %v2143_v54  ;;  %vm2199_vm4 = vcmp.eq.f32.partialorder %v2198_v8, 8.507059e+37 }
 0x584   : > { %v2178_v59 = vadd.f32 %v4036_v13, %v2177_v17 }
 0x585   : > { %v4038_v33 = vpop.eup %4037 }
 0x586   : > { %v2190_v12 = vmul.f32 %v4038_v33, %v2083_v14  ;;  %v4883_v18 = vpop.eup %4039  ;;  %vm2195_vm11 = vweird.f32 %v4038_v33  ;;  %v2182_v30 = vsel %vm2181_vm13, %v4036_v13, %v2178_v59  ;;  %v4900_v14 = vpop.permute.xlu2 %2442 }
 0x587   : > { %v2067_v42 = vsel %vm851_vm2, %v4883_v18, 0.0  ;;  %vm2196_vm15 = vmor %vm2194_vm14, %vm2195_vm11  ;;  %v2187_v10 = vsel %vm2184_vm3, %v2186_v11, %v2182_v30  ;;  %v2066_v13 = vpop.xlane.xlu1 %2065 }
 0x588   : > { %v2191_v28 = vsub.f32 1.0, %v2190_v12  ;;  %v2188_v34 = vmul.f32 %v4827_v60, %v2187_v10  ;;  %v2080_v60 = vadd.f32 1e-08, %v2066_v13 }
 0x58a   : > { %v2192_v36 = vmul.f32 %v4038_v33, %v2191_v28  ;;  %4041 = vrcp.f32 %v2080_v60  ;;  %vm2149_vm11 = vweird.f32 %v2080_v60 }
 0x58c   : > { %2068 = vadd.xlane.f32.xlu2 %v2067_v42  ;;  %v2193_v6 = vadd.f32 %v4038_v33, %v2192_v36 }
 0x58e   : > { %v2197_v55 = vsel %vm2196_vm15, %v4038_v33, %v2193_v6  ;;  %v4904_v56 = vpop.permute.xlu2 %2526 }
 0x58f   : > { %v4887_v39 = vpop.permute.xlu0 %2414  ;;  %v2202_v58 = vsel %vm2199_vm4, %v2201_v0, %v2197_v55  ;;  %v2525_v49 = vpop.permute.xlu1 %2524 }
 0x590   : > { %v2203_v27 = vmul.f32 %v4831_v4, %v2202_v58  ;;  %v4042_v54 = vpop.eup %4041 }
 0x591   : > { %v2145_v12 = vmul.f32 %v4042_v54, %v2080_v60  ;;  %vm2150_vm6 = vweird.f32 %v4042_v54 }
 0x592   : > { %vm4907_vm12 = vmor %vm2149_vm11, %vm2150_vm6 }
 0x593   : > { %v2146_v28 = vsub.f32 1.0, %v2145_v12 }
 0x597   : > { %v3931_v63 = vpop.permute.xlu0 %3930  ;;  %v2469_v29 = vpop.permute.xlu1 %2468 }
 0x598   : > { %v3933_v2 = vunpack.i.h.bf16 %v3931_v63  ;;  %v3932_v38 = vunpack.i.l.bf16 %v3931_v63 }
 0x59a   : > { %2381 = vmatpush.msra.mxu0 %v3932_v38  ;;  %2407 = vmatpush.msrb.mxu1 %v3933_v2  ;;  %v2155_v2 = vand.u32 2147483648, %v2080_v60 }
 0x59b   : > { %3786 = vmatmul.msk.f32.vlgmr.msra.gmra.mxu0 %vm851_vm2, %v2188_v34  ;;  %3787 = vmatmul.msk.f32.vlgmr.msrb.gmra.mxu1 %vm851_vm2, %v2203_v27  ;;  %v2153_v27 = vand.u32 2147483647, %v2080_v60 }
 0x59d   : > { %vm2154_vm3 = vcmp.eq.f32.partialorder %v2153_v27, 8.507059e+37 }
 0x59f   : > { %v2583_v60 = vpop.permute.xlu1 %2582 }
 0x5a4   : > { %2498 = vrot.lane.b32.xlu2 %v4381_v20, %s4200_s10 }
 0x5ac   : > { %2580 = vrot.lane.b32.xlu2 %v4384_v22, %s4199_s30  ;;  %v2147_v22 = vmul.f32 %v4042_v54, %v2146_v28 }
 0x5ae   : > { %v2148_v55 = vadd.f32 %v4042_v54, %v2147_v22 }
 0x5b0   : > { %v2152_v12 = vsel %vm4907_vm12, %v4042_v54, %v2148_v55 }
 0x5be   : > { %v2054_v4 = vpop.xlane.xlu2 %2053 }
 0x5bf   : > { %v2076_v62 = vadd.f32 1e-08, %v2054_v4 }
 0x5c1   : > { %4043 = vrcp.f32 %v2076_v62  ;;  %v2093_v59 = vand.u32 2147483647, %v2076_v62  ;;  %v2095_v6 = vand.u32 2147483648, %v2076_v62  ;;  %vm2089_vm7 = vweird.f32 %v2076_v62 }
 0x5c2   : > { %v2057_v33 = vpop.xlane.xlu0 %2056 }
 0x5c3   : > { %v2077_v20 = vadd.f32 1e-08, %v2057_v33  ;;  %vm2094_vm9 = vcmp.eq.f32.partialorder %v2093_v59, 8.507059e+37  ;;  %v2096_v11 = vor.u32 1.1754944e-38, %v2095_v6  ;;  %v2611_v59 = vpop.permute.xlu1 %2610 }
 0x5c5   : > { %4045 = vrcp.f32 %v2077_v20  ;;  %v2110_v0 = vand.u32 2147483648, %v2077_v20  ;;  %v2108_v58 = vand.u32 2147483647, %v2077_v20  ;;  %vm2104_vm13 = vweird.f32 %v2077_v20 }
 0x5c7   : > { %v4044_v50 = vpop.eup %4043  ;;  %vm2109_vm15 = vcmp.eq.f32.partialorder %v2108_v58, 8.507059e+37 }
 0x5c8   : > { %v2085_v17 = vmul.f32 %v4044_v50, %v2076_v62  ;;  %vm2090_vm5 = vweird.f32 %v4044_v50  ;;  %v2111_v62 = vor.u32 1.1754944e-38, %v2110_v0 }
 0x5c9   : > { %vm2091_vm8 = vmor %vm2089_vm7, %vm2090_vm5 }
 0x5ca   : > { %v2086_v36 = vsub.f32 1.0, %v2085_v17 }
 0x5cb   : > { %v4046_v42 = vpop.eup %4045 }
 0x5cc   : > { %v2087_v47 = vmul.f32 %v4044_v50, %v2086_v36  ;;  %v2100_v61 = vmul.f32 %v4046_v42, %v2077_v20  ;;  %vm2105_vm10 = vweird.f32 %v4046_v42 }
 0x5cd   : > { %vm2106_vm14 = vmor %vm2104_vm13, %vm2105_vm10 }
 0x5ce   : > { %v2088_v8 = vadd.f32 %v4044_v50, %v2087_v47  ;;  %v2101_v30 = vsub.f32 1.0, %v2100_v61 }
 0x5d0   : > { %v2102_v10 = vmul.f32 %v4046_v42, %v2101_v30  ;;  %v2092_v63 = vsel %vm2091_vm8, %v4044_v50, %v2088_v8  ;;  %v2156_v50 = vor.u32 1.1754944e-38, %v2155_v2 }
 0x5d1   : > { %v2097_v38 = vsel %vm2094_vm9, %v2096_v11, %v2092_v63 }
 0x5d2   : > { %v2103_v13 = vadd.f32 %v4046_v42, %v2102_v10  ;;  %v2098_v4 = vmul.f32 %v4857_v24, %v2097_v38  ;;  %v2157_v20 = vsel %vm2154_vm3, %v2156_v50, %v2152_v12 }
 0x5d4   : > { %3780 = vmatmul.msk.f32.vlgmr.msra.gmra.mxu2 %vm851_vm2, %v2098_v4  ;;  %v2107_v33 = vsel %vm2106_vm14, %v4046_v42, %v2103_v13 }
 0x5d5   : > { %3788 = vmatpush.xpose.msk.msra.mxu2 %vm613_vm1, %v4887_v39  ;;  %v2471_v28 = vpop.permute.xlu0 %2470  ;;  %v2112_v17 = vsel %vm2109_vm15, %v2111_v62, %v2107_v33  ;;  %v2158_v39 = vmul.f32 %v4821_v35, %v2157_v20 }
 0x5d6   : > { %3792 = vmatpush.xpose.msk.msrb.mxu0 %vm613_vm1, %v2471_v28  ;;  %v2113_v24 = vmul.f32 %v4861_v26, %v2112_v17  ;;  %v2555_v26 = vpop.permute.xlu2 %2554 }
 0x5d8   : > { %3781 = vmatmul.msk.f32.vlgmr.msra.gmra.mxu3 %vm851_vm2, %v2113_v24 }
 0x5d9   : > { %3790 = vmatpush.xpose.msk.msra.mxu3 %vm613_vm1, %v4900_v14  ;;  %3793 = vmatmul.msk.f32.vlgmr.msrb.gmra.mxu0 %vm613_vm1, %v2469_v29 }
 0x5da   : > { %3800 = vmatpush.xpose.msk.msra.mxu0 %vm613_vm1, %v2583_v60 }
 0x5dc   : > { %3784 = vmatmul.msk.f32.vlgmr.msrb.gmra.mxu2 %vm851_vm2, %v2158_v39 }
 0x5dd   : > { %3796 = vmatpush.xpose.msk.msrb.mxu2 %vm613_vm1, %v4904_v56  ;;  %v2553_v54 = vpop.permute.xlu0 %2552 }
 0x5e4   : > { %3789 = vmatmul.msk.f32.vlgmr.msra.gmra.mxu2 %vm613_vm1, %v4801_v48 }
 0x5e5   : > { %v2497_v6 = vpop.permute.xlu0 %2496 }
 0x5ec   : > { %3797 = vmatmul.msk.f32.vlgmr.msrb.gmra.mxu2 %vm613_vm1, %v2525_v49 }
 0x5ed   : > { %v2609_v55 = vpop.permute.xlu0 %2608 }
 0x5ff   : > { %v2069_v36 = vpop.xlane.xlu2 %2068  ;;  %v4942_v10 = vpop.f32.mrf.mxu0 }
 0x600   : > { %v2081_v42 = vadd.f32 1e-08, %v2069_v36  ;;  %v4950_v27 = vpop.f32.mrf.mxu1 }
 0x602   : > { %4047 = vrcp.f32 %v2081_v42  ;;  %v2170_v48 = vand.u32 2147483648, %v2081_v42  ;;  %v2168_v49 = vand.u32 2147483647, %v2081_v42  ;;  %vm2164_vm5 = vweird.f32 %v2081_v42 }
 0x604   : > { %v2171_v8 = vor.u32 1.1754944e-38, %v2170_v48  ;;  %vm2169_vm7 = vcmp.eq.f32.partialorder %v2168_v49, 8.507059e+37  ;;  %v3939_v48 = vpack.i.bf16 %v4516_v5, %v4421_v40 }
 0x607   : > { %v2499_v14 = vpop.permute.xlu2 %2498 }
 0x608   : > { %v4048_v22 = vpop.eup %4047  ;;  %3794 = vmatpush.xpose.msk.msra.mxu1 %vm613_vm1, %v2499_v14 }
 0x609   : > { %v2160_v35 = vmul.f32 %v4048_v22, %v2081_v42  ;;  %vm2165_vm4 = vweird.f32 %v4048_v22 }
 0x60a   : > { %vm2166_vm6 = vmor %vm2164_vm5, %vm2165_vm4 }
 0x60b   : > { %v2161_v56 = vsub.f32 1.0, %v2160_v35  ;;  %3795 = vmatmul.msk.f32.vlgmr.msra.gmra.mxu1 %vm613_vm1, %v2497_v6 }
 0x60c   : > { %3802 = vmatpush.xpose.msk.msrb.mxu1 %vm613_vm1, %v2611_v59 }
 0x60d   : > { %v2162_v29 = vmul.f32 %v4048_v22, %v2161_v56 }
 0x60f   : > { %v2163_v47 = vadd.f32 %v4048_v22, %v2162_v29  ;;  %v2581_v61 = vpop.permute.xlu2 %2580 }
 0x610   : > { %3801 = vmatmul.msk.f32.vlgmr.msra.gmra.mxu0 %vm613_vm1, %v2581_v61 }
 0x611   : > { %v2167_v30 = vsel %vm2166_vm6, %v4048_v22, %v2163_v47 }
 0x612   : > { %v2172_v11 = vsel %vm2169_vm7, %v2171_v8, %v2167_v30  ;;  %v3944_v30 = vpack.i.bf16 %v4506_v51, %v4435_v45 }
 0x613   : > { %3803 = vmatmul.msk.f32.vlgmr.msrb.gmra.mxu1 %vm613_vm1, %v2609_v55  ;;  %v2173_v0 = vmul.f32 %v4883_v18, %v2172_v11 }
 0x615   : > { %3785 = vmatmul.msk.f32.vlgmr.msrb.gmra.mxu3 %vm851_vm2, %v2173_v0 }
 0x616   : > { %3798 = vmatpush.xpose.msk.msrb.mxu3 %vm613_vm1, %v2555_v26 }
 0x618   : > { %v4944_v58 = vpop.f32.mrf.mxu0  ;;  %v4952_v13 = vpop.f32.mrf.mxu1 }
 0x61d   : > { %3791 = vmatmul.msk.f32.vlgmr.msra.gmra.mxu3 %vm613_vm1, %v4898_v32 }
 0x625   : > { %3799 = vmatmul.msk.f32.vlgmr.msrb.gmra.mxu3 %vm613_vm1, %v2553_v54 }
 0x656   : > { %v2493_v63 = vpop.f32.mrf.mxu0 }
 0x657   : > { %v2638_v2 = vmul.f32 0.25, %v2493_v63  ;;  %v2227_v56 = vpop.f32.mrf.mxu2 }
 0x659   : > { %v2648_v38 = vmul.f32 1.442695, %v2638_v2 }
 0x65b   : > { %4049 = vpow2.f32 %v2648_v38  ;;  %v4954_v50 = vpop.f32.mrf.mxu3 }
 0x65f   : > { %v2331_v47 = vpop.f32.mrf.mxu2 }
 0x661   : > { %v4946_v34 = vpop.eup %4049 }
 0x662   : > { %v2666_v18 = vsel %vm851_vm2, %v4946_v34, 0.0 }
 0x663   : > { %2667 = vadd.xlane.f32.xlu0 %v2666_v18 }
 0x667   : > { %v2437_v61 = vpop.f32.mrf.mxu2 }
 0x668   : > { %v2636_v55 = vmul.f32 0.25, %v2437_v61 }
 0x66a   : > { %v2644_v11 = vmul.f32 1.442695, %v2636_v55 }
 0x66f   : > { %v2549_v40 = vpop.f32.mrf.mxu2 }
 0x670   : > { %v2640_v5 = vmul.f32 0.25, %v2549_v40 }
 0x672   : > { %v2652_v63 = vmul.f32 1.442695, %v2640_v5 }
 0x688   : > { %v2521_v32 = vpop.f32.mrf.mxu1 }
 0x689   : > { %v2639_v4 = vmul.f32 0.25, %v2521_v32 }
 0x68b   : > { %v2650_v62 = vmul.f32 1.442695, %v2639_v4 }
 0x68d   : > { %4051 = vpow2.f32 %v2650_v62  ;;  %v2605_v33 = vpop.f32.mrf.mxu0 }
 0x68e   : > { %v2642_v12 = vmul.f32 0.25, %v2605_v33 }
 0x690   : > { %v2656_v28 = vmul.f32 1.442695, %v2642_v12  ;;  %v2633_v17 = vpop.f32.mrf.mxu1 }
 0x691   : > { %v2643_v60 = vmul.f32 0.25, %v2633_v17 }
 0x692   : > { %4053 = vpow2.f32 %v2656_v28 }
 0x693   : > { %v4956_v24 = vpop.eup %4051  ;;  %v2658_v20 = vmul.f32 1.442695, %v2643_v60 }
 0x694   : > { %v2669_v39 = vsel %vm851_vm2, %v4956_v24, 0.0 }
 0x695   : > { %4055 = vpow2.f32 %v2658_v20  ;;  %2670 = vadd.xlane.f32.xlu1 %v2669_v39 }
 0x698   : > { %v4960_v26 = vpop.eup %4053  ;;  %v4962_v54 = vpop.f32.mrf.mxu3 }
 0x699   : > { %v2678_v36 = vsel %vm851_vm2, %v4960_v26, 0.0 }
 0x69a   : > { %2679 = vadd.xlane.f32.xlu2 %v2678_v36 }
 0x69b   : > { %v4966_v42 = vpop.eup %4055 }
 0x69c   : > { %v2681_v14 = vsel %vm851_vm2, %v4966_v42, 0.0 }
 0x69d   : > { %2682 = vadd.xlane.f32.xlu0 %v2681_v14 }
 0x6a0   : > { %v2465_v22 = vpop.f32.mrf.mxu3 }
 0x6a1   : > { %v2637_v8 = vmul.f32 0.25, %v2465_v22 }
 0x6a8   : > { %v2577_v59 = vpop.f32.mrf.mxu3 }
 0x6a9   : > { %v2641_v6 = vmul.f32 0.25, %v2577_v59 }
 0x6ab   : > { %v2654_v35 = vmul.f32 1.442695, %v2641_v6 }
 0x6ad   : > { %4057 = vpow2.f32 %v2654_v35 }
 0x6ae   : > { %3935 = vrot.lane.b32.xlu1 %v4488_v21, %s4199_s30  ;;  %v2646_v21 = vmul.f32 1.442695, %v2637_v8 }
 0x6b0   : > { %4059 = vpow2.f32 %v2646_v21 }
 0x6b1   : > { %4061 = vpow2.f32 %v2644_v11 }
 0x6b2   : > { %3940 = vrot.lane.b32.xlu2 %v3939_v48, %s4199_s30  ;;  %4063 = vpow2.f32 %v2652_v63 }
 0x6b3   : > { %v4975_v29 = vpop.eup %4057 }
 0x6b4   : > { %v2675_v49 = vsel %vm851_vm2, %v4975_v29, 0.0 }
 0x6b5   : > { %2676 = vadd.xlane.f32.xlu0 %v2675_v49 }
 0x6b6   : > { %v4984_v0 = vpop.eup %4059 }
 0x6b7   : > { %v4986_v2 = vpop.eup %4061  ;;  %v2663_v45 = vsel %vm851_vm2, %v4984_v0, 0.0 }
 0x6b8   : > { %v2660_v51 = vsel %vm851_vm2, %v4986_v2, 0.0  ;;  %v4994_v38 = vpop.eup %4063 }
 0x6c9   : > { %3945 = vrot.lane.b32.xlu0 %v3944_v30, %s4199_s30 }
 0x6d1   : > { %3028 = vrot.lane.b32.xlu0 %v4803_v15, %s4200_s10  ;;  %v2672_v15 = vsel %vm851_vm2, %v4994_v38, 0.0 }
 0x6d6   : > { %v2668_v18 = vpop.xlane.xlu0 %2667 }
 0x6d7   : > { %v2686_v32 = vadd.f32 1e-08, %v2668_v18 }
 0x6d8   : > { %2664 = vadd.xlane.f32.xlu1 %v2663_v45 }
 0x6d9   : > { %3030 = vrot.lane.b32.xlu0 %v4851_v57, %s4200_s10  ;;  %4065 = vrcp.f32 %v2686_v32  ;;  %v2733_v12 = vand.u32 2147483648, %v2686_v32  ;;  %vm2727_vm9 = vweird.f32 %v2686_v32 }
 0x6db   : > { %2661 = vadd.xlane.f32.xlu2 %v2660_v51  ;;  %v2734_v28 = vor.u32 1.1754944e-38, %v2733_v12 }
 0x6df   : > { %v4066_v57 = vpop.eup %4065 }
 0x6e0   : > { %v2723_v4 = vmul.f32 %v4066_v57, %v2686_v32  ;;  %vm2728_vm8 = vweird.f32 %v4066_v57 }
 0x6e1   : > { %3036 = vrot.lane.b32.xlu0 %v4807_v3, %s4200_s10  ;;  %vm2729_vm10 = vmor %vm2727_vm9, %vm2728_vm8 }
 0x6e2   : > { %v2724_v3 = vsub.f32 1.0, %v2723_v4 }
 0x6e3   : > { %2673 = vadd.xlane.f32.xlu2 %v2672_v15 }
 0x6e4   : > { %v2725_v62 = vmul.f32 %v4066_v57, %v2724_v3 }
 0x6f1   : > { %2968 = vrot.lane.b32.xlu1 %v4526_v37, %s4199_s30  ;;  %v2726_v37 = vadd.f32 %v4066_v57, %v2725_v62 }
 0x6f9   : > { %3060 = vrot.lane.b32.xlu1 %v2227_v56, %s4197_s23 }
 0x6fb   : > { %2994 = vrot.lane.b32.xlu2 %v4536_v53, %s4199_s30  ;;  %v2731_v53 = vand.u32 2147483647, %v2686_v32 }
 0x6fd   : > { %vm2732_vm11 = vcmp.eq.f32.partialorder %v2731_v53, 8.507059e+37 }
 0x701   : > { %3062 = vrot.lane.b32.xlu1 %v4954_v50, %s4197_s23  ;;  %v2730_v50 = vsel %vm2729_vm10, %v4066_v57, %v2726_v37 }
 0x703   : > { %3040 = vrot.lane.b32.xlu2 %v4811_v1, %s4200_s10  ;;  %v2735_v1 = vsel %vm2732_vm11, %v2734_v28, %v2730_v50 }
 0x704   : > { %v2736_v39 = vmul.f32 %v4946_v34, %v2735_v1 }
 0x708   : > { %v2671_v20 = vpop.xlane.xlu1 %2670 }
 0x709   : > { %3068 = vrot.lane.b32.xlu1 %v2331_v47, %s4197_s23 }
 0x70b   : > { %3032 = vrot.lane.b32.xlu2 %v4805_v52, %s4200_s10  ;;  %v2687_v52 = vadd.f32 1e-08, %v2671_v20 }
 0x70d   : > { %v2680_v33 = vpop.xlane.xlu2 %2679  ;;  %4067 = vrcp.f32 %v2687_v52  ;;  %v2748_v49 = vand.u32 2147483648, %v2687_v52  ;;  %vm2742_vm13 = vweird.f32 %v2687_v52 }
 0x70e   : > { %v2690_v11 = vadd.f32 1e-08, %v2680_v33 }
 0x70f   : > { %v2749_v61 = vor.u32 1.1754944e-38, %v2748_v49 }
 0x710   : > { %v2683_v6 = vpop.xlane.xlu0 %2682  ;;  %vm2787_vm7 = vweird.f32 %v2690_v11 }
 0x711   : > { %3072 = vrot.lane.b32.xlu1 %v4944_v58, %s4197_s23  ;;  %v2691_v8 = vadd.f32 1e-08, %v2683_v6 }
 0x713   : > { %v4068_v59 = vpop.eup %4067  ;;  %4069 = vrcp.f32 %v2691_v8  ;;  %v2808_v53 = vand.u32 2147483648, %v2691_v8  ;;  %vm2802_vm4 = vweird.f32 %v2691_v8  ;;  %v2806_v50 = vand.u32 2147483647, %v2691_v8 }
 0x714   : > { %v2738_v34 = vmul.f32 %v4068_v59, %v2687_v52  ;;  %vm2743_vm12 = vweird.f32 %v4068_v59  ;;  %4071 = vrcp.f32 %v2690_v11 }
 0x715   : > { %v3941_v17 = vpop.permute.xlu2 %3940  ;;  %vm2744_vm14 = vmor %vm2742_vm13, %vm2743_vm12  ;;  %vm2807_vm8 = vcmp.eq.f32.partialorder %v2806_v50, 8.507059e+37 }
 0x716   : > { %v3942_v60 = vunpack.i.l.bf16 %v3941_v17  ;;  %v3943_v22 = vunpack.i.h.bf16 %v3941_v17 }
 0x718   : > { %2885 = vmatpush.msrb.mxu0 %v3942_v60  ;;  %v2791_v60 = vand.u32 2147483647, %v2690_v11 }
 0x719   : > { %3064 = vrot.lane.b32.xlu1 %v4942_v10, %s4197_s23  ;;  %3806 = vmatmul.msk.f32.vlgmr.msrb.gmra.mxu0 %vm851_vm2, %v2736_v39  ;;  %v2739_v10 = vsub.f32 1.0, %v2738_v34 }
 0x71a   : > { %vm5057_vm11 = vcmp.eq.f32.partialorder %v2791_v60, 8.507059e+37 }
 0x71b   : > { %v2740_v35 = vmul.f32 %v4068_v59, %v2739_v10 }
 0x71d   : > { %v2741_v56 = vadd.f32 %v4068_v59, %v2740_v35 }
 0x71f   : > { %v2745_v47 = vsel %vm2744_vm14, %v4068_v59, %v2741_v56 }
 0x720   : > { %v3936_v36 = vpop.permute.xlu1 %3935 }
 0x721   : > { %v3938_v14 = vunpack.i.h.bf16 %v3936_v36  ;;  %v3937_v58 = vunpack.i.l.bf16 %v3936_v36  ;;  %3070 = vrot.lane.b32.xlu1 %v4962_v54, %s4197_s23  ;;  %v2746_v54 = vand.u32 2147483647, %v2687_v52  ;;  %v2793_v36 = vand.u32 2147483648, %v2690_v11 }
 0x723   : > { %2833 = vmatpush.msra.mxu2 %v3937_v58  ;;  %2859 = vmatpush.msra.mxu3 %v3938_v14  ;;  %vm2747_vm15 = vcmp.eq.f32.partialorder %v2746_v54, 8.507059e+37  ;;  %v2809_v14 = vor.u32 1.1754944e-38, %v2808_v53 }
 0x724   : > { %v2750_v30 = vsel %vm2747_vm15, %v2749_v61, %v2745_v47  ;;  %v2794_v61 = vor.u32 1.1754944e-38, %v2793_v36 }
 0x725   : > { %2937 = vmatpush.msrb.mxu2 %v3943_v22  ;;  %v2751_v40 = vmul.f32 %v4956_v24, %v2750_v30 }
 0x728   : > { %v2677_v48 = vpop.xlane.xlu0 %2676 }
 0x729   : > { %3074 = vrot.lane.b32.xlu1 %v4952_v13, %s4197_s23  ;;  %v5026_v5 = vadd.f32 1e-08, %v2677_v48 }
 0x72b   : > { %4073 = vrcp.f32 %v5026_v5 }
 0x731   : > { %3066 = vrot.lane.b32.xlu1 %v4950_v27, %s4197_s23  ;;  %v4070_v27 = vpop.eup %4069  ;;  %s3695_s23 = sshll.u32 %s342_s28, 3 }
 0x732   : > { %v2798_v63 = vmul.f32 %v4070_v27, %v2691_v8  ;;  %v5028_v45 = vpop.eup %4071  ;;  %vm2803_vm3 = vweird.f32 %v4070_v27  ;;  %s344_s15 = scalar_lea.vmem [#allocation3], %s3695_s23 }
 0x733   : > { %v2783_v15 = vmul.f32 %v5028_v45, %v2690_v11  ;;  %v5032_v57 = vpop.eup %4073  ;;  %vm5040_vm5 = vmor %vm2802_vm4, %vm2803_vm3  ;;  %vm2788_vm6 = vweird.f32 %v5028_v45  ;;  %s3617_s17 = sshll.u32 %s344_s15, 4  ;;  %s3618_s17 = int_to_ptr.vmem [resolvable:$true] %s3617_s17 }
 0x734   : > { %v2799_v51 = vsub.f32 1.0, %v2798_v63  ;;  %v2768_v37 = vmul.f32 %v5032_v57, %v5026_v5  ;;  %vm5052_vm9 = vmor %vm2787_vm7, %vm2788_vm6  ;;  %vm2773_vm15 = vweird.f32 %v5032_v57 }
 0x735   : > { %v2784_v4 = vsub.f32 1.0, %v2783_v15 }
 0x736   : > { %v2800_v24 = vmul.f32 %v4070_v27, %v2799_v51  ;;  %v2769_v17 = vsub.f32 1.0, %v2768_v37 }
 0x737   : > { %v2785_v12 = vmul.f32 %v5028_v45, %v2784_v4 }
 0x738   : > { %v2801_v33 = vadd.f32 %v4070_v27, %v2800_v24  ;;  %v2770_v10 = vmul.f32 %v5032_v57, %v2769_v17  ;;  %v2776_v24 = vand.u32 2147483647, %v5026_v5 }
 0x739   : > { %v2786_v52 = vadd.f32 %v5028_v45, %v2785_v12 }
 0x73a   : > { %v2805_v39 = vsel %vm5040_vm5, %v4070_v27, %v2801_v33  ;;  %v2771_v63 = vadd.f32 %v5032_v57, %v2770_v10  ;;  %vm2772_vm5 = vweird.f32 %v5026_v5  ;;  %v3145_v10 = vld [vmem:[%s5326_s5 + $0x20] sm:$0xff] }
 0x73b   : > { %v3946_v55 = vpop.permute.xlu0 %3945  ;;  %v2810_v56 = vsel %vm2807_vm8, %v2809_v14, %v2805_v39  ;;  %v2790_v30 = vsel %vm5052_vm9, %v5028_v45, %v2786_v52  ;;  %v2778_v45 = vand.u32 2147483648, %v5026_v5  ;;  %vm5076_vm7 = vmor %vm2772_vm5, %vm2773_vm15  ;;  %vm2777_vm9 = vcmp.eq.f32.partialorder %v2776_v24, 8.507059e+37 }
 0x73c   : > { %v3948_v13 = vunpack.i.h.bf16 %v3946_v55  ;;  %v3947_v21 = vunpack.i.l.bf16 %v3946_v55  ;;  %v2795_v5 = vsel %vm5057_vm11, %v2794_v61, %v2790_v30 }
 0x73d   : > { %v2779_v53 = vor.u32 1.1754944e-38, %v2778_v45  ;;  %v2796_v60 = vmul.f32 %v4960_v26, %v2795_v5 }
 0x73e   : > { %2911 = vmatpush.msra.mxu1 %v3947_v21  ;;  %2963 = vmatpush.msrb.mxu3 %v3948_v13  ;;  %v2811_v21 = vmul.f32 %v4966_v42, %v2810_v56  ;;  %v3142_v56 = vld [vmem:[%s5326_s5 + $0x8] sm:$0xff] }
 0x73f   : > { %3807 = vmatmul.msk.f32.vlgmr.msra.gmra.mxu1 %vm851_vm2, %v2751_v40 }
 0x74b   : > { %v2665_v18 = vpop.xlane.xlu1 %2664 }
 0x74c   : > { %v2685_v32 = vadd.f32 1e-08, %v2665_v18 }
 0x74e   : > { %4075 = vrcp.f32 %v2685_v32  ;;  %v2662_v3 = vpop.xlane.xlu2 %2661  ;;  %v2718_v6 = vand.u32 2147483648, %v2685_v32  ;;  %v2716_v54 = vand.u32 2147483647, %v2685_v32  ;;  %vm2712_vm12 = vweird.f32 %v2685_v32 }
 0x74f   : > { %v5034_v62 = vadd.f32 1e-08, %v2662_v3 }
 0x750   : > { %v2719_v11 = vor.u32 1.1754944e-38, %v2718_v6  ;;  %vm2717_vm3 = vcmp.eq.f32.partialorder %v2716_v54, 8.507059e+37  ;;  %v3144_v6 = vld [vmem:[%s5326_s5 + $0x18] sm:$0xff] }
 0x751   : > { %4077 = vrcp.f32 %v5034_v62  ;;  %v2703_v13 = vand.u32 2147483648, %v5034_v62  ;;  %v2701_v27 = vand.u32 2147483647, %v5034_v62  ;;  %vm2697_vm4 = vweird.f32 %v5034_v62 }
 0x753   : > { %v2704_v4 = vor.u32 1.1754944e-38, %v2703_v13  ;;  %vm2702_vm8 = vcmp.eq.f32.partialorder %v2701_v27, 8.507059e+37 }
 0x754   : > { %v4076_v28 = vpop.eup %4075 }
 0x755   : > { %v2708_v20 = vmul.f32 %v4076_v28, %v2685_v32  ;;  %vm2713_vm10 = vweird.f32 %v4076_v28 }
 0x756   : > { %v2674_v58 = vpop.xlane.xlu2 %2673  ;;  %vm2714_vm13 = vmor %vm2712_vm12, %vm2713_vm10 }
 0x757   : > { %v4078_v22 = vpop.eup %4077  ;;  %v2709_v59 = vsub.f32 1.0, %v2708_v20  ;;  %v5048_v34 = vadd.f32 1e-08, %v2674_v58 }
 0x758   : > { %v2693_v35 = vmul.f32 %v4078_v22, %v5034_v62  ;;  %vm2698_vm14 = vweird.f32 %v4078_v22 }
 0x759   : > { %v2710_v49 = vmul.f32 %v4076_v28, %v2709_v59  ;;  %4079 = vrcp.f32 %v5048_v34  ;;  %vm2699_vm6 = vmor %vm2697_vm4, %vm2698_vm14  ;;  %v2763_v1 = vand.u32 2147483648, %v5048_v34  ;;  %v2761_v39 = vand.u32 2147483647, %v5048_v34 }
 0x75a   : > { %v2694_v8 = vsub.f32 1.0, %v2693_v35  ;;  %vm2757_vm11 = vweird.f32 %v5048_v34  ;;  %v3143_v35 = vld [vmem:[%s5326_s5 + $0x10] sm:$0xff]  ;;  %vm3132_vm14 = vcmask 392192  }
 0x75b   : > { %v2711_v55 = vadd.f32 %v4076_v28, %v2710_v49 }
 0x75c   : > { %v2695_v40 = vmul.f32 %v4078_v22, %v2694_v8 }
 0x75d   : > { %v2715_v51 = vsel %vm2714_vm13, %v4076_v28, %v2711_v55  ;;  %vm2762_vm13 = vcmp.eq.f32.partialorder %v2761_v39, 8.507059e+37  ;;  %v3141_v55 = vld [vmem:[%s5326_s5] sm:$0xff] }
 0x75e   : > { %v2696_v15 = vadd.f32 %v4078_v22, %v2695_v40  ;;  %v2995_v18 = vpop.permute.xlu2 %2994  ;;  %v2720_v32 = vsel %vm2717_vm3, %v2719_v11, %v2715_v51  ;;  %v3029_v40 = vpop.permute.xlu0 %3028 }
 0x75f   : > { %v4080_v42 = vpop.eup %4079  ;;  %3015 = vmatpush.msrb.mxu1 %v2995_v18  ;;  %v2721_v3 = vmul.f32 %v4984_v0, %v2720_v32  ;;  %v2775_v0 = vsel %vm5076_vm7, %v5032_v57, %v2771_v63  ;;  %v3116_v51 = vsel %vm613_vm1, %v4579_v19, %v3029_v40 }
 0x760   : > { %v2753_v62 = vmul.f32 %v4080_v42, %v5048_v34  ;;  %3811 = vmatmul.msk.f32.vlgmr.msrb.gmra.mxu1 %vm851_vm2, %v2811_v21  ;;  %v2700_v33 = vsel %vm2699_vm6, %v4078_v22, %v2696_v15  ;;  %vm2758_vm10 = vweird.f32 %v4080_v42  ;;  %v2780_v52 = vsel %vm2777_vm9, %v2779_v53, %v2775_v0  ;;  %v3147_v34 = vld [vmem:[%s5326_s5 + $0x30] sm:$0xff] }
 0x761   : > { %3805 = vmatmul.msk.f32.vlgmr.msra.gmra.mxu3 %vm851_vm2, %v2721_v3  ;;  %v2705_v12 = vsel %vm2702_vm8, %v2704_v4, %v2700_v33  ;;  %vm2759_vm12 = vmor %vm2757_vm11, %vm2758_vm10  ;;  %v2781_v36 = vmul.f32 %v4975_v29, %v2780_v52  ;;  %v3148_v29 = vld [vmem:[%s5326_s5 + $0x38] sm:$0xff] }
 0x762   : > { %v2754_v50 = vsub.f32 1.0, %v2753_v62  ;;  %v2706_v28 = vmul.f32 %v4986_v2, %v2705_v12  ;;  %v2764_v2 = vor.u32 1.1754944e-38, %v2763_v1  ;;  %3829 = vmatpush.msra.mxu3 %v3148_v29 }
 0x763   : > { %v2969_v17 = vpop.permute.xlu1 %2968 }
 0x764   : > { %v2755_v20 = vmul.f32 %v4080_v42, %v2754_v50  ;;  %3804 = vmatmul.msk.f32.vlgmr.msra.gmra.mxu2 %vm851_vm2, %v2706_v28  ;;  %2989 = vmatpush.msra.mxu0 %v2969_v17 }
 0x765   : > { %3810 = vmatmul.msk.f32.vlgmr.msra.gmra.mxu0 %vm851_vm2, %v2796_v60  ;;  %3828 = vmatpush.msra.mxu2 %v3148_v29 }
 0x766   : > { %v2756_v57 = vadd.f32 %v4080_v42, %v2755_v20  ;;  %3186 = vmatpush.msrb.mxu0 %v3148_v29  ;;  %3831 = vmatpush.msra.mxu3 %v3147_v34  ;;  %v3041_v30 = vpop.permute.xlu2 %3040  ;;  %v3031_v18 = vpop.permute.xlu0 %3030 }
 0x767   : > { %3830 = vmatpush.msra.mxu2 %v3147_v34  ;;  %v3117_v24 = vsel %vm613_vm1, %v4595_v41, %v3031_v18  ;;  %v3122_v41 = vsel %vm613_vm1, %v4585_v31, %v3041_v30 }
 0x768   : > { %v2760_v14 = vsel %vm2759_vm12, %v4080_v42, %v2756_v57  ;;  %3187 = vmatpush.msrb.mxu0 %v3147_v34 }
 0x769   : > { %3809 = vmatmul.msk.f32.vlgmr.msrb.gmra.mxu3 %vm851_vm2, %v2781_v36  ;;  %v2765_v26 = vsel %vm2762_vm13, %v2764_v2, %v2760_v14 }
 0x76a   : > { %v2766_v58 = vmul.f32 %v4994_v38, %v2765_v26  ;;  %v3146_v38 = vld [vmem:[%s5326_s5 + $0x28] sm:$0xff] }
 0x76b   : > { %3188 = vmatpush.msrb.mxu0 %v3146_v38  ;;  %3833 = vmatpush.msra.mxu3 %v3146_v38  ;;  %v3061_v61 = vpop.permute.xlu1 %3060 }
 0x76c   : > { %3808 = vmatmul.msk.f32.vlgmr.msrb.gmra.mxu2 %vm851_vm2, %v2766_v58  ;;  %vm3153_vm2 = vcmask 523264   ;;  %v3124_v45 = vsel %vm503_vm0, %v3116_v51, %v3061_v61 }
 0x76d   : > { %3832 = vmatpush.msra.mxu2 %v3146_v38  ;;  %3189 = vmatpush.msrb.mxu0 %v3145_v10 }
 0x76e   : > { %3835 = vmatpush.msra.mxu3 %v3145_v10  ;;  %v3033_v13 = vpop.permute.xlu2 %3032  ;;  %v3037_v37 = vpop.permute.xlu0 %3036 }
 0x76f   : > { %3190 = vmatpush.msrb.mxu0 %v3144_v6  ;;  %3834 = vmatpush.msra.mxu2 %v3145_v10  ;;  %v3118_v33 = vsel %vm613_vm1, %v4581_v23, %v3033_v13  ;;  %v3120_v39 = vsel %vm613_vm1, %v4583_v25, %v3037_v37 }
 0x770   : > { %3837 = vmatpush.msra.mxu3 %v3144_v6 }
 0x771   : > { %3191 = vmatpush.msrb.mxu0 %v3143_v35  ;;  %3836 = vmatpush.msra.mxu2 %v3144_v6 }
 0x772   : > { %3839 = vmatpush.msra.mxu3 %v3143_v35 }
 0x773   : > { %3192 = vmatpush.msrb.mxu0 %v3142_v56  ;;  %3838 = vmatpush.msra.mxu2 %v3143_v35  ;;  %v3063_v8 = vpop.permute.xlu1 %3062 }
 0x774   : > { %3841 = vmatpush.msra.mxu3 %v3142_v56  ;;  %v3125_v4 = vsel %vm503_vm0, %v3117_v24, %v3063_v8 }
 0x775   : > { %3840 = vmatpush.msra.mxu2 %v3142_v56  ;;  %3193 = vmatpush.msrb.mxu0 %v3141_v55 }
 0x776   : > { %3843 = vmatpush.msra.mxu3 %v3141_v55 }
 0x777   : > { %3842 = vmatpush.msra.mxu2 %v3141_v55 }
 0x796   : > { %v2887_v22 = vpop.f32.mrf.mxu0 }
 0x797   : > { %3096 = vrot.lane.b32.xlu2 %v2887_v22, %s4196_s29 }
 0x79f   : > { %3042 = vrot.lane.b32.xlu2 %v4813_v9, %s4200_s10 }
 0x7bc   : > { %v2913_v49 = vpop.f32.mrf.mxu1 }
 0x7dd   : > { %v3017_v47 = vpop.f32.mrf.mxu1 }
 0x7e2   : > { %v2991_v59 = vpop.f32.mrf.mxu0 }
 0x7e3   : > { %3104 = vrot.lane.b32.xlu0 %v2991_v59, %s4196_s29 }
 0x7e4   : > { %v2861_v48 = vpop.f32.mrf.mxu3 }
 0x7e7   : > { %v2835_v9 = vpop.f32.mrf.mxu2 }
 0x7e8   : > { %3092 = vrot.lane.b32.xlu2 %v2835_v9, %s4196_s29 }
 0x7eb   : > { %3038 = vrot.lane.b32.xlu0 %v4855_v16, %s4200_s10 }
 0x7ec   : > { %v2965_v54 = vpop.f32.mrf.mxu3 }
 0x7ef   : > { %v2939_v16 = vpop.f32.mrf.mxu2 }
 0x7f0   : > { %3094 = vrot.lane.b32.xlu2 %v2861_v48, %s4196_s29 }
 0x7f1   : > { %v3097_v21 = vpop.permute.xlu2 %3096 }
 0x7f3   : > { %3100 = vrot.lane.b32.xlu0 %v2939_v16, %s4196_s29 }
 0x7f8   : > { %3034 = vrot.lane.b32.xlu2 %v4809_v7, %s4200_s10  ;;  %v3069_v7 = vpop.permute.xlu1 %3068 }
 0x7f9   : > { %v3043_v27 = vpop.permute.xlu2 %3042  ;;  %v3128_v52 = vsel %vm503_vm0, %v3120_v39, %v3069_v7 }
 0x7fa   : > { %v3123_v25 = vsel %vm613_vm1, %v4603_v46, %v3043_v27  ;;  %v3951_v46 = vld [vmem:[%s5328_s7] ss:$0 sm:$0xff] }
 0x7fb   : > { %3102 = vrot.lane.b32.xlu0 %v2965_v54, %s4196_s29 }
 0x800   : > { %3098 = vrot.lane.b32.xlu2 %v2913_v49, %s4196_s29  ;;  %v3073_v11 = vpop.permute.xlu1 %3072 }
 0x801   : > { %v3130_v53 = vsel %vm503_vm0, %v3122_v41, %v3073_v11 }
 0x803   : > { %3106 = vrot.lane.b32.xlu0 %v3017_v47, %s4196_s29  ;;  %s4145_s29 = scalar_lea.hbm %s4144_s25, 8 }
 0x804   : > { %p4146_p11 = scmp.ne.s32.totalorder %s4144_s25, %s4145_s29  ;;  %p4151_p1 = scmp.lt.s32.totalorder %s4149_s27, %s4145_s29 }
 0x806   : > { %p4147_p12 = pnand %p4146_p11, %p4289_p5  ;;  %p4152_p2 = por %p4151_p1, %p4150_p0 }
 0x808   : > { %v3065_v63 = vpop.permute.xlu1 %3064  ;;  %p4148_p13 = pneg %p4147_p12 }
 0x809   : > { %v3126_v5 = vsel %vm503_vm0, %v3118_v33, %v3065_v63 }
 0x80a   : > { %v5157_v0 = vsel %vm3132_vm14, %v3126_v5, %v3097_v21  ;;  %p4153_p3 = pnand %p4152_p2, %p4148_p13 }
 0x810   : > { %v3071_v42 = vpop.permute.xlu1 %3070 }
 0x818   : > { %v3075_v62 = vpop.permute.xlu1 %3074 }
 0x819   : > { %v3131_v22 = vsel %vm503_vm0, %v3123_v25, %v3075_v62 }
 0x820   : > { %v3067_v1 = vpop.permute.xlu1 %3066 }
 0x842   : > { %v3093_v15 = vpop.permute.xlu2 %3092 }
 0x843   : > { %v5141_v32 = vsel %vm3132_vm14, %v3124_v45, %v3093_v15 }
 0x844   : > { %3812 = vmatmul.msk.f32.vlgmr.msrb.gmra.mxu0 %vm3153_vm2, %v5141_v32 }
 0x84a   : > { %v3095_v3 = vpop.permute.xlu2 %3094 }
 0x84b   : > { %v5149_v19 = vsel %vm3132_vm14, %v3125_v4, %v3095_v3 }
 0x84c   : > { %3813 = vmatmul.msk.f32.gmra.mxu0 %vm3153_vm2, %v5149_v19 }
 0x852   : > { %v3035_v12 = vpop.permute.xlu2 %3034 }
 0x853   : > { %v3119_v23 = vsel %vm613_vm1, %v4597_v43, %v3035_v12 }
 0x854   : > { %3814 = vmatmul.msk.f32.gmra.mxu0 %vm3153_vm2, %v5157_v0  ;;  %v3127_v60 = vsel %vm503_vm0, %v3119_v23, %v3067_v1  ;;  %v5215_v23 = vld [vmem:[#allocation2] ss:$0 sm:$0xff] }
 0x855   : > { %v3105_v50 = vpop.permute.xlu0 %3104 }
 0x856   : > { %v5165_v28 = vsel %vm3132_vm14, %v3130_v53, %v3105_v50 }
 0x857   : > { %3818 = vmatmul.msk.f32.vlgmr.msra.gmra.mxu3 %vm3153_vm2, %v5165_v28 }
 0x85a   : > { %v3099_v17 = vpop.permute.xlu2 %3098 }
 0x85b   : > { %v5173_v31 = vsel %vm3132_vm14, %v3127_v60, %v3099_v17 }
 0x85c   : > { %3815 = vmatmul.msk.f32.gmra.mxu0 %vm3153_vm2, %v5173_v31 }
 0x85d   : > { %v3039_v20 = vpop.permute.xlu0 %3038 }
 0x85e   : > { %v3121_v2 = vsel %vm613_vm1, %v4601_v44, %v3039_v20  ;;  %v3950_v44 = vld [vmem:[%s5327_s6] ss:$0 sm:$0xff]  ;;  %vm3291_vm1 = vcmask 7168  }
 0x85f   : > { %v3129_v14 = vsel %vm503_vm0, %v3121_v2, %v3071_v42 }
 0x865   : > { %v3101_v43 = vpop.permute.xlu0 %3100 }
 0x866   : > { %v5181_v57 = vsel %vm3132_vm14, %v3128_v52, %v3101_v43 }
 0x867   : > { %3816 = vmatmul.msk.f32.vlgmr.msra.gmra.mxu2 %vm3153_vm2, %v5181_v57 }
 0x86d   : > { %v3103_v36 = vpop.permute.xlu0 %3102 }
 0x86e   : > { %v5189_v26 = vsel %vm3132_vm14, %v3129_v14, %v3103_v36 }
 0x86f   : > { %3817 = vmatmul.msk.f32.gmra.mxu2 %vm3153_vm2, %v5189_v26 }
 0x875   : > { %v3107_v58 = vpop.permute.xlu0 %3106 }
 0x876   : > { %v5197_v59 = vsel %vm3132_vm14, %v3131_v22, %v3107_v58 }
 0x877   : > { %3819 = vmatmul.msk.f32.gmra.mxu3 %vm3153_vm2, %v5197_v59 }
 0x8c1   : > { %v3195_v29 = vpop.f32.mrf.mxu0 }
 0x8c2   : > { %v3196_v34 = vadd.f32 %v3950_v44, %v3195_v29 }
 0x8c4   : > { %4081 = vtanh.f32 %v3196_v34 }
 0x8c9   : > { %v3198_v38 = vpop.f32.mrf.mxu0 }
 0x8ca   : > { %v4082_v9 = vpop.eup %4081  ;;  %v3199_v10 = vadd.f32 %v3950_v44, %v3198_v38 }
 0x8cb   : > { %v3231_v6 = vmul.f32 %v4082_v9, %v3951_v46 }
 0x8cc   : > { %4083 = vtanh.f32 %v3199_v10 }
 0x8cd   : > { %v3239_v35 = vsel %vm503_vm0, %v3231_v6, 0.0 }
 0x8ce   : > { %3240 = vadd.xlane.f32.xlu0 %v3239_v35 }
 0x8d1   : > { %v3201_v56 = vpop.f32.mrf.mxu0 }
 0x8d2   : > { %v4084_v48 = vpop.eup %4083  ;;  %v3202_v27 = vadd.f32 %v3950_v44, %v3201_v56 }
 0x8d3   : > { %v3232_v16 = vmul.f32 %v4084_v48, %v3951_v46 }
 0x8d5   : > { %v3242_v49 = vsel %vm503_vm0, %v3232_v16, 0.0 }
 0x8d6   : > { %3243 = vadd.xlane.f32.xlu1 %v3242_v49 }
 0x8d9   : > { %v3204_v54 = vpop.f32.mrf.mxu0 }
 0x8da   : > { %v3205_v47 = vadd.f32 %v3950_v44, %v3204_v54  ;;  %v3213_v61 = vpop.f32.mrf.mxu3 }
 0x8db   : > { %v3214_v8 = vadd.f32 %v3950_v44, %v3213_v61 }
 0x8dc   : > { %4085 = vtanh.f32 %v3205_v47 }
 0x8dd   : > { %4087 = vtanh.f32 %v3214_v8 }
 0x8e2   : > { %v4086_v30 = vpop.eup %4085 }
 0x8e3   : > { %v3234_v55 = vmul.f32 %v4086_v30, %v3951_v46  ;;  %v4088_v13 = vpop.eup %4087 }
 0x8e4   : > { %v3237_v21 = vmul.f32 %v4088_v13, %v3951_v46 }
 0x8e5   : > { %v3248_v7 = vsel %vm503_vm0, %v3234_v55, 0.0 }
 0x8e6   : > { %3249 = vadd.xlane.f32.xlu0 %v3248_v7  ;;  %v3257_v63 = vsel %vm503_vm0, %v3237_v21, 0.0 }
 0x8ea   : > { %v3207_v11 = vpop.f32.mrf.mxu2 }
 0x8eb   : > { %v3208_v40 = vadd.f32 %v3950_v44, %v3207_v11 }
 0x8ed   : > { %4089 = vtanh.f32 %v3208_v40 }
 0x8ee   : > { %3258 = vadd.xlane.f32.xlu0 %v3257_v63  ;;  %4091 = vtanh.f32 %v3202_v27 }
 0x8f2   : > { %v3210_v51 = vpop.f32.mrf.mxu2 }
 0x8f3   : > { %v4090_v45 = vpop.eup %4089  ;;  %v3211_v15 = vadd.f32 %v3950_v44, %v3210_v51 }
 0x8f4   : > { %v3235_v18 = vmul.f32 %v4090_v45, %v3951_v46  ;;  %v4092_v24 = vpop.eup %4091 }
 0x8f5   : > { %4093 = vtanh.f32 %v3211_v15  ;;  %v3233_v3 = vmul.f32 %v4092_v24, %v3951_v46 }
 0x8f6   : > { %v3251_v42 = vsel %vm503_vm0, %v3235_v18, 0.0 }
 0x8f7   : > { %3252 = vadd.xlane.f32.xlu2 %v3251_v42  ;;  %v3245_v5 = vsel %vm503_vm0, %v3233_v3, 0.0 }
 0x8fa   : > { %v3216_v4 = vpop.f32.mrf.mxu3 }
 0x8fb   : > { %v4094_v37 = vpop.eup %4093  ;;  %v3217_v62 = vadd.f32 %v3950_v44, %v3216_v4 }
 0x8fc   : > { %v3236_v33 = vmul.f32 %v4094_v37, %v3951_v46 }
 0x8fd   : > { %4095 = vtanh.f32 %v3217_v62 }
 0x8fe   : > { %v3254_v12 = vsel %vm503_vm0, %v3236_v33, 0.0 }
 0x8ff   : > { %3246 = vadd.xlane.f32.xlu2 %v3245_v5  ;;  %3255 = vadd.xlane.f32.xlu1 %v3254_v12 }
 0x903   : > { %v4096_v41 = vpop.eup %4095 }
 0x904   : > { %v3238_v53 = vmul.f32 %v4096_v41, %v3951_v46 }
 0x906   : > { %v3260_v50 = vsel %vm503_vm0, %v3238_v53, 0.0 }
 0x907   : > { %3261 = vadd.xlane.f32.xlu2 %v3260_v50 }
 0x941   : > { %v3241_v1 = vpop.xlane.xlu0 %3240 }
 0x942   : > { %v3267_v17 = vadd.f32 %v5215_v23, %v3241_v1 }
 0x944   : > { %v3275_v60 = vmul.f32 1.442695, %v3267_v17 }
 0x946   : > { %4097 = vpow2.f32 %v3275_v60 }
 0x949   : > { %v3244_v20 = vpop.xlane.xlu1 %3243 }
 0x94a   : > { %v3268_v39 = vadd.f32 %v5215_v23, %v3244_v20 }
 0x94c   : > { %v4098_v52 = vpop.eup %4097  ;;  %v3277_v43 = vmul.f32 1.442695, %v3268_v39 }
 0x94d   : > { %v3292_v2 = vsel %vm3291_vm1, %v4098_v52, 0.0 }
 0x94e   : > { %v3293_v36 = vrot.slane %v3292_v2, 4  ;;  %4099 = vpow2.f32 %v3277_v43 }
 0x950   : > { %v3294_v14 = vadd.f32 %v3293_v36, %v3292_v2 }
 0x952   : > { %v3295_v25 = vrot.slane %v3294_v14, 2 }
 0x954   : > { %v5220_v58 = vpop.eup %4099  ;;  %v3296_v22 = vadd.f32 %v3295_v25, %v3294_v14 }
 0x955   : > { %v3299_v44 = vsel %vm3291_vm1, %v5220_v58, 0.0 }
 0x956   : > { %v3297_v29 = vrot.slane %v3296_v22, 1  ;;  %v3300_v34 = vrot.slane %v3299_v44, 4 }
 0x958   : > { %v3298_v46 = vadd.f32 %v3297_v29, %v3296_v22  ;;  %v3301_v38 = vadd.f32 %v3300_v34, %v3299_v44 }
 0x959   : > { %v3250_v9 = vpop.xlane.xlu0 %3249 }
 0x95a   : > { %v3348_v10 = vadd.f32 1e-08, %v3298_v46  ;;  %v3302_v6 = vrot.slane %v3301_v38, 2  ;;  %v3270_v35 = vadd.f32 %v5215_v23, %v3250_v9 }
 0x95c   : > { %4101 = vrcp.f32 %v3348_v10  ;;  %v3303_v56 = vadd.f32 %v3302_v6, %v3301_v38  ;;  %v3281_v48 = vmul.f32 1.442695, %v3270_v35  ;;  %v3367_v40 = vand.u32 2147483648, %v3348_v10 }
 0x95d   : > { %v3365_v63 = vand.u32 2147483647, %v3348_v10  ;;  %vm3361_vm15 = vweird.f32 %v3348_v10 }
 0x95e   : > { %v3304_v16 = vrot.slane %v3303_v56, 1  ;;  %4103 = vpow2.f32 %v3281_v48  ;;  %v3368_v24 = vor.u32 1.1754944e-38, %v3367_v40 }
 0x95f   : > { %vm3366_vm4 = vcmp.eq.f32.partialorder %v3365_v63, 8.507059e+37 }
 0x960   : > { %v3305_v49 = vadd.f32 %v3304_v16, %v3303_v56 }
 0x961   : > { %v3259_v54 = vpop.xlane.xlu0 %3258 }
 0x962   : > { %v4102_v47 = vpop.eup %4101  ;;  %v3349_v61 = vadd.f32 1e-08, %v3305_v49  ;;  %v3273_v8 = vadd.f32 %v5215_v23, %v3259_v54 }
 0x963   : > { %v3357_v30 = vmul.f32 %v4102_v47, %v3348_v10  ;;  %vm3362_vm0 = vweird.f32 %v4102_v47 }
 0x964   : > { %v5226_v55 = vpop.eup %4103  ;;  %4105 = vrcp.f32 %v3349_v61  ;;  %v3287_v7 = vmul.f32 1.442695, %v3273_v8  ;;  %vm3363_vm3 = vmor %vm3361_vm15, %vm3362_vm0  ;;  %v3382_v60 = vand.u32 2147483648, %v3349_v61  ;;  %v3380_v39 = vand.u32 2147483647, %v3349_v61 }
 0x965   : > { %v3313_v13 = vsel %vm3291_vm1, %v5226_v55, 0.0  ;;  %v3358_v21 = vsub.f32 1.0, %v3357_v30  ;;  %vm3376_vm6 = vweird.f32 %v3349_v61 }
 0x966   : > { %v3314_v11 = vrot.slane %v3313_v13, 4  ;;  %4107 = vpow2.f32 %v3287_v7  ;;  %v3383_v29 = vor.u32 1.1754944e-38, %v3382_v60  ;;  %vm3381_vm8 = vcmp.eq.f32.partialorder %v3380_v39, 8.507059e+37 }
 0x967   : > { %v3359_v27 = vmul.f32 %v4102_v47, %v3358_v21 }
 0x968   : > { %v3315_v51 = vadd.f32 %v3314_v11, %v3313_v13 }
 0x969   : > { %v3360_v45 = vadd.f32 %v4102_v47, %v3359_v27 }
 0x96a   : > { %v4106_v15 = vpop.eup %4105  ;;  %v3316_v18 = vrot.slane %v3315_v51, 2  ;;  %v3253_v42 = vpop.xlane.xlu2 %3252 }
 0x96b   : > { %v3271_v4 = vadd.f32 %v5215_v23, %v3253_v42  ;;  %v3364_v3 = vsel %vm3363_vm3, %v4102_v47, %v3360_v45  ;;  %v3372_v37 = vmul.f32 %v4106_v15, %v3349_v61  ;;  %vm3377_vm5 = vweird.f32 %v4106_v15 }
 0x96c   : > { %v5231_v62 = vpop.eup %4107  ;;  %v3317_v33 = vadd.f32 %v3316_v18, %v3315_v51  ;;  %v3369_v5 = vsel %vm3366_vm4, %v3368_v24, %v3364_v3  ;;  %vm3378_vm7 = vmor %vm3376_vm6, %vm3377_vm5 }
 0x96d   : > { %v3334_v12 = vsel %vm3291_vm1, %v5231_v62, 0.0  ;;  %v3283_v41 = vmul.f32 1.442695, %v3271_v4  ;;  %v3370_v53 = vmul.f32 %v4098_v52, %v3369_v5  ;;  %v3373_v50 = vsub.f32 1.0, %v3372_v37 }
 0x96e   : > { %v3318_v1 = vrot.slane %v3317_v33, 1  ;;  %v3335_v17 = vrot.slane %v3334_v12, 4 }
 0x96f   : > { %4109 = vpow2.f32 %v3283_v41  ;;  %3478 = vperm.xlu1 %3892, %v3370_v53   ;;  %v3374_v20 = vmul.f32 %v4106_v15, %v3373_v50 }
 0x970   : > { %v3319_v43 = vadd.f32 %v3318_v1, %v3317_v33  ;;  %v3336_v2 = vadd.f32 %v3335_v17, %v3334_v12 }
 0x971   : > { %v3375_v36 = vadd.f32 %v4106_v15, %v3374_v20 }
 0x972   : > { %v3351_v14 = vadd.f32 1e-08, %v3319_v43  ;;  %v3337_v25 = vrot.slane %v3336_v2, 2  ;;  %v3247_v22 = vpop.xlane.xlu2 %3246  ;;  %v3256_v44 = vpop.xlane.xlu1 %3255 }
 0x973   : > { %v3269_v52 = vadd.f32 %v5215_v23, %v3247_v22  ;;  %v3272_v34 = vadd.f32 %v5215_v23, %v3256_v44  ;;  %v3379_v46 = vsel %vm3378_vm7, %v4106_v15, %v3375_v36 }
 0x974   : > { %4111 = vrcp.f32 %v3351_v14  ;;  %v3338_v38 = vadd.f32 %v3337_v25, %v3336_v2  ;;  %v3384_v9 = vsel %vm3381_vm8, %v3383_v29, %v3379_v46  ;;  %v3412_v45 = vand.u32 2147483648, %v3351_v14 }
 0x975   : > { %v5237_v10 = vpop.eup %4109  ;;  %v3279_v6 = vmul.f32 1.442695, %v3269_v52  ;;  %v3285_v35 = vmul.f32 1.442695, %v3272_v34  ;;  %v3385_v56 = vmul.f32 %v5220_v58, %v3384_v9  ;;  %v3410_v4 = vand.u32 2147483647, %v3351_v14 }
 0x976   : > { %v3339_v48 = vrot.slane %v3338_v38, 1  ;;  %v3320_v16 = vsel %vm3291_vm1, %v5237_v10, 0.0  ;;  %vm3406_vm10 = vweird.f32 %v3351_v14  ;;  %v3413_v50 = vor.u32 1.1754944e-38, %v3412_v45 }
 0x977   : > { %v3321_v49 = vrot.slane %v3320_v16, 4  ;;  %4113 = vpow2.f32 %v3279_v6  ;;  %3483 = vperm.xlu0 %3891, %v3385_v56   ;;  %vm3411_vm12 = vcmp.eq.f32.partialorder %v3410_v4, 8.507059e+37 }
 0x978   : > { %v3340_v54 = vadd.f32 %v3339_v48, %v3338_v38  ;;  %4115 = vpow2.f32 %v3285_v35 }
 0x979   : > { %v3322_v47 = vadd.f32 %v3321_v49, %v3320_v16 }
 0x97a   : > { %v4112_v61 = vpop.eup %4111  ;;  %v5242_v8 = vadd.f32 1e-08, %v3340_v54  ;;  %v3262_v30 = vpop.xlane.xlu2 %3261 }
 0x97b   : > { %v3323_v7 = vrot.slane %v3322_v47, 2  ;;  %v3274_v13 = vadd.f32 %v5215_v23, %v3262_v30  ;;  %v3402_v21 = vmul.f32 %v4112_v61, %v3351_v14  ;;  %vm3407_vm9 = vweird.f32 %v4112_v61 }
 0x97c   : > { %4117 = vrcp.f32 %v5242_v8  ;;  %vm3408_vm11 = vmor %vm3406_vm10, %vm3407_vm9  ;;  %v3455_v20 = vand.u32 2147483647, %v5242_v8  ;;  %v3457_v44 = vand.u32 2147483648, %v5242_v8  ;;  %vm3451_vm14 = vweird.f32 %v5242_v8 }
 0x97d   : > { %v5246_v58 = vpop.eup %4113  ;;  %v3324_v11 = vadd.f32 %v3323_v7, %v3322_v47  ;;  %v3289_v40 = vmul.f32 1.442695, %v3274_v13  ;;  %v3403_v27 = vsub.f32 1.0, %v3402_v21 }
 0x97e   : > { %v5248_v63 = vpop.eup %4115  ;;  %v3306_v51 = vsel %vm3291_vm1, %v5246_v58, 0.0  ;;  %v3458_v56 = vor.u32 1.1754944e-38, %v3457_v44 }
 0x97f   : > { %v3325_v15 = vrot.slane %v3324_v11, 1  ;;  %v3307_v18 = vrot.slane %v3306_v51, 4  ;;  %v3327_v42 = vsel %vm3291_vm1, %v5248_v63, 0.0  ;;  %4119 = vpow2.f32 %v3289_v40 }
 0x980   : > { %v3328_v23 = vrot.slane %v3327_v42, 4  ;;  %v3404_v24 = vmul.f32 %v4112_v61, %v3403_v27 }
 0x981   : > { %v3326_v3 = vadd.f32 %v3325_v15, %v3324_v11  ;;  %v3308_v37 = vadd.f32 %v3307_v18, %v3306_v51 }
 0x982   : > { %v4118_v33 = vpop.eup %4117  ;;  %v3329_v5 = vadd.f32 %v3328_v23, %v3327_v42  ;;  %v3405_v12 = vadd.f32 %v4112_v61, %v3404_v24 }
 0x983   : > { %v3352_v41 = vadd.f32 1e-08, %v3326_v3  ;;  %v3309_v53 = vrot.slane %v3308_v37, 2  ;;  %v3447_v1 = vmul.f32 %v4118_v33, %v5242_v8  ;;  %vm3452_vm13 = vweird.f32 %v4118_v33 }
 0x984   : > { %v3330_v17 = vrot.slane %v3329_v5, 2  ;;  %v3409_v60 = vsel %vm3408_vm11, %v4112_v61, %v3405_v12  ;;  %vm3453_vm0 = vmor %vm3451_vm14, %vm3452_vm13 }
 0x985   : > { %v5256_v39 = vpop.eup %4119  ;;  %4121 = vrcp.f32 %v3352_v41  ;;  %v3310_v43 = vadd.f32 %v3309_v53, %v3308_v37  ;;  %v3414_v2 = vsel %vm3411_vm12, %v3413_v50, %v3409_v60  ;;  %v3448_v36 = vsub.f32 1.0, %v3447_v1 }
 0x986   : > { %v3331_v25 = vadd.f32 %v3330_v17, %v3329_v5  ;;  %v3341_v14 = vsel %vm3291_vm1, %v5256_v39, 0.0  ;;  %v3415_v22 = vmul.f32 %v5226_v55, %v3414_v2  ;;  %vm3456_vm1 = vcmp.eq.f32.partialorder %v3455_v20, 8.507059e+37 }
 0x987   : > { %v3311_v29 = vrot.slane %v3310_v43, 1  ;;  %v3342_v52 = vrot.slane %v3341_v14, 4  ;;  %v3449_v34 = vmul.f32 %v4118_v33, %v3448_v36  ;;  %v3427_v11 = vand.u32 2147483648, %v3352_v41 }
 0x988   : > { %v3332_v46 = vrot.slane %v3331_v25, 1  ;;  %3493 = vperm.xlu0 %3891, %v3415_v22   ;;  %v3425_v40 = vand.u32 2147483647, %v3352_v41  ;;  %vm3421_vm3 = vweird.f32 %v3352_v41 }
 0x989   : > { %v3312_v38 = vadd.f32 %v3311_v29, %v3310_v43  ;;  %v3343_v9 = vadd.f32 %v3342_v52, %v3341_v14  ;;  %v3450_v6 = vadd.f32 %v4118_v33, %v3449_v34  ;;  %v3428_v18 = vor.u32 1.1754944e-38, %v3427_v11 }
 0x98a   : > { %v3333_v35 = vadd.f32 %v3332_v46, %v3331_v25  ;;  %vm3426_vm5 = vcmp.eq.f32.partialorder %v3425_v40, 8.507059e+37 }
 0x98b   : > { %v4122_v48 = vpop.eup %4121  ;;  %v3350_v16 = vadd.f32 1e-08, %v3312_v38  ;;  %v3344_v49 = vrot.slane %v3343_v9, 2  ;;  %v3454_v55 = vsel %vm3453_vm0, %v4118_v33, %v3450_v6 }
 0x98c   : > { %v3353_v54 = vadd.f32 1e-08, %v3333_v35  ;;  %v3459_v47 = vsel %vm3456_vm1, %v3458_v56, %v3454_v55  ;;  %v3417_v61 = vmul.f32 %v4122_v48, %v3352_v41  ;;  %vm3422_vm15 = vweird.f32 %v4122_v48 }
 0x98d   : > { %4123 = vrcp.f32 %v3350_v16  ;;  %v3345_v30 = vadd.f32 %v3344_v49, %v3343_v9  ;;  %v3460_v7 = vmul.f32 %v5231_v62, %v3459_v47  ;;  %vm3423_vm4 = vmor %vm3421_vm3, %vm3422_vm15  ;;  %v3395_v33 = vand.u32 2147483647, %v3350_v16 }
 0x98e   : > { %4125 = vrcp.f32 %v3353_v54  ;;  %v3418_v13 = vsub.f32 1.0, %v3417_v61  ;;  %v3397_v5 = vand.u32 2147483648, %v3350_v16  ;;  %vm3391_vm7 = vweird.f32 %v3350_v16 }
 0x98f   : > { %v3346_v21 = vrot.slane %v3345_v30, 1  ;;  %vm3396_vm9 = vcmp.eq.f32.partialorder %v3395_v33, 8.507059e+37  ;;  %vm3436_vm11 = vweird.f32 %v3353_v54  ;;  %v3440_v25 = vand.u32 2147483647, %v3353_v54 }
 0x990   : > { %3508 = vperm.xlu0 %3891, %v3460_v7   ;;  %v3419_v8 = vmul.f32 %v4122_v48, %v3418_v13  ;;  %v3398_v17 = vor.u32 1.1754944e-38, %v3397_v5  ;;  %vm3588_vm3 = vcmask 1041409  }
 0x991   : > { %v3347_v27 = vadd.f32 %v3346_v21, %v3345_v30  ;;  %vm3441_vm14 = vcmp.eq.f32.partialorder %v3440_v25, 8.507059e+37 }
 0x992   : > { %v3420_v51 = vadd.f32 %v4122_v48, %v3419_v8 }
 0x993   : > { %v4124_v45 = vpop.eup %4123  ;;  %v3355_v15 = vadd.f32 1e-08, %v3347_v27 }
 0x994   : > { %v4126_v42 = vpop.eup %4125  ;;  %v3424_v23 = vsel %vm3423_vm4, %v4122_v48, %v3420_v51  ;;  %v3387_v24 = vmul.f32 %v4124_v45, %v3350_v16  ;;  %vm3392_vm6 = vweird.f32 %v4124_v45  ;;  %vm3590_vm4 = vcmask 1042434  }
 0x995   : > { %4127 = vrcp.f32 %v3355_v15  ;;  %v3429_v62 = vsel %vm3426_vm5, %v3428_v18, %v3424_v23  ;;  %v3432_v4 = vmul.f32 %v4126_v42, %v3353_v54  ;;  %vm3393_vm8 = vmor %vm3391_vm7, %vm3392_vm6  ;;  %vm3437_vm10 = vweird.f32 %v4126_v42 }
 0x996   : > { %v3430_v3 = vmul.f32 %v5237_v10, %v3429_v62  ;;  %v3388_v37 = vsub.f32 1.0, %v3387_v24  ;;  %v3442_v10 = vand.u32 2147483648, %v3353_v54  ;;  %vm3438_vm12 = vmor %vm3436_vm11, %vm3437_vm10  ;;  %v3472_v22 = vand.u32 2147483648, %v3355_v15 }
 0x997   : > { %v3433_v12 = vsub.f32 1.0, %v3432_v4  ;;  %v3470_v52 = vand.u32 2147483647, %v3355_v15  ;;  %vm3466_vm0 = vweird.f32 %v3355_v15  ;;  %vm3592_vm5 = vcmask 1043459  }
 0x998   : > { %3498 = vperm.xlu1 %3892, %v3430_v3   ;;  %v3389_v53 = vmul.f32 %v4124_v45, %v3388_v37  ;;  %v3443_v34 = vor.u32 1.1754944e-38, %v3442_v10  ;;  %v3473_v9 = vor.u32 1.1754944e-38, %v3472_v22  ;;  %vm3594_vm6 = vcmask 1044484  }
 0x999   : > { %v3434_v41 = vmul.f32 %v4126_v42, %v3433_v12  ;;  %vm3471_vm15 = vcmp.eq.f32.partialorder %v3470_v52, 8.507059e+37  ;;  %vm3596_vm7 = vcmask 1045509  }
 0x99a   : > { %v3390_v50 = vadd.f32 %v4124_v45, %v3389_v53 }
 0x99b   : > { %v4128_v1 = vpop.eup %4127  ;;  %v3435_v20 = vadd.f32 %v4126_v42, %v3434_v41 }
 0x99c   : > { %v3394_v60 = vsel %vm3393_vm8, %v4124_v45, %v3390_v50  ;;  %v3462_v43 = vmul.f32 %v4128_v1, %v3355_v15  ;;  %vm3467_vm13 = vweird.f32 %v4128_v1  ;;  %vm3598_vm8 = vcmask 1046534  }
 0x99d   : > { %v3399_v2 = vsel %vm3396_vm9, %v3398_v17, %v3394_v60  ;;  %v3439_v44 = vsel %vm3438_vm12, %v4126_v42, %v3435_v20  ;;  %vm3468_vm1 = vmor %vm3466_vm0, %vm3467_vm13  ;;  %vm3600_vm9 = vcmask 1047559  }
 0x99e   : > { %v3400_v36 = vmul.f32 %v5246_v58, %v3399_v2  ;;  %v3463_v14 = vsub.f32 1.0, %v3462_v43  ;;  %v3444_v38 = vsel %vm3441_vm14, %v3443_v34, %v3439_v44 }
 0x99f   : > { %v3445_v35 = vmul.f32 %v5248_v63, %v3444_v38 }
 0x9a0   : > { %3488 = vperm.xlu2 %3893, %v3400_v36   ;;  %v3464_v29 = vmul.f32 %v4128_v1, %v3463_v14 }
 0x9a2   : > { %v3465_v46 = vadd.f32 %v4128_v1, %v3464_v29 }
 0x9a4   : > { %v3469_v6 = vsel %vm3468_vm1, %v4128_v1, %v3465_v46 }
 0x9a5   : > { %v3474_v58 = vsel %vm3471_vm15, %v3473_v9, %v3469_v6 }
 0x9a6   : > { %v3475_v56 = vmul.f32 %v5256_v39, %v3474_v58 }
 0x9a8   : > { %3503 = vperm.xlu2 %3893, %v3445_v35   ;;  %3513 = vperm.xlu1 %3892, %v3475_v56  }
 0x9e1   : > { %v3479_v49 = vpop.permute.xlu1 %3478 }
 0x9e2   : > { %v3516_v47 = vmul.f32 %v3479_v49, %v5141_v32 }
 0x9e4   : > { %v3524_v7 = vsel %vm3153_vm2, %v3516_v47, 0.0 }
 0x9e5   : > { %v3525_v11 = vrot.slane %v3524_v7, 4 }
 0x9e9   : > { %v3484_v48 = vpop.permute.xlu0 %3483 }
 0x9ea   : > { %v3517_v55 = vmul.f32 %v3484_v48, %v5149_v19 }
 0x9ec   : > { %v3531_v30 = vsel %vm3153_vm2, %v3517_v55, 0.0 }
 0x9ed   : > { %v3532_v13 = vrot.slane %v3531_v30, 4 }
 0x9ef   : > { %v3533_v32 = vadd.f32 %v3532_v13, %v3531_v30 }
 0x9f1   : > { %v3534_v24 = vrot.slane %v3533_v32, 2 }
 0x9f3   : > { %v3535_v12 = vadd.f32 %v3534_v24, %v3533_v32 }
 0x9f5   : > { %v3536_v17 = vrot.slane %v3535_v12, 1 }
 0x9f7   : > { %v3537_v25 = vadd.f32 %v3536_v17, %v3535_v12 }
 0x9fa   : > { %v3489_v16 = vpop.permute.xlu2 %3488  ;;  %v3494_v54 = vpop.permute.xlu0 %3493 }
 0x9fb   : > { %v3518_v61 = vmul.f32 %v3489_v16, %v5157_v0  ;;  %v3519_v39 = vmul.f32 %v3494_v54, %v5173_v31  ;;  %v3526_v0 = vadd.f32 %v3525_v11, %v3524_v7 }
 0x9fd   : > { %v3538_v63 = vsel %vm3153_vm2, %v3518_v61, 0.0  ;;  %v3545_v40 = vsel %vm3153_vm2, %v3519_v39, 0.0  ;;  %v3527_v4 = vrot.slane %v3526_v0, 2 }
 0x9fe   : > { %v3539_v8 = vrot.slane %v3538_v63, 4  ;;  %v3546_v18 = vrot.slane %v3545_v40, 4 }
 0x9ff   : > { %v3528_v50 = vadd.f32 %v3527_v4, %v3526_v0 }
 0xa00   : > { %v3540_v45 = vadd.f32 %v3539_v8, %v3538_v63  ;;  %v3547_v37 = vadd.f32 %v3546_v18, %v3545_v40 }
 0xa01   : > { %v3529_v2 = vrot.slane %v3528_v50, 1 }
 0xa02   : > { %v3504_v21 = vpop.permute.xlu2 %3503  ;;  %v3509_v19 = vpop.permute.xlu0 %3508  ;;  %v3541_v3 = vrot.slane %v3540_v45, 2  ;;  %v3548_v1 = vrot.slane %v3547_v37, 2 }
 0xa03   : > { %v3521_v27 = vmul.f32 %v3504_v21, %v5189_v26  ;;  %v3522_v42 = vmul.f32 %v3509_v19, %v5165_v28  ;;  %v3530_v34 = vadd.f32 %v3529_v2, %v3528_v50 }
 0xa04   : > { %v3542_v53 = vadd.f32 %v3541_v3, %v3540_v45  ;;  %v3549_v10 = vadd.f32 %v3548_v1, %v3547_v37 }
 0xa05   : > { %v3559_v31 = vsel %vm3153_vm2, %v3521_v27, 0.0  ;;  %v3566_v26 = vsel %vm3153_vm2, %v3522_v42, 0.0  ;;  %v3589_v6 = vsel %vm3588_vm3, %v3537_v25, %v3530_v34 }
 0xa06   : > { %v3560_v33 = vrot.slane %v3559_v31, 4  ;;  %v3567_v41 = vrot.slane %v3566_v26, 4  ;;  %v3543_v60 = vrot.slane %v3542_v53, 1  ;;  %v3550_v46 = vrot.slane %v3549_v10, 1 }
 0xa08   : > { %v3561_v28 = vadd.f32 %v3560_v33, %v3559_v31  ;;  %v3568_v20 = vadd.f32 %v3567_v41, %v3566_v26  ;;  %v3544_v22 = vadd.f32 %v3543_v60, %v3542_v53  ;;  %v3551_v16 = vadd.f32 %v3550_v46, %v3549_v10 }
 0xa0a   : > { %v3499_v51 = vpop.permute.xlu1 %3498  ;;  %v3562_v36 = vrot.slane %v3561_v28, 2  ;;  %v3569_v44 = vrot.slane %v3568_v20, 2  ;;  %v3591_v35 = vsel %vm3590_vm4, %v3544_v22, %v3589_v6 }
 0xa0b   : > { %v3520_v15 = vmul.f32 %v3499_v51, %v5181_v57 }
 0xa0c   : > { %v3563_v38 = vadd.f32 %v3562_v36, %v3561_v28  ;;  %v3570_v56 = vadd.f32 %v3569_v44, %v3568_v20 }
 0xa0d   : > { %v3552_v23 = vsel %vm3153_vm2, %v3520_v15, 0.0 }
 0xa0e   : > { %v3553_v62 = vrot.slane %v3552_v23, 4  ;;  %v3564_v49 = vrot.slane %v3563_v38, 1  ;;  %v3571_v47 = vrot.slane %v3570_v56, 1 }
 0xa10   : > { %v3554_v5 = vadd.f32 %v3553_v62, %v3552_v23  ;;  %v3565_v30 = vadd.f32 %v3564_v49, %v3563_v38  ;;  %v3572_v13 = vadd.f32 %v3571_v47, %v3570_v56 }
 0xa12   : > { %v3555_v57 = vrot.slane %v3554_v5, 2 }
 0xa14   : > { %v3556_v43 = vadd.f32 %v3555_v57, %v3554_v5 }
 0xa16   : > { %v3557_v29 = vrot.slane %v3556_v43, 1 }
 0xa18   : > { %v3558_v48 = vadd.f32 %v3557_v29, %v3556_v43 }
 0xa1a   : > { %v3514_v14 = vpop.permute.xlu1 %3513 }
 0xa1b   : > { %v3523_v52 = vmul.f32 %v3514_v14, %v5197_v59  ;;  %v3593_v59 = vsel %vm3592_vm5, %v3551_v16, %v3591_v35 }
 0xa1c   : > { %v3595_v61 = vsel %vm3594_vm6, %v3558_v48, %v3593_v59 }
 0xa1d   : > { %v3573_v9 = vsel %vm3153_vm2, %v3523_v52, 0.0  ;;  %v3597_v39 = vsel %vm3596_vm7, %v3565_v30, %v3595_v61 }
 0xa1e   : > { %v3574_v58 = vrot.slane %v3573_v9, 4  ;;  %v3599_v11 = vsel %vm3598_vm8, %v3572_v13, %v3597_v39 }
 0xa20   : > { %v3575_v55 = vadd.f32 %v3574_v58, %v3573_v9 }
 0xa22   : > { %v3576_v54 = vrot.slane %v3575_v55, 2 }
 0xa24   : > { %v3577_v7 = vadd.f32 %v3576_v54, %v3575_v55 }
 0xa26   : > { %v3578_v63 = vrot.slane %v3577_v7, 1 }
 0xa28   : > { %v3579_v21 = vadd.f32 %v3578_v63, %v3577_v7 }
 0xa2a   : > { %v3601_v8 = vsel %vm3600_vm9, %v3579_v21, %v3599_v11 }
 0xa2b   : > { %3603 = vst.msk [vmem:[%s344_s15] sm:$0xff] %vm3153_vm2, %v3601_v8 }
 0xa2c   : > { %4156 = shalt.err (!%p4153_p3)
}
 0xa2d   : > { %3844 = dma.vmem_to_hbm [thread:$0]  (%p4289_p5), %s3618_s17, 128, %s3620_s18, %s3605_s22  }
 0xa2e PF: > { %p3850_p4 = scmp.ge.s32.totalorder %s4191_s14, 2  ;;  %s3631_s28 = sand.u32 1, %s4179_s11  }
 0xa2f   : > { %s3632_s30 = scalar_lea.sflag [#allocation4], %s3631_s28 }
 0xa30   : > { %p3847_p7 = pnand %p3850_p4, %p4293_p6 }
 0xa32   : > { %p3848_p8 = pneg %p3847_p7 }
 0xa34   : > { %4174 = dma.done.wait (%p3848_p8), %s3632_s30, 128  }
 0xa35   : > { %4176 = vsyncadd (%p3848_p8), %s3632_s30, 4294967168  ;;  %p21_p9 = scmp.ge.s32.totalorder %s4277_s16, 4   ;;  %s5351_s11 = smov %s4183_s12 }
 0xa36   : > { %s5352_s12 = smov %s4187_s13  ;;  %s5353_s13 = smov %s4287_s19 }
 0xa37   : > { %s5354_s14 = smov %s4277_s16  ;;  %23 = sbr.rel (!%p21_p9) target bundleno = 6 (0x6), region = 94 }
 0xa3c   :  { %3638 = vsyncpa [#allocation4], 1 }
 0xa3d   :  { %3640 = vsyncpa [#allocation4 + $0x1], 1 }

</bundles_post_ra>
